<compile_context>
chip_gen: v7x
topology: tpu7x:2x2x1
jax: 0.10.0
libtpu: 0.0.40
codegen_flags: <defaults>
</compile_context>

<pallas_src>
import functools

import jax
import jax.numpy as jnp
import numpy as np
from jax import lax
from jax.experimental import pallas as pl
from jax.experimental.pallas import tpu as pltpu


def _round_up(x, m):
    return ((x + m - 1) // m) * m


# -----------------------------------------------------------------------------
# Constant matrices (built once in the wrapper, VMEM-resident across the grid).
# -----------------------------------------------------------------------------
def _upsample_matrix_1d(n):
    """(2n, n) bilinear 2x upsample matrix, PyTorch align_corners=False."""
    u = np.zeros((2 * n, n), np.float32)
    for i in range(n):
        u[2 * i, i] += 0.75
        u[2 * i, max(i - 1, 0)] += 0.25
        u[2 * i + 1, i] += 0.75
        u[2 * i + 1, min(i + 1, n - 1)] += 0.25
    return u


def _make_upsample_matrix(H, W):
    """(H2*W2, H*W) right-multiply matrix: flat(h_d) @ M == flat(bilinear 2x)."""
    uh = _upsample_matrix_1d(H // 2)            # (H, H2)
    uw = _upsample_matrix_1d(W // 2)            # (W, W2)
    return np.kron(uh.T, uw.T).astype(np.float32)


def _make_pool_decimation(H, W):
    """(H*W, H2*W2) 0/1 matrix selecting flat positions (2*r2, 2*c2)."""
    H2, W2 = H // 2, W // 2
    d = np.zeros((H * W, H2 * W2), np.float32)
    for r2 in range(H2):
        for c2 in range(W2):
            d[(2 * r2) * W + 2 * c2, r2 * W2 + c2] = 1.0
    return d


# -----------------------------------------------------------------------------
# In-kernel helpers.
# -----------------------------------------------------------------------------
def _shift_flat(x, d, S):
    """y[:, p] = x[:, (p + d) mod S] for a (C, S) value, static d != 0."""
    if d > 0:
        return jnp.concatenate([x[:, d:], x[:, :d]], axis=1)
    dd = -d
    return jnp.concatenate([x[:, S - dd:], x[:, :S - dd]], axis=1)


def _conv3x3_flat_gates(xh, w_ref, b_ref, H, W):
    """3x3 zero-padded conv over a flat-spatial (Cio, H*W) bf16 slab, computed
    as 9 shift-and-matmul MXU accumulations with all 4 gates fused on N.

    w_ref: (9, Cout4, Cio) bf16 with tap k = kh*3 + kw;  b_ref: (Cout4, 1) f32.
    Returns (Cout4, H*W) f32 pre-activations.
    """
    S = H * W
    lane = lax.broadcasted_iota(jnp.int32, (1, S), 1)
    col = lane % W
    row_ok = {-1: lane >= W, 0: None, 1: lane < (S - W)}
    col_ok = {-1: col >= 1, 0: None, 1: col <= (W - 2)}
    zero = jnp.zeros_like(xh)
    acc = None
    for dr in (-1, 0, 1):
        for dc in (-1, 0, 1):
            k = (dr + 1) * 3 + (dc + 1)
            d = dr * W + dc
            tap = xh if d == 0 else _shift_flat(xh, d, S)
            m = row_ok[dr]
            if col_ok[dc] is not None:
                m = col_ok[dc] if m is None else jnp.logical_and(m, col_ok[dc])
            if m is not None:
                tap = jnp.where(m, tap, zero)
            part = jnp.dot(w_ref[k], tap, preferred_element_type=jnp.float32)
            acc = part if acc is None else acc + part
    return acc + b_ref[...]


# -----------------------------------------------------------------------------
# Fused per-(batch, time) kernel.  Grid = (B, T); T is the recurrence axis.
#   inputs : x      (Cin, S)                current frame, flat spatial
#            w_e    (9, 4*CH_PAD, CIO_E)    encoder conv weights (bf16)
#            b_e    (4*CH_PAD, 1)           encoder bias (f32)
#            w_d    (9, 4*CO_PAD, CIO_D)    decoder conv weights (bf16)
#            b_d    (4*CO_PAD, 1)           decoder bias (f32)
#            dpool  (S, S2)                 0/1 pooling decimation matrix
#            mup    (S2, S)                 bilinear 2x upsample matrix
#   output : out    (1, S)                  upsampled decoder hidden state
#   scratch: xh_e (CIO_E, S) bf16, c_e (CH_PAD, S) f32,
#            xh_d (CIO_D, S2) bf16, c_d (CO_PAD, S2) f32
# -----------------------------------------------------------------------------
def _sst_sal_step_kernel(x_ref, we_ref, be_ref, wd_ref, bd_ref,
                         dpool_ref, mup_ref, out_ref,
                         xh_e_ref, c_e_ref, xh_d_ref, c_d_ref,
                         *, H, W, Cin, CIN_PAD, CH_PAD, COUT_PAD):
    t = pl.program_id(1)
    S = H * W
    H2, W2 = H // 2, W // 2
    CIO_E = CIN_PAD + CH_PAD
    CIO_D = CH_PAD + COUT_PAD

    # ---- t == 0: reset recurrent state (padding channels stay exactly 0) ----
    @pl.when(t == 0)
    def _init():
        xh_e_ref[...] = jnp.zeros_like(xh_e_ref)
        c_e_ref[...] = jnp.zeros_like(c_e_ref)
        xh_d_ref[...] = jnp.zeros_like(xh_d_ref)
        c_d_ref[...] = jnp.zeros_like(c_d_ref)

    # ---- stage current frame into rows [0:CIN_PAD] of the merged x/h slab ----
    x_bf = x_ref[...].astype(jnp.bfloat16)
    if CIN_PAD > Cin:
        x_bf = jnp.concatenate(
            [x_bf, jnp.zeros((CIN_PAD - Cin, S), jnp.bfloat16)], axis=0)
    xh_e_ref[0:CIN_PAD, :] = x_bf

    # ---------------- encoder ConvLSTM cell ----------------
    gates_e = _conv3x3_flat_gates(xh_e_ref[...], we_ref, be_ref, H, W)
    i_e = jax.nn.sigmoid(gates_e[0 * CH_PAD:1 * CH_PAD])
    f_e = jax.nn.sigmoid(gates_e[1 * CH_PAD:2 * CH_PAD])
    o_e = jax.nn.sigmoid(gates_e[2 * CH_PAD:3 * CH_PAD])
    g_e = jnp.tanh(gates_e[3 * CH_PAD:4 * CH_PAD])
    c_e = f_e * c_e_ref[...] + i_e * g_e                    # (CH_PAD, S) f32
    h_e = o_e * jnp.tanh(c_e)
    c_e_ref[...] = c_e
    xh_e_ref[CIN_PAD:CIO_E, :] = h_e.astype(jnp.bfloat16)   # h_t for next step

    # ---------------- 2x2 / stride-2 max pool (planar approximation) ---------
    rowpair = jnp.maximum(h_e, _shift_flat(h_e, W, S))      # max(row r, r+1)
    blkmax = jnp.maximum(rowpair, _shift_flat(rowpair, 1, S))
    pooled = jnp.dot(blkmax, dpool_ref[...],
                     preferred_element_type=jnp.float32)    # (CH_PAD, S2)
    xh_d_ref[0:CH_PAD, :] = pooled.astype(jnp.bfloat16)

    # ---------------- decoder ConvLSTM cell ----------------
    gates_d = _conv3x3_flat_gates(xh_d_ref[...], wd_ref, bd_ref, H2, W2)
    i_d = jax.nn.sigmoid(gates_d[0 * COUT_PAD:1 * COUT_PAD])
    f_d = jax.nn.sigmoid(gates_d[1 * COUT_PAD:2 * COUT_PAD])
    o_d = jax.nn.sigmoid(gates_d[2 * COUT_PAD:3 * COUT_PAD])
    g_d = jnp.tanh(gates_d[3 * COUT_PAD:4 * COUT_PAD])
    c_d = f_d * c_d_ref[...] + i_d * g_d                    # (COUT_PAD, S2)
    h_d = o_d * jnp.tanh(c_d)
    c_d_ref[...] = c_d
    xh_d_ref[CH_PAD:CIO_D, :] = h_d.astype(jnp.bfloat16)

    # ---------------- bilinear 2x upsample via constant matmul ---------------
    up = jnp.dot(h_d, mup_ref[...], preferred_element_type=jnp.float32)  # (COUT_PAD, S)
    out_ref[...] = up[0:1, :].astype(out_ref.dtype)          # lane-dense (1, S)


# -----------------------------------------------------------------------------
# Parameters (created directly in the padded kernel layout).
# -----------------------------------------------------------------------------
def _pack_convlstm_weights(w, b, *, cout, cout_pad, cin_pad_total, in_groups):
    """Pack a PyTorch-style ConvLSTM conv weight into the kernel layout.

    w: (4*cout, cin_total, 3, 3) with gates ordered [i, f, o, g] along out
       channels (the torch.split order);  b: (4*cout,).
    in_groups: (src_start, length, dst_start) groups mapping the
       torch.cat([...], dim=1) input-channel order onto padded kernel slots.
    Returns w_k (9, 4*cout_pad, cin_pad_total) bf16 (tap k = kh*3 + kw) and
            b_k (4*cout_pad, 1) f32; all padding entries are zero.
    """
    cin_total = w.shape[1]
    w5 = w.reshape(4, cout, cin_total, 3, 3)
    w5 = jnp.transpose(w5, (3, 4, 0, 1, 2)).reshape(9, 4, cout, cin_total)
    wk = jnp.zeros((9, 4, cout_pad, cin_pad_total), jnp.float32)
    for src, length, dst in in_groups:
        wk = wk.at[:, :, :cout, dst:dst + length].set(w5[..., src:src + length])
    wk = wk.reshape(9, 4 * cout_pad, cin_pad_total).astype(jnp.bfloat16)
    bk = jnp.zeros((4, cout_pad), jnp.float32).at[:, :cout].set(b.reshape(4, cout))
    return wk, bk.reshape(4 * cout_pad, 1)


def init_params(key, input_dim=3, hidden_dim=36, output_dim=1):
    assert output_dim == 1, "decoder/upsample path assumes a single output map"
    k0, k1, k2, k3 = jax.random.split(key, 4)
    s = 0.05
    cio_e = input_dim + hidden_dim
    cio_d = hidden_dim + output_dim
    enc_w = jax.random.normal(k0, (4 * hidden_dim, cio_e, 3, 3), jnp.float32) * s
    enc_b = jax.random.normal(k1, (4 * hidden_dim,), jnp.float32) * s
    dec_w = jax.random.normal(k2, (4 * output_dim, cio_d, 3, 3), jnp.float32) * s
    dec_b = jax.random.normal(k3, (4 * output_dim,), jnp.float32) * s

    cin_pad = _round_up(input_dim, 8)
    ch_pad = _round_up(hidden_dim, 8)
    cout_pad = _round_up(output_dim, 8)

    enc_wk, enc_bk = _pack_convlstm_weights(
        enc_w, enc_b, cout=hidden_dim, cout_pad=ch_pad,
        cin_pad_total=cin_pad + ch_pad,
        in_groups=[(0, input_dim, 0), (input_dim, hidden_dim, cin_pad)])
    dec_wk, dec_bk = _pack_convlstm_weights(
        dec_w, dec_b, cout=output_dim, cout_pad=cout_pad,
        cin_pad_total=ch_pad + cout_pad,
        in_groups=[(0, hidden_dim, 0), (hidden_dim, output_dim, ch_pad)])
    return {"enc_w": enc_wk, "enc_b": enc_bk, "dec_w": dec_wk, "dec_b": dec_bk}


# -----------------------------------------------------------------------------
# SST_Sal forward: (B, T, C, H, W) -> (B, T, 1, H, W)
# -----------------------------------------------------------------------------
def sst_sal_forward(x, params):
    B, T, Cin, H, W = x.shape
    assert H % 2 == 0 and W % 2 == 0
    S = H * W
    H2, W2 = H // 2, W // 2
    S2 = H2 * W2

    enc_w, enc_b = params["enc_w"], params["enc_b"]
    dec_w, dec_b = params["dec_w"], params["dec_b"]
    CH4, CIO_E = enc_w.shape[1], enc_w.shape[2]
    CH_PAD = CH4 // 4
    CIN_PAD = CIO_E - CH_PAD
    CO4, CIO_D = dec_w.shape[1], dec_w.shape[2]
    COUT_PAD = CO4 // 4
    assert CIO_D == CH_PAD + COUT_PAD and Cin <= CIN_PAD

    # NCHW kept as-is; only a free flatten of the spatial dims in HBM.
    x_flat = x.reshape(B, T, Cin, S)

    dpool = jnp.asarray(_make_pool_decimation(H, W))    # (S, S2) f32
    mup = jnp.asarray(_make_upsample_matrix(H, W))      # (S2, S) f32

    kernel = functools.partial(
        _sst_sal_step_kernel, H=H, W=W, Cin=Cin,
        CIN_PAD=CIN_PAD, CH_PAD=CH_PAD, COUT_PAD=COUT_PAD)

    out = pl.pallas_call(
        kernel,
        out_shape=jax.ShapeDtypeStruct((B, T, 1, S), jnp.float32),
        grid=(B, T),
        in_specs=[
            pl.BlockSpec((None, None, Cin, S), lambda b, t: (b, t, 0, 0)),
            pl.BlockSpec((9, CH4, CIO_E), lambda b, t: (0, 0, 0)),
            pl.BlockSpec((CH4, 1), lambda b, t: (0, 0)),
            pl.BlockSpec((9, CO4, CIO_D), lambda b, t: (0, 0, 0)),
            pl.BlockSpec((CO4, 1), lambda b, t: (0, 0)),
            pl.BlockSpec((S, S2), lambda b, t: (0, 0)),
            pl.BlockSpec((S2, S), lambda b, t: (0, 0)),
        ],
        out_specs=pl.BlockSpec((None, None, 1, S), lambda b, t: (b, t, 0, 0)),
        scratch_shapes=[
            pltpu.VMEM((CIO_E, S), jnp.bfloat16),     # merged [x | h_e] slab
            pltpu.VMEM((CH_PAD, S), jnp.float32),     # c_e
            pltpu.VMEM((CIO_D, S2), jnp.bfloat16),    # merged [enc | h_d] slab
            pltpu.VMEM((COUT_PAD, S2), jnp.float32),  # c_d
        ],
        compiler_params=pltpu.CompilerParams(
            dimension_semantics=("parallel", "arbitrary"),  # B megacore, T seq
            vmem_limit_bytes=32 * 1024 * 1024,
        ),
    )(x_flat, enc_w, enc_b, dec_w, dec_b, dpool, mup)

    # (B, T, 1, H*W) -> (B, T, 1, H, W)   (matches torch.stack(outputs, dim=1))
    return out.reshape(B, T, 1, H, W)


if __name__ == "__main__":
    key = jax.random.PRNGKey(0)
    kx, kp = jax.random.split(key)

    B, T, Cin, H, W = 2, 4, 3, 16, 16
    hidden_dim, output_dim = 36, 1

    x = jax.random.normal(kx, (B, T, Cin, H, W), jnp.float32)
    params = init_params(kp, input_dim=Cin, hidden_dim=hidden_dim,
                         output_dim=output_dim)

    fwd = jax.jit(sst_sal_forward)
    y = fwd(x, params)
    jax.block_until_ready(y)

    assert y.shape == (B, T, output_dim, H, W), y.shape
    assert bool(jnp.all(jnp.isfinite(y)))
    print("KERNEL_OK")
</pallas_src>

<mosaic_0001>
module attributes {stable_mosaic.version = 11 : i64} {
  func.func @_sst_sal_step_kernel(%arg0: i32, %arg1: i32, %arg2: memref<1x1x3x256xf32, #tpu.memory_space<vmem>>, %arg3: memref<9x160x48xbf16, #tpu.memory_space<vmem>>, %arg4: memref<160x1xf32, #tpu.memory_space<vmem>>, %arg5: memref<9x32x48xbf16, #tpu.memory_space<vmem>>, %arg6: memref<32x1xf32, #tpu.memory_space<vmem>>, %arg7: memref<256x64xf32, #tpu.memory_space<vmem>>, %arg8: memref<64x256xf32, #tpu.memory_space<vmem>>, %arg9: memref<1x1x1x256xf32, #tpu.memory_space<vmem>>, %arg10: memref<48x256xbf16, #tpu.memory_space<vmem>>, %arg11: memref<40x256xf32, #tpu.memory_space<vmem>>, %arg12: memref<48x64xbf16, #tpu.memory_space<vmem>>, %arg13: memref<8x64xf32, #tpu.memory_space<vmem>>) attributes {dimension_semantics = [#tpu.dimension_semantics<parallel>, #tpu.dimension_semantics<arbitrary>], iteration_bounds = array<i64: 2, 4>, scalar_prefetch = 0 : i64, scratch_operands = 4 : i64, tpu.core_type = #tpu.core_type<tc>, window_params = [{transform_indices = @transform_0, window_bounds = array<i64: 1, 1, 3, 256>}, {pipeline_mode = #tpu.pipeline_mode<synchronous>, transform_indices = @transform_1, window_bounds = array<i64: 9, 160, 48>}, {pipeline_mode = #tpu.pipeline_mode<synchronous>, transform_indices = @transform_2, window_bounds = array<i64: 160, 1>}, {pipeline_mode = #tpu.pipeline_mode<synchronous>, transform_indices = @transform_3, window_bounds = array<i64: 9, 32, 48>}, {pipeline_mode = #tpu.pipeline_mode<synchronous>, transform_indices = @transform_4, window_bounds = array<i64: 32, 1>}, {pipeline_mode = #tpu.pipeline_mode<synchronous>, transform_indices = @transform_5, window_bounds = array<i64: 256, 64>}, {pipeline_mode = #tpu.pipeline_mode<synchronous>, transform_indices = @transform_6, window_bounds = array<i64: 64, 256>}, {transform_indices = @transform_7, window_bounds = array<i64: 1, 1, 1, 256>}]} {
    %c0_i32 = arith.constant 0 : i32
    %0 = arith.cmpi eq, %arg1, %c0_i32 : i32
    %1 = arith.extui %0 : i1 to i32
    %c0_i32_0 = arith.constant 0 : i32
    %2 = arith.cmpi ne, %1, %c0_i32_0 : i32
    scf.if %2 {
      %cst_122 = arith.constant 0.000000e+00 : bf16
      %319 = vector.broadcast %cst_122 : bf16 to vector<48x256xbf16>
      %c0_123 = arith.constant 0 : index
      %c0_124 = arith.constant 0 : index
      %320 = vector.load %arg10[%c0_123, %c0_124] : memref<48x256xbf16, #tpu.memory_space<vmem>>, vector<48x256xbf16>
      tpu.vector_store %arg10[%c0_123, %c0_124], %319 {strides = array<i32>} : memref<48x256xbf16, #tpu.memory_space<vmem>>, vector<48x256xbf16>,
      %cst_125 = arith.constant 0.000000e+00 : f32
      %321 = vector.broadcast %cst_125 : f32 to vector<40x256xf32>
      %c0_126 = arith.constant 0 : index
      %c0_127 = arith.constant 0 : index
      %322 = vector.load %arg11[%c0_126, %c0_127] : memref<40x256xf32, #tpu.memory_space<vmem>>, vector<40x256xf32>
      tpu.vector_store %arg11[%c0_126, %c0_127], %321 {strides = array<i32>} : memref<40x256xf32, #tpu.memory_space<vmem>>, vector<40x256xf32>,
      %cst_128 = arith.constant 0.000000e+00 : bf16
      %323 = vector.broadcast %cst_128 : bf16 to vector<48x64xbf16>
      %c0_129 = arith.constant 0 : index
      %c0_130 = arith.constant 0 : index
      %324 = vector.load %arg12[%c0_129, %c0_130] : memref<48x64xbf16, #tpu.memory_space<vmem>>, vector<48x64xbf16>
      tpu.vector_store %arg12[%c0_129, %c0_130], %323 {strides = array<i32>} : memref<48x64xbf16, #tpu.memory_space<vmem>>, vector<48x64xbf16>,
      %cst_131 = arith.constant 0.000000e+00 : f32
      %325 = vector.broadcast %cst_131 : f32 to vector<8x64xf32>
      %c0_132 = arith.constant 0 : index
      %c0_133 = arith.constant 0 : index
      %326 = vector.load %arg13[%c0_132, %c0_133] : memref<8x64xf32, #tpu.memory_space<vmem>>, vector<8x64xf32>
      tpu.vector_store %arg13[%c0_132, %c0_133], %325 {strides = array<i32>} : memref<8x64xf32, #tpu.memory_space<vmem>>, vector<8x64xf32>,
    } else {
    }
    %c0 = arith.constant 0 : index
    %c0_1 = arith.constant 0 : index
    %c0_2 = arith.constant 0 : index
    %c0_3 = arith.constant 0 : index
    %3 = vector.load %arg2[%c0, %c0_1, %c0_2, %c0_3] : memref<1x1x3x256xf32, #tpu.memory_space<vmem>>, vector<1x1x3x256xf32>
    %4 = vector.shape_cast %3 : vector<1x1x3x256xf32> to vector<3x256xf32>
    %5 = arith.truncf %4 : vector<3x256xf32> to vector<3x256xbf16>
    %cst = arith.constant 0.000000e+00 : bf16
    %6 = vector.broadcast %cst : bf16 to vector<5x256xbf16>
    %7 = tpu.concatenate %5, %6 in 0 : vector<3x256xbf16>, vector<5x256xbf16> -> vector<8x256xbf16>
    %c0_4 = arith.constant 0 : index
    %c0_5 = arith.constant 0 : index
    %8 = vector.load %arg10[%c0_4, %c0_5] : memref<48x256xbf16, #tpu.memory_space<vmem>>, vector<8x256xbf16>
    tpu.vector_store %arg10[%c0_4, %c0_5], %7 {strides = array<i32>} : memref<48x256xbf16, #tpu.memory_space<vmem>>, vector<8x256xbf16>,
    %c0_6 = arith.constant 0 : index
    %c0_7 = arith.constant 0 : index
    %9 = vector.load %arg10[%c0_6, %c0_7] : memref<48x256xbf16, #tpu.memory_space<vmem>>, vector<48x256xbf16>
    %10 = tpu.iota {dimensions = array<i32: 1>} : vector<1x256xi32>
    %c16_i32 = arith.constant 16 : i32
    %c0_i32_8 = arith.constant 0 : i32
    %11 = arith.cmpi eq, %c16_i32, %c0_i32_8 : i32
    %c1_i32 = arith.constant 1 : i32
    %12 = arith.select %11, %c1_i32, %c16_i32 : i32
    %13 = vector.broadcast %12 : i32 to vector<1x256xi32>
    %14 = arith.remsi %10, %13 : vector<1x256xi32>
    %c0_i32_9 = arith.constant 0 : i32
    %15 = vector.broadcast %c0_i32_9 : i32 to vector<1x256xi32>
    %16 = arith.cmpi ne, %14, %15 : vector<1x256xi32>
    %c0_i32_10 = arith.constant 0 : i32
    %17 = vector.broadcast %c0_i32_10 : i32 to vector<1x256xi32>
    %18 = arith.cmpi slt, %14, %17 : vector<1x256xi32>
    %c0_i32_11 = arith.constant 0 : i32
    %19 = arith.cmpi slt, %12, %c0_i32_11 : i32
    %20 = vector.broadcast %19 : i1 to vector<1x256xi1>
    %21 = vector.broadcast %20 : vector<1x256xi1> to vector<1x256xi1>
    %22 = arith.xori %18, %21 : vector<1x256xi1>
    %23 = arith.andi %22, %16 : vector<1x256xi1>
    %24 = vector.broadcast %12 : i32 to vector<1x256xi32>
    %25 = arith.addi %14, %24 : vector<1x256xi32>
    %26 = arith.select %23, %25, %14 : vector<1x256xi1>, vector<1x256xi32>
    %c16_i32_12 = arith.constant 16 : i32
    %27 = vector.broadcast %c16_i32_12 : i32 to vector<1x256xi32>
    %28 = arith.cmpi sge, %10, %27 : vector<1x256xi32>
    %c240_i32 = arith.constant 240 : i32
    %29 = vector.broadcast %c240_i32 : i32 to vector<1x256xi32>
    %30 = arith.cmpi slt, %10, %29 : vector<1x256xi32>
    %c1_i32_13 = arith.constant 1 : i32
    %31 = vector.broadcast %c1_i32_13 : i32 to vector<1x256xi32>
    %32 = arith.cmpi sge, %26, %31 : vector<1x256xi32>
    %c14_i32 = arith.constant 14 : i32
    %33 = vector.broadcast %c14_i32 : i32 to vector<1x256xi32>
    %34 = arith.cmpi sle, %26, %33 : vector<1x256xi32>
    %cst_14 = arith.constant 0.000000e+00 : bf16
    %35 = vector.broadcast %cst_14 : bf16 to vector<48x256xbf16>
    %36 = vector.extract_strided_slice %9 {offsets = [0, 239], sizes = [48, 17], strides = [1, 1]} : vector<48x256xbf16> to vector<48x17xbf16>
    %37 = vector.extract_strided_slice %9 {offsets = [0, 0], sizes = [48, 239], strides = [1, 1]} : vector<48x256xbf16> to vector<48x239xbf16>
    %38 = tpu.concatenate %36, %37 in 1 : vector<48x17xbf16>, vector<48x239xbf16> -> vector<48x256xbf16>
    %39 = arith.andi %28, %32 : vector<1x256xi1>
    %40 = vector.shape_cast %39 : vector<1x256xi1> to vector<1x256xi1>
    %41 = vector.broadcast %40 : vector<1x256xi1> to vector<48x256xi1>
    %42 = arith.select %41, %38, %35 : vector<48x256xi1>, vector<48x256xbf16>
    %c0_15 = arith.constant 0 : index
    %c0_16 = arith.constant 0 : index
    %c0_17 = arith.constant 0 : index
    %43 = vector.load %arg3[%c0_15, %c0_16, %c0_17] : memref<9x160x48xbf16, #tpu.memory_space<vmem>>, vector<1x160x48xbf16>
    %44 = vector.shape_cast %43 : vector<1x160x48xbf16> to vector<160x48xbf16>
    %cst_18 = arith.constant dense<0.000000e+00> : vector<160x256xf32>
    %45 = tpu.matmul %44, %42, %cst_18 {dimension_numbers = #tpu.dot_dimension_numbers<[1], [0], [0], [1], [0, 0, 1, 1], [], []>} : vector<160x48xbf16>, vector<48x256xbf16>, vector<160x256xf32> -> vector<160x256xf32>
    %46 = vector.extract_strided_slice %9 {offsets = [0, 240], sizes = [48, 16], strides = [1, 1]} : vector<48x256xbf16> to vector<48x16xbf16>
    %47 = vector.extract_strided_slice %9 {offsets = [0, 0], sizes = [48, 240], strides = [1, 1]} : vector<48x256xbf16> to vector<48x240xbf16>
    %48 = tpu.concatenate %46, %47 in 1 : vector<48x16xbf16>, vector<48x240xbf16> -> vector<48x256xbf16>
    %49 = vector.shape_cast %28 : vector<1x256xi1> to vector<1x256xi1>
    %50 = vector.broadcast %49 : vector<1x256xi1> to vector<48x256xi1>
    %51 = arith.select %50, %48, %35 : vector<48x256xi1>, vector<48x256xbf16>
    %c1 = arith.constant 1 : index
    %c0_19 = arith.constant 0 : index
    %c0_20 = arith.constant 0 : index
    %52 = vector.load %arg3[%c1, %c0_19, %c0_20] : memref<9x160x48xbf16, #tpu.memory_space<vmem>>, vector<1x160x48xbf16>
    %53 = vector.shape_cast %52 : vector<1x160x48xbf16> to vector<160x48xbf16>
    %cst_21 = arith.constant dense<0.000000e+00> : vector<160x256xf32>
    %54 = tpu.matmul %53, %51, %cst_21 {dimension_numbers = #tpu.dot_dimension_numbers<[1], [0], [0], [1], [0, 0, 1, 1], [], []>} : vector<160x48xbf16>, vector<48x256xbf16>, vector<160x256xf32> -> vector<160x256xf32>
    %55 = arith.addf %45, %54 : vector<160x256xf32>
    %56 = vector.extract_strided_slice %9 {offsets = [0, 241], sizes = [48, 15], strides = [1, 1]} : vector<48x256xbf16> to vector<48x15xbf16>
    %57 = vector.extract_strided_slice %9 {offsets = [0, 0], sizes = [48, 241], strides = [1, 1]} : vector<48x256xbf16> to vector<48x241xbf16>
    %58 = tpu.concatenate %56, %57 in 1 : vector<48x15xbf16>, vector<48x241xbf16> -> vector<48x256xbf16>
    %59 = arith.andi %28, %34 : vector<1x256xi1>
    %60 = vector.shape_cast %59 : vector<1x256xi1> to vector<1x256xi1>
    %61 = vector.broadcast %60 : vector<1x256xi1> to vector<48x256xi1>
    %62 = arith.select %61, %58, %35 : vector<48x256xi1>, vector<48x256xbf16>
    %c2 = arith.constant 2 : index
    %c0_22 = arith.constant 0 : index
    %c0_23 = arith.constant 0 : index
    %63 = vector.load %arg3[%c2, %c0_22, %c0_23] : memref<9x160x48xbf16, #tpu.memory_space<vmem>>, vector<1x160x48xbf16>
    %64 = vector.shape_cast %63 : vector<1x160x48xbf16> to vector<160x48xbf16>
    %cst_24 = arith.constant dense<0.000000e+00> : vector<160x256xf32>
    %65 = tpu.matmul %64, %62, %cst_24 {dimension_numbers = #tpu.dot_dimension_numbers<[1], [0], [0], [1], [0, 0, 1, 1], [], []>} : vector<160x48xbf16>, vector<48x256xbf16>, vector<160x256xf32> -> vector<160x256xf32>
    %66 = arith.addf %55, %65 : vector<160x256xf32>
    %67 = vector.extract_strided_slice %9 {offsets = [0, 255], sizes = [48, 1], strides = [1, 1]} : vector<48x256xbf16> to vector<48x1xbf16>
    %68 = vector.extract_strided_slice %9 {offsets = [0, 0], sizes = [48, 255], strides = [1, 1]} : vector<48x256xbf16> to vector<48x255xbf16>
    %69 = tpu.concatenate %67, %68 in 1 : vector<48x1xbf16>, vector<48x255xbf16> -> vector<48x256xbf16>
    %70 = vector.shape_cast %32 : vector<1x256xi1> to vector<1x256xi1>
    %71 = vector.broadcast %70 : vector<1x256xi1> to vector<48x256xi1>
    %72 = arith.select %71, %69, %35 : vector<48x256xi1>, vector<48x256xbf16>
    %c3 = arith.constant 3 : index
    %c0_25 = arith.constant 0 : index
    %c0_26 = arith.constant 0 : index
    %73 = vector.load %arg3[%c3, %c0_25, %c0_26] : memref<9x160x48xbf16, #tpu.memory_space<vmem>>, vector<1x160x48xbf16>
    %74 = vector.shape_cast %73 : vector<1x160x48xbf16> to vector<160x48xbf16>
    %cst_27 = arith.constant dense<0.000000e+00> : vector<160x256xf32>
    %75 = tpu.matmul %74, %72, %cst_27 {dimension_numbers = #tpu.dot_dimension_numbers<[1], [0], [0], [1], [0, 0, 1, 1], [], []>} : vector<160x48xbf16>, vector<48x256xbf16>, vector<160x256xf32> -> vector<160x256xf32>
    %76 = arith.addf %66, %75 : vector<160x256xf32>
    %c4 = arith.constant 4 : index
    %c0_28 = arith.constant 0 : index
    %c0_29 = arith.constant 0 : index
    %77 = vector.load %arg3[%c4, %c0_28, %c0_29] : memref<9x160x48xbf16, #tpu.memory_space<vmem>>, vector<1x160x48xbf16>
    %78 = vector.shape_cast %77 : vector<1x160x48xbf16> to vector<160x48xbf16>
    %cst_30 = arith.constant dense<0.000000e+00> : vector<160x256xf32>
    %79 = tpu.matmul %78, %9, %cst_30 {dimension_numbers = #tpu.dot_dimension_numbers<[1], [0], [0], [1], [0, 0, 1, 1], [], []>} : vector<160x48xbf16>, vector<48x256xbf16>, vector<160x256xf32> -> vector<160x256xf32>
    %80 = arith.addf %76, %79 : vector<160x256xf32>
    %81 = vector.extract_strided_slice %9 {offsets = [0, 1], sizes = [48, 255], strides = [1, 1]} : vector<48x256xbf16> to vector<48x255xbf16>
    %82 = vector.extract_strided_slice %9 {offsets = [0, 0], sizes = [48, 1], strides = [1, 1]} : vector<48x256xbf16> to vector<48x1xbf16>
    %83 = tpu.concatenate %81, %82 in 1 : vector<48x255xbf16>, vector<48x1xbf16> -> vector<48x256xbf16>
    %84 = vector.shape_cast %34 : vector<1x256xi1> to vector<1x256xi1>
    %85 = vector.broadcast %84 : vector<1x256xi1> to vector<48x256xi1>
    %86 = arith.select %85, %83, %35 : vector<48x256xi1>, vector<48x256xbf16>
    %c5 = arith.constant 5 : index
    %c0_31 = arith.constant 0 : index
    %c0_32 = arith.constant 0 : index
    %87 = vector.load %arg3[%c5, %c0_31, %c0_32] : memref<9x160x48xbf16, #tpu.memory_space<vmem>>, vector<1x160x48xbf16>
    %88 = vector.shape_cast %87 : vector<1x160x48xbf16> to vector<160x48xbf16>
    %cst_33 = arith.constant dense<0.000000e+00> : vector<160x256xf32>
    %89 = tpu.matmul %88, %86, %cst_33 {dimension_numbers = #tpu.dot_dimension_numbers<[1], [0], [0], [1], [0, 0, 1, 1], [], []>} : vector<160x48xbf16>, vector<48x256xbf16>, vector<160x256xf32> -> vector<160x256xf32>
    %90 = arith.addf %80, %89 : vector<160x256xf32>
    %91 = vector.extract_strided_slice %9 {offsets = [0, 15], sizes = [48, 241], strides = [1, 1]} : vector<48x256xbf16> to vector<48x241xbf16>
    %92 = vector.extract_strided_slice %9 {offsets = [0, 0], sizes = [48, 15], strides = [1, 1]} : vector<48x256xbf16> to vector<48x15xbf16>
    %93 = tpu.concatenate %91, %92 in 1 : vector<48x241xbf16>, vector<48x15xbf16> -> vector<48x256xbf16>
    %94 = arith.andi %30, %32 : vector<1x256xi1>
    %95 = vector.shape_cast %94 : vector<1x256xi1> to vector<1x256xi1>
    %96 = vector.broadcast %95 : vector<1x256xi1> to vector<48x256xi1>
    %97 = arith.select %96, %93, %35 : vector<48x256xi1>, vector<48x256xbf16>
    %c6 = arith.constant 6 : index
    %c0_34 = arith.constant 0 : index
    %c0_35 = arith.constant 0 : index
    %98 = vector.load %arg3[%c6, %c0_34, %c0_35] : memref<9x160x48xbf16, #tpu.memory_space<vmem>>, vector<1x160x48xbf16>
    %99 = vector.shape_cast %98 : vector<1x160x48xbf16> to vector<160x48xbf16>
    %cst_36 = arith.constant dense<0.000000e+00> : vector<160x256xf32>
    %100 = tpu.matmul %99, %97, %cst_36 {dimension_numbers = #tpu.dot_dimension_numbers<[1], [0], [0], [1], [0, 0, 1, 1], [], []>} : vector<160x48xbf16>, vector<48x256xbf16>, vector<160x256xf32> -> vector<160x256xf32>
    %101 = arith.addf %90, %100 : vector<160x256xf32>
    %102 = vector.extract_strided_slice %9 {offsets = [0, 16], sizes = [48, 240], strides = [1, 1]} : vector<48x256xbf16> to vector<48x240xbf16>
    %103 = vector.extract_strided_slice %9 {offsets = [0, 0], sizes = [48, 16], strides = [1, 1]} : vector<48x256xbf16> to vector<48x16xbf16>
    %104 = tpu.concatenate %102, %103 in 1 : vector<48x240xbf16>, vector<48x16xbf16> -> vector<48x256xbf16>
    %105 = vector.shape_cast %30 : vector<1x256xi1> to vector<1x256xi1>
    %106 = vector.broadcast %105 : vector<1x256xi1> to vector<48x256xi1>
    %107 = arith.select %106, %104, %35 : vector<48x256xi1>, vector<48x256xbf16>
    %c7 = arith.constant 7 : index
    %c0_37 = arith.constant 0 : index
    %c0_38 = arith.constant 0 : index
    %108 = vector.load %arg3[%c7, %c0_37, %c0_38] : memref<9x160x48xbf16, #tpu.memory_space<vmem>>, vector<1x160x48xbf16>
    %109 = vector.shape_cast %108 : vector<1x160x48xbf16> to vector<160x48xbf16>
    %cst_39 = arith.constant dense<0.000000e+00> : vector<160x256xf32>
    %110 = tpu.matmul %109, %107, %cst_39 {dimension_numbers = #tpu.dot_dimension_numbers<[1], [0], [0], [1], [0, 0, 1, 1], [], []>} : vector<160x48xbf16>, vector<48x256xbf16>, vector<160x256xf32> -> vector<160x256xf32>
    %111 = arith.addf %101, %110 : vector<160x256xf32>
    %112 = vector.extract_strided_slice %9 {offsets = [0, 17], sizes = [48, 239], strides = [1, 1]} : vector<48x256xbf16> to vector<48x239xbf16>
    %113 = vector.extract_strided_slice %9 {offsets = [0, 0], sizes = [48, 17], strides = [1, 1]} : vector<48x256xbf16> to vector<48x17xbf16>
    %114 = tpu.concatenate %112, %113 in 1 : vector<48x239xbf16>, vector<48x17xbf16> -> vector<48x256xbf16>
    %115 = arith.andi %30, %34 : vector<1x256xi1>
    %116 = vector.shape_cast %115 : vector<1x256xi1> to vector<1x256xi1>
    %117 = vector.broadcast %116 : vector<1x256xi1> to vector<48x256xi1>
    %118 = arith.select %117, %114, %35 : vector<48x256xi1>, vector<48x256xbf16>
    %c8 = arith.constant 8 : index
    %c0_40 = arith.constant 0 : index
    %c0_41 = arith.constant 0 : index
    %119 = vector.load %arg3[%c8, %c0_40, %c0_41] : memref<9x160x48xbf16, #tpu.memory_space<vmem>>, vector<1x160x48xbf16>
    %120 = vector.shape_cast %119 : vector<1x160x48xbf16> to vector<160x48xbf16>
    %cst_42 = arith.constant dense<0.000000e+00> : vector<160x256xf32>
    %121 = tpu.matmul %120, %118, %cst_42 {dimension_numbers = #tpu.dot_dimension_numbers<[1], [0], [0], [1], [0, 0, 1, 1], [], []>} : vector<160x48xbf16>, vector<48x256xbf16>, vector<160x256xf32> -> vector<160x256xf32>
    %122 = arith.addf %111, %121 : vector<160x256xf32>
    %c0_43 = arith.constant 0 : index
    %c0_44 = arith.constant 0 : index
    %123 = vector.load %arg4[%c0_43, %c0_44] : memref<160x1xf32, #tpu.memory_space<vmem>>, vector<160x1xf32>
    %124 = vector.broadcast %123 : vector<160x1xf32> to vector<160x256xf32>
    %125 = arith.addf %122, %124 : vector<160x256xf32>
    %126 = vector.extract_strided_slice %125 {offsets = [0, 0], sizes = [40, 256], strides = [1, 1]} : vector<160x256xf32> to vector<40x256xf32>
    %127 = arith.negf %126 : vector<40x256xf32>
    %128 = math.exp %127 : vector<40x256xf32>
    %cst_45 = arith.constant 1.000000e+00 : f32
    %129 = vector.broadcast %cst_45 : f32 to vector<40x256xf32>
    %130 = arith.addf %129, %128 : vector<40x256xf32>
    %131 = arith.divf %129, %130 : vector<40x256xf32>
    %132 = vector.extract_strided_slice %125 {offsets = [40, 0], sizes = [40, 256], strides = [1, 1]} : vector<160x256xf32> to vector<40x256xf32>
    %133 = arith.negf %132 : vector<40x256xf32>
    %134 = math.exp %133 : vector<40x256xf32>
    %cst_46 = arith.constant 1.000000e+00 : f32
    %135 = vector.broadcast %cst_46 : f32 to vector<40x256xf32>
    %136 = arith.addf %135, %134 : vector<40x256xf32>
    %137 = arith.divf %135, %136 : vector<40x256xf32>
    %138 = vector.extract_strided_slice %125 {offsets = [80, 0], sizes = [40, 256], strides = [1, 1]} : vector<160x256xf32> to vector<40x256xf32>
    %139 = arith.negf %138 : vector<40x256xf32>
    %140 = math.exp %139 : vector<40x256xf32>
    %cst_47 = arith.constant 1.000000e+00 : f32
    %141 = vector.broadcast %cst_47 : f32 to vector<40x256xf32>
    %142 = arith.addf %141, %140 : vector<40x256xf32>
    %143 = arith.divf %141, %142 : vector<40x256xf32>
    %144 = vector.extract_strided_slice %125 {offsets = [120, 0], sizes = [40, 256], strides = [1, 1]} : vector<160x256xf32> to vector<40x256xf32>
    %145 = math.tanh %144 : vector<40x256xf32>
    %c0_48 = arith.constant 0 : index
    %c0_49 = arith.constant 0 : index
    %146 = vector.load %arg11[%c0_48, %c0_49] : memref<40x256xf32, #tpu.memory_space<vmem>>, vector<40x256xf32>
    %147 = arith.mulf %137, %146 : vector<40x256xf32>
    %148 = arith.mulf %131, %145 : vector<40x256xf32>
    %149 = arith.addf %147, %148 : vector<40x256xf32>
    %150 = math.tanh %149 : vector<40x256xf32>
    %151 = arith.mulf %143, %150 : vector<40x256xf32>
    %c0_50 = arith.constant 0 : index
    %c0_51 = arith.constant 0 : index
    %152 = vector.load %arg11[%c0_50, %c0_51] : memref<40x256xf32, #tpu.memory_space<vmem>>, vector<40x256xf32>
    tpu.vector_store %arg11[%c0_50, %c0_51], %149 {strides = array<i32>} : memref<40x256xf32, #tpu.memory_space<vmem>>, vector<40x256xf32>,
    %153 = arith.truncf %151 : vector<40x256xf32> to vector<40x256xbf16>
    %c8_52 = arith.constant 8 : index
    %c0_53 = arith.constant 0 : index
    %154 = vector.load %arg10[%c8_52, %c0_53] : memref<48x256xbf16, #tpu.memory_space<vmem>>, vector<40x256xbf16>
    tpu.vector_store %arg10[%c8_52, %c0_53], %153 {strides = array<i32>} : memref<48x256xbf16, #tpu.memory_space<vmem>>, vector<40x256xbf16>,
    %155 = vector.extract_strided_slice %151 {offsets = [0, 16], sizes = [40, 240], strides = [1, 1]} : vector<40x256xf32> to vector<40x240xf32>
    %156 = vector.extract_strided_slice %151 {offsets = [0, 0], sizes = [40, 16], strides = [1, 1]} : vector<40x256xf32> to vector<40x16xf32>
    %157 = tpu.concatenate %155, %156 in 1 : vector<40x240xf32>, vector<40x16xf32> -> vector<40x256xf32>
    %158 = arith.maximumf %151, %157 : vector<40x256xf32>
    %159 = vector.extract_strided_slice %158 {offsets = [0, 1], sizes = [40, 255], strides = [1, 1]} : vector<40x256xf32> to vector<40x255xf32>
    %160 = vector.extract_strided_slice %158 {offsets = [0, 0], sizes = [40, 1], strides = [1, 1]} : vector<40x256xf32> to vector<40x1xf32>
    %161 = tpu.concatenate %159, %160 in 1 : vector<40x255xf32>, vector<40x1xf32> -> vector<40x256xf32>
    %162 = arith.maximumf %158, %161 : vector<40x256xf32>
    %c0_54 = arith.constant 0 : index
    %c0_55 = arith.constant 0 : index
    %163 = vector.load %arg7[%c0_54, %c0_55] : memref<256x64xf32, #tpu.memory_space<vmem>>, vector<256x64xf32>
    %cst_56 = arith.constant dense<0.000000e+00> : vector<40x64xf32>
    %164 = tpu.matmul %162, %163, %cst_56 {dimension_numbers = #tpu.dot_dimension_numbers<[1], [0], [0], [1], [0, 0, 1, 1], [], []>} : vector<40x256xf32>, vector<256x64xf32>, vector<40x64xf32> -> vector<40x64xf32>
    %165 = arith.truncf %164 : vector<40x64xf32> to vector<40x64xbf16>
    %c0_57 = arith.constant 0 : index
    %c0_58 = arith.constant 0 : index
    %166 = vector.load %arg12[%c0_57, %c0_58] : memref<48x64xbf16, #tpu.memory_space<vmem>>, vector<40x64xbf16>
    tpu.vector_store %arg12[%c0_57, %c0_58], %165 {strides = array<i32>} : memref<48x64xbf16, #tpu.memory_space<vmem>>, vector<40x64xbf16>,
    %c0_59 = arith.constant 0 : index
    %c0_60 = arith.constant 0 : index
    %167 = vector.load %arg12[%c0_59, %c0_60] : memref<48x64xbf16, #tpu.memory_space<vmem>>, vector<48x64xbf16>
    %168 = tpu.iota {dimensions = array<i32: 1>} : vector<1x64xi32>
    %c8_i32 = arith.constant 8 : i32
    %c0_i32_61 = arith.constant 0 : i32
    %169 = arith.cmpi eq, %c8_i32, %c0_i32_61 : i32
    %c1_i32_62 = arith.constant 1 : i32
    %170 = arith.select %169, %c1_i32_62, %c8_i32 : i32
    %171 = vector.broadcast %170 : i32 to vector<1x64xi32>
    %172 = arith.remsi %168, %171 : vector<1x64xi32>
    %c0_i32_63 = arith.constant 0 : i32
    %173 = vector.broadcast %c0_i32_63 : i32 to vector<1x64xi32>
    %174 = arith.cmpi ne, %172, %173 : vector<1x64xi32>
    %c0_i32_64 = arith.constant 0 : i32
    %175 = vector.broadcast %c0_i32_64 : i32 to vector<1x64xi32>
    %176 = arith.cmpi slt, %172, %175 : vector<1x64xi32>
    %c0_i32_65 = arith.constant 0 : i32
    %177 = arith.cmpi slt, %170, %c0_i32_65 : i32
    %178 = vector.broadcast %177 : i1 to vector<1x64xi1>
    %179 = vector.broadcast %178 : vector<1x64xi1> to vector<1x64xi1>
    %180 = arith.xori %176, %179 : vector<1x64xi1>
    %181 = arith.andi %180, %174 : vector<1x64xi1>
    %182 = vector.broadcast %170 : i32 to vector<1x64xi32>
    %183 = arith.addi %172, %182 : vector<1x64xi32>
    %184 = arith.select %181, %183, %172 : vector<1x64xi1>, vector<1x64xi32>
    %c8_i32_66 = arith.constant 8 : i32
    %185 = vector.broadcast %c8_i32_66 : i32 to vector<1x64xi32>
    %186 = arith.cmpi sge, %168, %185 : vector<1x64xi32>
    %c56_i32 = arith.constant 56 : i32
    %187 = vector.broadcast %c56_i32 : i32 to vector<1x64xi32>
    %188 = arith.cmpi slt, %168, %187 : vector<1x64xi32>
    %c1_i32_67 = arith.constant 1 : i32
    %189 = vector.broadcast %c1_i32_67 : i32 to vector<1x64xi32>
    %190 = arith.cmpi sge, %184, %189 : vector<1x64xi32>
    %c6_i32 = arith.constant 6 : i32
    %191 = vector.broadcast %c6_i32 : i32 to vector<1x64xi32>
    %192 = arith.cmpi sle, %184, %191 : vector<1x64xi32>
    %cst_68 = arith.constant 0.000000e+00 : bf16
    %193 = vector.broadcast %cst_68 : bf16 to vector<48x64xbf16>
    %194 = vector.extract_strided_slice %167 {offsets = [0, 55], sizes = [48, 9], strides = [1, 1]} : vector<48x64xbf16> to vector<48x9xbf16>
    %195 = vector.extract_strided_slice %167 {offsets = [0, 0], sizes = [48, 55], strides = [1, 1]} : vector<48x64xbf16> to vector<48x55xbf16>
    %196 = tpu.concatenate %194, %195 in 1 : vector<48x9xbf16>, vector<48x55xbf16> -> vector<48x64xbf16>
    %197 = arith.andi %186, %190 : vector<1x64xi1>
    %198 = vector.shape_cast %197 : vector<1x64xi1> to vector<1x64xi1>
    %199 = vector.broadcast %198 : vector<1x64xi1> to vector<48x64xi1>
    %200 = arith.select %199, %196, %193 : vector<48x64xi1>, vector<48x64xbf16>
    %c0_69 = arith.constant 0 : index
    %c0_70 = arith.constant 0 : index
    %c0_71 = arith.constant 0 : index
    %201 = vector.load %arg5[%c0_69, %c0_70, %c0_71] : memref<9x32x48xbf16, #tpu.memory_space<vmem>>, vector<1x32x48xbf16>
    %202 = vector.shape_cast %201 : vector<1x32x48xbf16> to vector<32x48xbf16>
    %cst_72 = arith.constant dense<0.000000e+00> : vector<32x64xf32>
    %203 = tpu.matmul %202, %200, %cst_72 {dimension_numbers = #tpu.dot_dimension_numbers<[1], [0], [0], [1], [0, 0, 1, 1], [], []>} : vector<32x48xbf16>, vector<48x64xbf16>, vector<32x64xf32> -> vector<32x64xf32>
    %204 = vector.extract_strided_slice %167 {offsets = [0, 56], sizes = [48, 8], strides = [1, 1]} : vector<48x64xbf16> to vector<48x8xbf16>
    %205 = vector.extract_strided_slice %167 {offsets = [0, 0], sizes = [48, 56], strides = [1, 1]} : vector<48x64xbf16> to vector<48x56xbf16>
    %206 = tpu.concatenate %204, %205 in 1 : vector<48x8xbf16>, vector<48x56xbf16> -> vector<48x64xbf16>
    %207 = vector.shape_cast %186 : vector<1x64xi1> to vector<1x64xi1>
    %208 = vector.broadcast %207 : vector<1x64xi1> to vector<48x64xi1>
    %209 = arith.select %208, %206, %193 : vector<48x64xi1>, vector<48x64xbf16>
    %c1_73 = arith.constant 1 : index
    %c0_74 = arith.constant 0 : index
    %c0_75 = arith.constant 0 : index
    %210 = vector.load %arg5[%c1_73, %c0_74, %c0_75] : memref<9x32x48xbf16, #tpu.memory_space<vmem>>, vector<1x32x48xbf16>
    %211 = vector.shape_cast %210 : vector<1x32x48xbf16> to vector<32x48xbf16>
    %cst_76 = arith.constant dense<0.000000e+00> : vector<32x64xf32>
    %212 = tpu.matmul %211, %209, %cst_76 {dimension_numbers = #tpu.dot_dimension_numbers<[1], [0], [0], [1], [0, 0, 1, 1], [], []>} : vector<32x48xbf16>, vector<48x64xbf16>, vector<32x64xf32> -> vector<32x64xf32>
    %213 = arith.addf %203, %212 : vector<32x64xf32>
    %214 = vector.extract_strided_slice %167 {offsets = [0, 57], sizes = [48, 7], strides = [1, 1]} : vector<48x64xbf16> to vector<48x7xbf16>
    %215 = vector.extract_strided_slice %167 {offsets = [0, 0], sizes = [48, 57], strides = [1, 1]} : vector<48x64xbf16> to vector<48x57xbf16>
    %216 = tpu.concatenate %214, %215 in 1 : vector<48x7xbf16>, vector<48x57xbf16> -> vector<48x64xbf16>
    %217 = arith.andi %186, %192 : vector<1x64xi1>
    %218 = vector.shape_cast %217 : vector<1x64xi1> to vector<1x64xi1>
    %219 = vector.broadcast %218 : vector<1x64xi1> to vector<48x64xi1>
    %220 = arith.select %219, %216, %193 : vector<48x64xi1>, vector<48x64xbf16>
    %c2_77 = arith.constant 2 : index
    %c0_78 = arith.constant 0 : index
    %c0_79 = arith.constant 0 : index
    %221 = vector.load %arg5[%c2_77, %c0_78, %c0_79] : memref<9x32x48xbf16, #tpu.memory_space<vmem>>, vector<1x32x48xbf16>
    %222 = vector.shape_cast %221 : vector<1x32x48xbf16> to vector<32x48xbf16>
    %cst_80 = arith.constant dense<0.000000e+00> : vector<32x64xf32>
    %223 = tpu.matmul %222, %220, %cst_80 {dimension_numbers = #tpu.dot_dimension_numbers<[1], [0], [0], [1], [0, 0, 1, 1], [], []>} : vector<32x48xbf16>, vector<48x64xbf16>, vector<32x64xf32> -> vector<32x64xf32>
    %224 = arith.addf %213, %223 : vector<32x64xf32>
    %225 = vector.extract_strided_slice %167 {offsets = [0, 63], sizes = [48, 1], strides = [1, 1]} : vector<48x64xbf16> to vector<48x1xbf16>
    %226 = vector.extract_strided_slice %167 {offsets = [0, 0], sizes = [48, 63], strides = [1, 1]} : vector<48x64xbf16> to vector<48x63xbf16>
    %227 = tpu.concatenate %225, %226 in 1 : vector<48x1xbf16>, vector<48x63xbf16> -> vector<48x64xbf16>
    %228 = vector.shape_cast %190 : vector<1x64xi1> to vector<1x64xi1>
    %229 = vector.broadcast %228 : vector<1x64xi1> to vector<48x64xi1>
    %230 = arith.select %229, %227, %193 : vector<48x64xi1>, vector<48x64xbf16>
    %c3_81 = arith.constant 3 : index
    %c0_82 = arith.constant 0 : index
    %c0_83 = arith.constant 0 : index
    %231 = vector.load %arg5[%c3_81, %c0_82, %c0_83] : memref<9x32x48xbf16, #tpu.memory_space<vmem>>, vector<1x32x48xbf16>
    %232 = vector.shape_cast %231 : vector<1x32x48xbf16> to vector<32x48xbf16>
    %cst_84 = arith.constant dense<0.000000e+00> : vector<32x64xf32>
    %233 = tpu.matmul %232, %230, %cst_84 {dimension_numbers = #tpu.dot_dimension_numbers<[1], [0], [0], [1], [0, 0, 1, 1], [], []>} : vector<32x48xbf16>, vector<48x64xbf16>, vector<32x64xf32> -> vector<32x64xf32>
    %234 = arith.addf %224, %233 : vector<32x64xf32>
    %c4_85 = arith.constant 4 : index
    %c0_86 = arith.constant 0 : index
    %c0_87 = arith.constant 0 : index
    %235 = vector.load %arg5[%c4_85, %c0_86, %c0_87] : memref<9x32x48xbf16, #tpu.memory_space<vmem>>, vector<1x32x48xbf16>
    %236 = vector.shape_cast %235 : vector<1x32x48xbf16> to vector<32x48xbf16>
    %cst_88 = arith.constant dense<0.000000e+00> : vector<32x64xf32>
    %237 = tpu.matmul %236, %167, %cst_88 {dimension_numbers = #tpu.dot_dimension_numbers<[1], [0], [0], [1], [0, 0, 1, 1], [], []>} : vector<32x48xbf16>, vector<48x64xbf16>, vector<32x64xf32> -> vector<32x64xf32>
    %238 = arith.addf %234, %237 : vector<32x64xf32>
    %239 = vector.extract_strided_slice %167 {offsets = [0, 1], sizes = [48, 63], strides = [1, 1]} : vector<48x64xbf16> to vector<48x63xbf16>
    %240 = vector.extract_strided_slice %167 {offsets = [0, 0], sizes = [48, 1], strides = [1, 1]} : vector<48x64xbf16> to vector<48x1xbf16>
    %241 = tpu.concatenate %239, %240 in 1 : vector<48x63xbf16>, vector<48x1xbf16> -> vector<48x64xbf16>
    %242 = vector.shape_cast %192 : vector<1x64xi1> to vector<1x64xi1>
    %243 = vector.broadcast %242 : vector<1x64xi1> to vector<48x64xi1>
    %244 = arith.select %243, %241, %193 : vector<48x64xi1>, vector<48x64xbf16>
    %c5_89 = arith.constant 5 : index
    %c0_90 = arith.constant 0 : index
    %c0_91 = arith.constant 0 : index
    %245 = vector.load %arg5[%c5_89, %c0_90, %c0_91] : memref<9x32x48xbf16, #tpu.memory_space<vmem>>, vector<1x32x48xbf16>
    %246 = vector.shape_cast %245 : vector<1x32x48xbf16> to vector<32x48xbf16>
    %cst_92 = arith.constant dense<0.000000e+00> : vector<32x64xf32>
    %247 = tpu.matmul %246, %244, %cst_92 {dimension_numbers = #tpu.dot_dimension_numbers<[1], [0], [0], [1], [0, 0, 1, 1], [], []>} : vector<32x48xbf16>, vector<48x64xbf16>, vector<32x64xf32> -> vector<32x64xf32>
    %248 = arith.addf %238, %247 : vector<32x64xf32>
    %249 = vector.extract_strided_slice %167 {offsets = [0, 7], sizes = [48, 57], strides = [1, 1]} : vector<48x64xbf16> to vector<48x57xbf16>
    %250 = vector.extract_strided_slice %167 {offsets = [0, 0], sizes = [48, 7], strides = [1, 1]} : vector<48x64xbf16> to vector<48x7xbf16>
    %251 = tpu.concatenate %249, %250 in 1 : vector<48x57xbf16>, vector<48x7xbf16> -> vector<48x64xbf16>
    %252 = arith.andi %188, %190 : vector<1x64xi1>
    %253 = vector.shape_cast %252 : vector<1x64xi1> to vector<1x64xi1>
    %254 = vector.broadcast %253 : vector<1x64xi1> to vector<48x64xi1>
    %255 = arith.select %254, %251, %193 : vector<48x64xi1>, vector<48x64xbf16>
    %c6_93 = arith.constant 6 : index
    %c0_94 = arith.constant 0 : index
    %c0_95 = arith.constant 0 : index
    %256 = vector.load %arg5[%c6_93, %c0_94, %c0_95] : memref<9x32x48xbf16, #tpu.memory_space<vmem>>, vector<1x32x48xbf16>
    %257 = vector.shape_cast %256 : vector<1x32x48xbf16> to vector<32x48xbf16>
    %cst_96 = arith.constant dense<0.000000e+00> : vector<32x64xf32>
    %258 = tpu.matmul %257, %255, %cst_96 {dimension_numbers = #tpu.dot_dimension_numbers<[1], [0], [0], [1], [0, 0, 1, 1], [], []>} : vector<32x48xbf16>, vector<48x64xbf16>, vector<32x64xf32> -> vector<32x64xf32>
    %259 = arith.addf %248, %258 : vector<32x64xf32>
    %260 = vector.extract_strided_slice %167 {offsets = [0, 8], sizes = [48, 56], strides = [1, 1]} : vector<48x64xbf16> to vector<48x56xbf16>
    %261 = vector.extract_strided_slice %167 {offsets = [0, 0], sizes = [48, 8], strides = [1, 1]} : vector<48x64xbf16> to vector<48x8xbf16>
    %262 = tpu.concatenate %260, %261 in 1 : vector<48x56xbf16>, vector<48x8xbf16> -> vector<48x64xbf16>
    %263 = vector.shape_cast %188 : vector<1x64xi1> to vector<1x64xi1>
    %264 = vector.broadcast %263 : vector<1x64xi1> to vector<48x64xi1>
    %265 = arith.select %264, %262, %193 : vector<48x64xi1>, vector<48x64xbf16>
    %c7_97 = arith.constant 7 : index
    %c0_98 = arith.constant 0 : index
    %c0_99 = arith.constant 0 : index
    %266 = vector.load %arg5[%c7_97, %c0_98, %c0_99] : memref<9x32x48xbf16, #tpu.memory_space<vmem>>, vector<1x32x48xbf16>
    %267 = vector.shape_cast %266 : vector<1x32x48xbf16> to vector<32x48xbf16>
    %cst_100 = arith.constant dense<0.000000e+00> : vector<32x64xf32>
    %268 = tpu.matmul %267, %265, %cst_100 {dimension_numbers = #tpu.dot_dimension_numbers<[1], [0], [0], [1], [0, 0, 1, 1], [], []>} : vector<32x48xbf16>, vector<48x64xbf16>, vector<32x64xf32> -> vector<32x64xf32>
    %269 = arith.addf %259, %268 : vector<32x64xf32>
    %270 = vector.extract_strided_slice %167 {offsets = [0, 9], sizes = [48, 55], strides = [1, 1]} : vector<48x64xbf16> to vector<48x55xbf16>
    %271 = vector.extract_strided_slice %167 {offsets = [0, 0], sizes = [48, 9], strides = [1, 1]} : vector<48x64xbf16> to vector<48x9xbf16>
    %272 = tpu.concatenate %270, %271 in 1 : vector<48x55xbf16>, vector<48x9xbf16> -> vector<48x64xbf16>
    %273 = arith.andi %188, %192 : vector<1x64xi1>
    %274 = vector.shape_cast %273 : vector<1x64xi1> to vector<1x64xi1>
    %275 = vector.broadcast %274 : vector<1x64xi1> to vector<48x64xi1>
    %276 = arith.select %275, %272, %193 : vector<48x64xi1>, vector<48x64xbf16>
    %c8_101 = arith.constant 8 : index
    %c0_102 = arith.constant 0 : index
    %c0_103 = arith.constant 0 : index
    %277 = vector.load %arg5[%c8_101, %c0_102, %c0_103] : memref<9x32x48xbf16, #tpu.memory_space<vmem>>, vector<1x32x48xbf16>
    %278 = vector.shape_cast %277 : vector<1x32x48xbf16> to vector<32x48xbf16>
    %cst_104 = arith.constant dense<0.000000e+00> : vector<32x64xf32>
    %279 = tpu.matmul %278, %276, %cst_104 {dimension_numbers = #tpu.dot_dimension_numbers<[1], [0], [0], [1], [0, 0, 1, 1], [], []>} : vector<32x48xbf16>, vector<48x64xbf16>, vector<32x64xf32> -> vector<32x64xf32>
    %280 = arith.addf %269, %279 : vector<32x64xf32>
    %c0_105 = arith.constant 0 : index
    %c0_106 = arith.constant 0 : index
    %281 = vector.load %arg6[%c0_105, %c0_106] : memref<32x1xf32, #tpu.memory_space<vmem>>, vector<32x1xf32>
    %282 = vector.broadcast %281 : vector<32x1xf32> to vector<32x64xf32>
    %283 = arith.addf %280, %282 : vector<32x64xf32>
    %284 = vector.extract_strided_slice %283 {offsets = [0, 0], sizes = [8, 64], strides = [1, 1]} : vector<32x64xf32> to vector<8x64xf32>
    %285 = arith.negf %284 : vector<8x64xf32>
    %286 = math.exp %285 : vector<8x64xf32>
    %cst_107 = arith.constant 1.000000e+00 : f32
    %287 = vector.broadcast %cst_107 : f32 to vector<8x64xf32>
    %288 = arith.addf %287, %286 : vector<8x64xf32>
    %289 = arith.divf %287, %288 : vector<8x64xf32>
    %290 = vector.extract_strided_slice %283 {offsets = [8, 0], sizes = [8, 64], strides = [1, 1]} : vector<32x64xf32> to vector<8x64xf32>
    %291 = arith.negf %290 : vector<8x64xf32>
    %292 = math.exp %291 : vector<8x64xf32>
    %cst_108 = arith.constant 1.000000e+00 : f32
    %293 = vector.broadcast %cst_108 : f32 to vector<8x64xf32>
    %294 = arith.addf %293, %292 : vector<8x64xf32>
    %295 = arith.divf %293, %294 : vector<8x64xf32>
    %296 = vector.extract_strided_slice %283 {offsets = [16, 0], sizes = [8, 64], strides = [1, 1]} : vector<32x64xf32> to vector<8x64xf32>
    %297 = arith.negf %296 : vector<8x64xf32>
    %298 = math.exp %297 : vector<8x64xf32>
    %cst_109 = arith.constant 1.000000e+00 : f32
    %299 = vector.broadcast %cst_109 : f32 to vector<8x64xf32>
    %300 = arith.addf %299, %298 : vector<8x64xf32>
    %301 = arith.divf %299, %300 : vector<8x64xf32>
    %302 = vector.extract_strided_slice %283 {offsets = [24, 0], sizes = [8, 64], strides = [1, 1]} : vector<32x64xf32> to vector<8x64xf32>
    %303 = math.tanh %302 : vector<8x64xf32>
    %c0_110 = arith.constant 0 : index
    %c0_111 = arith.constant 0 : index
    %304 = vector.load %arg13[%c0_110, %c0_111] : memref<8x64xf32, #tpu.memory_space<vmem>>, vector<8x64xf32>
    %305 = arith.mulf %295, %304 : vector<8x64xf32>
    %306 = arith.mulf %289, %303 : vector<8x64xf32>
    %307 = arith.addf %305, %306 : vector<8x64xf32>
    %308 = math.tanh %307 : vector<8x64xf32>
    %309 = arith.mulf %301, %308 : vector<8x64xf32>
    %c0_112 = arith.constant 0 : index
    %c0_113 = arith.constant 0 : index
    %310 = vector.load %arg13[%c0_112, %c0_113] : memref<8x64xf32, #tpu.memory_space<vmem>>, vector<8x64xf32>
    tpu.vector_store %arg13[%c0_112, %c0_113], %307 {strides = array<i32>} : memref<8x64xf32, #tpu.memory_space<vmem>>, vector<8x64xf32>,
    %311 = arith.truncf %309 : vector<8x64xf32> to vector<8x64xbf16>
    %c40 = arith.constant 40 : index
    %c0_114 = arith.constant 0 : index
    %312 = vector.load %arg12[%c40, %c0_114] : memref<48x64xbf16, #tpu.memory_space<vmem>>, vector<8x64xbf16>
    tpu.vector_store %arg12[%c40, %c0_114], %311 {strides = array<i32>} : memref<48x64xbf16, #tpu.memory_space<vmem>>, vector<8x64xbf16>,
    %c0_115 = arith.constant 0 : index
    %c0_116 = arith.constant 0 : index
    %313 = vector.load %arg8[%c0_115, %c0_116] : memref<64x256xf32, #tpu.memory_space<vmem>>, vector<64x256xf32>
    %cst_117 = arith.constant dense<0.000000e+00> : vector<8x256xf32>
    %314 = tpu.matmul %309, %313, %cst_117 {dimension_numbers = #tpu.dot_dimension_numbers<[1], [0], [0], [1], [0, 0, 1, 1], [], []>} : vector<8x64xf32>, vector<64x256xf32>, vector<8x256xf32> -> vector<8x256xf32>
    %315 = vector.extract_strided_slice %314 {offsets = [0, 0], sizes = [1, 256], strides = [1, 1]} : vector<8x256xf32> to vector<1x256xf32>
    %c0_118 = arith.constant 0 : index
    %c0_119 = arith.constant 0 : index
    %c0_120 = arith.constant 0 : index
    %c0_121 = arith.constant 0 : index
    %316 = vector.load %arg9[%c0_118, %c0_119, %c0_120, %c0_121] : memref<1x1x1x256xf32, #tpu.memory_space<vmem>>, vector<1x1x1x256xf32>
    %317 = vector.shape_cast %316 : vector<1x1x1x256xf32> to vector<1x256xf32>
    %318 = vector.shape_cast %315 : vector<1x256xf32> to vector<1x1x1x256xf32>
    tpu.vector_store %arg9[%c0_118, %c0_119, %c0_120, %c0_121], %318 {strides = array<i32>} : memref<1x1x1x256xf32, #tpu.memory_space<vmem>>, vector<1x1x1x256xf32>,
    return
  }
  func.func @transform_0(%arg0: i32, %arg1: i32) -> (i32, i32, i32, i32) {
    %c0_i32 = arith.constant 0 : i32
    %c0_i32_0 = arith.constant 0 : i32
    %c0_i32_1 = arith.constant 0 : i32
    return %arg0, %arg1, %c0_i32, %c0_i32_0 : i32, i32, i32, i32
  }
  func.func @transform_1(%arg0: i32, %arg1: i32) -> (i32, i32, i32) {
    %c0_i32 = arith.constant 0 : i32
    %c0_i32_0 = arith.constant 0 : i32
    %c0_i32_1 = arith.constant 0 : i32
    %c0_i32_2 = arith.constant 0 : i32
    return %c0_i32, %c0_i32_0, %c0_i32_1 : i32, i32, i32
  }
  func.func @transform_2(%arg0: i32, %arg1: i32) -> (i32, i32) {
    %c0_i32 = arith.constant 0 : i32
    %c0_i32_0 = arith.constant 0 : i32
    %c0_i32_1 = arith.constant 0 : i32
    return %c0_i32, %c0_i32_0 : i32, i32
  }
  func.func @transform_3(%arg0: i32, %arg1: i32) -> (i32, i32, i32) {
    %c0_i32 = arith.constant 0 : i32
    %c0_i32_0 = arith.constant 0 : i32
    %c0_i32_1 = arith.constant 0 : i32
    %c0_i32_2 = arith.constant 0 : i32
    return %c0_i32, %c0_i32_0, %c0_i32_1 : i32, i32, i32
  }
  func.func @transform_4(%arg0: i32, %arg1: i32) -> (i32, i32) {
    %c0_i32 = arith.constant 0 : i32
    %c0_i32_0 = arith.constant 0 : i32
    %c0_i32_1 = arith.constant 0 : i32
    return %c0_i32, %c0_i32_0 : i32, i32
  }
  func.func @transform_5(%arg0: i32, %arg1: i32) -> (i32, i32) {
    %c0_i32 = arith.constant 0 : i32
    %c0_i32_0 = arith.constant 0 : i32
    %c0_i32_1 = arith.constant 0 : i32
    return %c0_i32, %c0_i32_0 : i32, i32
  }
  func.func @transform_6(%arg0: i32, %arg1: i32) -> (i32, i32) {
    %c0_i32 = arith.constant 0 : i32
    %c0_i32_0 = arith.constant 0 : i32
    %c0_i32_1 = arith.constant 0 : i32
    return %c0_i32, %c0_i32_0 : i32, i32
  }
  func.func @transform_7(%arg0: i32, %arg1: i32) -> (i32, i32, i32, i32) {
    %c0_i32 = arith.constant 0 : i32
    %c0_i32_0 = arith.constant 0 : i32
    %c0_i32_1 = arith.constant 0 : i32
    return %arg0, %arg1, %c0_i32, %c0_i32_0 : i32, i32, i32, i32
  }
}

</mosaic_0001>

<bundles_post_ra>
// kernel: sst_sal_forward.1
= control target key start
LH: loop header
LB: loop body
LE: loop exit
PB: predicated region body
PF: predicated region fallthrough
CT: control target
= control target key end

     0   :  { %s6786_s24 = smov 0   ;;  %s6788_s25 = smov 0   ;;  %s8740_s0 = inlined_call_operand.vmem [shape: f32[2,4,3,256], index: 0, kind: input, shape index: {}]   ;;  %s8741_s1 = inlined_call_operand.vmem [shape: bf16[9,160,48], index: 1, kind: input, shape index: {}]   ;;  %s8742_s2 = inlined_call_operand.vmem [shape: f32[160,1], index: 2, kind: input, shape index: {}]   ;;  %s8743_s3 = inlined_call_operand.vmem [shape: bf16[9,32,48], index: 3, kind: input, shape index: {}]   ;;  %s8744_s4 = inlined_call_operand.vmem [shape: f32[32,1], index: 4, kind: input, shape index: {}]   ;;  %s8745_s5 = inlined_call_operand.vmem [shape: f32[256,64], index: 5, kind: input, shape index: {}]   ;;  %s8746_s6 = inlined_call_operand.vmem [shape: f32[64,256], index: 6, kind: input, shape index: {}]   ;;  %s8747_s7 = inlined_call_operand.vmem [shape: f32[2,4,1,256], index: 7, kind: output, shape index: {}]  }
   0x1   :  { %s6790_s26 = smov 0   ;;  %s6792_s27 = smov 0  }
   0x2   :  { %s6794_s28 = smov 0  }
   0x3 LB: > { %s26_s29 = sadd.s32 1, %s6708_s26  ;;  %s29_s30 = sadd.s32 1, %s6712_s27  ;;  %s6716_s28 = sphi %s6794_s28, %s17_s28   ;;  %s6712_s27 = sphi %s6792_s27, %s8831_s27   ;;  %s6708_s26 = sphi %s6790_s26, %s8830_s26   ;;  %s6704_s25 = sphi %s6788_s25, %s8829_s25   ;;  %s6700_s24 = sphi %s6786_s24, %s8828_s24  }
   0x4   : > { %p27_p0 = scmp.ge.s32.totalorder %s26_s29, 4  ;;  %p5186_p1 = scmp.ge.s32.totalorder %s6716_s28, 1 }
   0x5   : > { %p257_p2 = scmp.lt.s32.totalorder %s6716_s28, 9 }
   0x6   : > { %s8833_s29 = smov (%p27_p0, %s26_s29), 0  ;;  %s8835_s30 = smov (!%p27_p0, %s29_s30), %s6712_s27 }
   0x7   : > { %p258_p3 = pnand %p5186_p1, %p257_p2  ;;  %p31_p4 = scmp.ge.s32.totalorder %s8835_s30, 2 }
   0x9   : > { %s8837_s30 = smov (%p31_p4, %s8835_s30), 0  ;;  %261 = sbr.rel (%p258_p3) target bundleno = 2019 (0x7e3), region = 48 }
  0x10   : > { %p296_p5 = scmp.lt.s32.totalorder %s6704_s25, 1  ;;  %p298_p6 = scmp.lt.s32.totalorder %s6700_s24, 3 }
  0x11   : > { %p5192_p7 = scmp.ne.s32.totalorder %s6700_s24, 0 }
  0x12   : > { %s8839_s25 = smov (!%p296_p5, %s6704_s25), 1  ;;  %vm336_vm0 = vcmask (!%p5192_p7), 523264   ;;  %v6718_v0 = vmov (!%p5192_p7), 0   ;;  %v6719_v1 = vmov (!%p5192_p7), 0.0  }
  0x13   : > { %s299_s8 = scalar_select %p298_p6, %s6700_s24, 3 }
  0x14   : > { %s5188_s9 = sshll.u32 %s8839_s25, 3  ;;  %319 = sbr.rel (%p5192_p7) target bundleno = 30 (0x1e), region = 52  ;;  %320 = vst [vmem:[#allocation2] sm:$0xff] (!%p5192_p7), %v6718_v0  ;;  %321 = vst [vmem:[#allocation2 + $0x8] sm:$0xff] (!%p5192_p7), %v6718_v0 }
  0x15   : > { %s5187_s10 = sshll.u32 %s299_s8, 1  ;;  %322 = vst [vmem:[#allocation2 + $0x10] sm:$0xff] (!%p5192_p7), %v6718_v0  ;;  %323 = vst [vmem:[#allocation2 + $0x18] sm:$0xff] (!%p5192_p7), %v6718_v0 }
  0x16   : > { %s6816_s11 = sadd.s32 %s5188_s9, %s5187_s10  ;;  %324 = vst [vmem:[#allocation2 + $0x20] sm:$0xff] (!%p5192_p7), %v6718_v0  ;;  %325 = vst [vmem:[#allocation2 + $0x28] sm:$0xff] (!%p5192_p7), %v6718_v0 }
  0x17   : > { %s5189_s12 = sshll.u32 %s6816_s11, 2  ;;  %s312_s15 = scalar_lea.vmem %s8747_s7, %s6816_s11  ;;  %326 = vst [vmem:[#allocation3] sm:$0xff] (!%p5192_p7), %v6719_v1  ;;  %327 = vst [vmem:[#allocation3 + $0x8] sm:$0xff] (!%p5192_p7), %v6719_v1 }
  0x18   : > { %s304_s18 = scalar_lea.vmem %s8740_s0, %s5189_s12  ;;  %328 = vst [vmem:[#allocation3 + $0x10] sm:$0xff] (!%p5192_p7), %v6719_v1  ;;  %329 = vst [vmem:[#allocation3 + $0x18] sm:$0xff] (!%p5192_p7), %v6719_v1 }
  0x19   : > { %330 = vst [vmem:[#allocation3 + $0x20] sm:$0xff] (!%p5192_p7), %v6719_v1  ;;  %331 = vst [vmem:[#allocation3 + $0x28] sm:$0xff] (!%p5192_p7), %v6719_v1 }
  0x1a   : > { %332 = vst [vmem:[#allocation3 + $0x30] sm:$0xff] (!%p5192_p7), %v6719_v1  ;;  %333 = vst [vmem:[#allocation3 + $0x38] sm:$0xff] (!%p5192_p7), %v6719_v1 }
  0x1b   : > { %334 = vst [vmem:[#allocation3 + $0x40] sm:$0xff] %v6719_v1  ;;  %335 = vst [vmem:[#allocation3 + $0x48] sm:$0xff] %v6719_v1 }
  0x1c   : > { %337 = vst.msk [vmem:[#allocation4] sm:$0xff] %vm336_vm0, %v6718_v0  ;;  %338 = vst.msk [vmem:[#allocation4 + $0x8] sm:$0xff] %vm336_vm0, %v6718_v0 }
  0x1d   : > { %339 = vst.msk [vmem:[#allocation4 + $0x10] sm:$0xff] %vm336_vm0, %v6718_v0  ;;  %340 = vst.msk [vmem:[#allocation5] sm:$0xff] %vm336_vm0, %v6719_v1 }
  0x1e PF: > { %v341_v3 = vld [vmem:[%s304_s18] sm:$0x77]  ;;  %vm347_vm1 = vcmask 1041408   ;;  %s6720_s19 = smov 1   ;;  %vm348_vm2 = vsmask.f32 1280  ;;  %v8749_v15 = vlaneseq }
  0x1f   : > { %v6830_v2 = vld [vmem:[#allocation2 + $0x18] sm:$0xff]  ;;  %v343_v4 = vcombine.high %v341_v3, %v341_v3  ;;  %v345_v5 = vpack.c.bf16 %v341_v3, %v341_v3  ;;  %vm349_vm3 = vmand %vm347_vm1, %vm348_vm2  ;;  %v6834_v6 = vld [vmem:[#allocation2 + $0x10] sm:$0xff]  ;;  %v8750_v9 = vmov 0   ;;  %s6722_s20 = smov 127   ;;  %s6723_s21 = smov 16   ;;  %vm8748_vm7 = vcmask 7168  }
  0x20   : > { %1311 = vrot.lane.b32.xlu1 %v6830_v2, %s6720_s19  ;;  %1496 = vmatprep.mubr.bf16.mxu0 %v8750_v9  ;;  %v6842_v11 = vld [vmem:[#allocation2 + $0x20] sm:$0xff]  ;;  %v6856_v14 = vld [vmem:[#allocation2 + $0x28] sm:$0xff]  ;;  %s6724_s22 = smov 113   ;;  %s6725_s23 = smov 17   ;;  %v6907_v16 = vand.u32 127, %v8749_v15  ;;  %v6923_v24 = vshrl.u32 %v8749_v15, 7 }
  0x21   : > { %v346_v7 = vpack.c.bf16 %v343_v4, %v343_v4  ;;  %v350_v8 = vsel %vm349_vm3, %v345_v5, 0  ;;  %665 = vmatprep.mubr.bf16.mxu1 %v8750_v9  ;;  %6342 = vset.pattern.permute.xlu1 %v8750_v9  ;;  %s6726_s24 = smov 112   ;;  %s6727_s25 = smov 15   ;;  %vm6728_vm11 = vmmov 1   ;;  %v6394_v51 = vld [vmem:[%s8741_s1 + $0xf0] sm:$0xff]   ;;  %vm602_vm14 = vcmask 392192  }
  0x22   : > { %352 = vst [vmem:[#allocation2] sm:$0xf] %v350_v8  ;;  %6341 = vset.pattern.permute.xlu0 %v8750_v9  ;;  %v6910_v17 = vadd.s32 128, %v6907_v16  ;;  %v367_v18 = vand.u32 15, %v6907_v16  ;;  %8757 = vst [vmem:[#allocation6_spill] sm:$0xff] %v6923_v24  ;;  %v6930_v25 = vsub.s32 0, %v6923_v24 }
  0x23   : > { %v351_v10 = vsel %vm349_vm3, %v346_v7, 0  ;;  %v6933_v26 = vsub.s32 4, %v6923_v24  ;;  %vm387_vm10 = vcmp.ge.s32.totalorder %v6907_v16, 16  ;;  %vm489_vm2 = vcmask 130048   ;;  %v6395_v61 = vld [vmem:[%s8741_s1 + $0xf8] sm:$0xff]   ;;  %v6398_v21 = vld [vmem:[%s8741_s1 + $0x108] sm:$0xff]  }
  0x24   : > { %1317 = vrot.lane.b32.xlu1 %v6834_v6, %s6720_s19  ;;  %353 = vst [vmem:[#allocation2 + $0x8] sm:$0xf] %v351_v10  ;;  %v374_v19 = vand.u32 15, %v6910_v17  ;;  %vm6914_vm4 = vcmp.ge.s32.totalorder %v367_v18, 1  ;;  %vm513_vm12 = vmpackc.low %vm6728_vm11, %vm387_vm10  ;;  %vm7001_vm15 = vcmp.le.s32.totalorder %v367_v18, 14  ;;  %vm390_vm1 = vcmp.lt.s32.totalorder %v6910_v17, 240 }
  0x25   : > { %v514_v54 = vsel %vm513_vm12, 65537, %v8750_v9  ;;  %v6399_v63 = vld [vmem:[%s8741_s1 + $0x58] sm:$0xff]   ;;  %s6729_s12 = smov 111   ;;  %v6403_v18 = vld [vmem:[%s8741_s1 + $0x68] sm:$0xff]   ;;  %s6732_s8 = smov 9  }
  0x26   : > { %vm6918_vm5 = vcmp.ge.s32.totalorder %v374_v19, 1  ;;  %vm6993_vm13 = vcmp.le.s32.totalorder %v374_v19, 14  ;;  %v522_v56 = vrot.slane %v514_v54, %v6933_v26  ;;  %v518_v57 = vrot.slane %v514_v54, %v6930_v25  ;;  %v6430_v50 = vld [vmem:[%s8741_s1 + $0x1b8] sm:$0xff]   ;;  %s6733_s9 = smov 73   ;;  %s6734_s10 = smov 7  }
  0x27   : > { %vm1345_vm6 = vmpackc.low %vm6918_vm5, %vm6914_vm4  ;;  %s6737_s13 = smov 63   ;;  %s6738_s14 = smov 57  }
  0x28   : > { %1319 = vrot.lane.b32.xlu1 %v6842_v11, %s6720_s19  ;;  %v1346_v28 = vsel %vm1345_vm6, 65537, %v8750_v9  ;;  %vm1947_vm0 = vmpackc.low %vm6993_vm13, %vm7001_vm15  ;;  %vm1923_vm6 = vcmask 1039360   ;;  %vm7042_vm12 = vcmp.ne.s16.totalorder %v518_v57, 0  ;;  %s6740_s16 = smov 56   ;;  %s6741_s17 = smov 120  }
  0x29   : > { %v6850_v13 = vld [vmem:[#allocation2] sm:$0xff]  ;;  %v1354_v29 = vrot.slane %v1346_v28, %v6933_v26  ;;  %v1350_v30 = vrot.slane %v1346_v28, %v6930_v25  ;;  %v7020_v58 = vsel %vm1947_vm0, 65537, %v8750_v9  ;;  %vm7034_vm3 = vmand %vm390_vm1, %vm6918_vm5  ;;  %s6743_s18 = smov 119  }
  0x2a   : > { %v1956_v62 = vrot.slane %v7020_v58, %v6933_v26  ;;  %vm2277_vm0 = vmpackc.low %vm7034_vm3, %vm6914_vm4  ;;  %vm2251_vm3 = vcmask 924672   ;;  %v1952_v22 = vrot.slane %v7020_v58, %v6930_v25 }
  0x2b   : > { %v6846_v12 = vld [vmem:[#allocation2 + $0x8] sm:$0xff]  ;;  %vm6940_vm8 = vcmp.ne.s16.totalorder %v1354_v29, 0  ;;  %vm6944_vm9 = vcmp.ne.s16.totalorder %v1350_v30, 0  ;;  %v6396_v30 = vld [vmem:[%s8741_s1 + $0x100] sm:$0xff]  }
  0x2c   : > { %1309 = vrot.lane.b32.xlu0 %v6846_v12, %s6720_s19  ;;  %1913 = vrot.lane.b32.xlu1 %v6846_v12, %s6722_s20 }
  0x30   : > { %1315 = vrot.lane.b32.xlu0 %v6850_v13, %s6720_s19  ;;  %1917 = vrot.lane.b32.xlu1 %v6830_v2, %s6722_s20 }
  0x34   : > { %1313 = vrot.lane.b32.xlu0 %v6856_v14, %s6720_s19  ;;  %1921 = vrot.lane.b32.xlu1 %v6856_v14, %s6722_s20 }
  0x38   : > { %1911 = vrot.lane.b32.xlu0 %v6850_v13, %s6722_s20  ;;  %483 = vrot.lane.b32.xlu1 %v6850_v13, %s6723_s21 }
  0x3c   : > { %1915 = vrot.lane.b32.xlu0 %v6834_v6, %s6722_s20  ;;  %485 = vrot.lane.b32.xlu1 %v6834_v6, %s6723_s21 }
  0x40   : > { %1919 = vrot.lane.b32.xlu0 %v6842_v11, %s6722_s20  ;;  %487 = vrot.lane.b32.xlu1 %v6842_v11, %s6723_s21 }
  0x44   : > { %477 = vrot.lane.b32.xlu0 %v6846_v12, %s6723_s21  ;;  %2241 = vrot.lane.b32.xlu1 %v6846_v12, %s6724_s22 }
  0x48   : > { %479 = vrot.lane.b32.xlu0 %v6830_v2, %s6723_s21  ;;  %2245 = vrot.lane.b32.xlu1 %v6830_v2, %s6724_s22 }
  0x4c   : > { %481 = vrot.lane.b32.xlu0 %v6856_v14, %s6723_s21  ;;  %2249 = vrot.lane.b32.xlu1 %v6856_v14, %s6724_s22  ;;  %s6730_s21 = smov 8  }
  0x50   : > { %2239 = vrot.lane.b32.xlu0 %v6850_v13, %s6724_s22  ;;  %407 = vrot.lane.b32.xlu1 %v6850_v13, %s6725_s23 }
  0x54   : > { %2243 = vrot.lane.b32.xlu0 %v6834_v6, %s6724_s22  ;;  %409 = vrot.lane.b32.xlu1 %v6834_v6, %s6725_s23 }
  0x58   : > { %2247 = vrot.lane.b32.xlu0 %v6842_v11, %s6724_s22  ;;  %411 = vrot.lane.b32.xlu1 %v6842_v11, %s6725_s23  ;;  %s6731_s22 = smov 72  }
  0x5c   : > { %398 = vrot.lane.b32.xlu0 %v6846_v12, %s6725_s23  ;;  %2571 = vrot.lane.b32.xlu1 %v6846_v12, %s6726_s24 }
  0x60   : > { %400 = vrot.lane.b32.xlu0 %v6830_v2, %s6725_s23  ;;  %2575 = vrot.lane.b32.xlu1 %v6830_v2, %s6726_s24 }
  0x64   : > { %402 = vrot.lane.b32.xlu0 %v6856_v14, %s6725_s23  ;;  %2579 = vrot.lane.b32.xlu1 %v6856_v14, %s6726_s24 }
  0x68   : > { %2569 = vrot.lane.b32.xlu0 %v6850_v13, %s6726_s24  ;;  %985 = vrot.lane.b32.xlu1 %v6850_v13, %s6727_s25 }
  0x6c   : > { %2573 = vrot.lane.b32.xlu0 %v6834_v6, %s6726_s24  ;;  %987 = vrot.lane.b32.xlu1 %v6834_v6, %s6727_s25 }
  0x70   : > { %2577 = vrot.lane.b32.xlu0 %v6842_v11, %s6726_s24  ;;  %989 = vrot.lane.b32.xlu1 %v6842_v11, %s6727_s25 }
  0x74   : > { %979 = vrot.lane.b32.xlu0 %v6846_v12, %s6727_s25  ;;  %2899 = vrot.lane.b32.xlu1 %v6846_v12, %s6729_s12 }
  0x78   : > { %981 = vrot.lane.b32.xlu0 %v6830_v2, %s6727_s25  ;;  %2903 = vrot.lane.b32.xlu1 %v6830_v2, %s6729_s12 }
  0x7c   : > { %983 = vrot.lane.b32.xlu0 %v6856_v14, %s6727_s25  ;;  %2907 = vrot.lane.b32.xlu1 %v6856_v14, %s6729_s12 }
  0x80   : > { %2897 = vrot.lane.b32.xlu0 %v6850_v13, %s6729_s12 }
  0x84   : > { %2901 = vrot.lane.b32.xlu0 %v6834_v6, %s6729_s12 }
  0x88   : > { %2905 = vrot.lane.b32.xlu0 %v6842_v11, %s6729_s12  ;;  %s6735_s12 = smov 71  }
  0x92   : > { %v1312_v20 = vpop.permute.xlu1 %1311 }
  0x96   : > { %v1318_v23 = vpop.permute.xlu1 %1317 }
  0x97   : > { %v6963_v40 = vsel %vm8748_vm7, %v1318_v23, %v1312_v20  ;;  %v1335_v41 = vsel %vm8748_vm7, %v1312_v20, %v1318_v23  ;;  %v7073_v23 = vsel %vm2277_vm0, 65537, %v8750_v9  ;;  %vm433_vm0 = vmand %vm387_vm10, %vm6914_vm4  ;;  %vm7151_vm4 = vcmp.ne.s16.totalorder %v1952_v22, 0 }
  0x98   : > { %v6977_v46 = vsel %vm6944_vm9, %v1335_v41, 0 }
  0x9a   : > { %v1320_v27 = vpop.permute.xlu1 %1319 }
  0x9e   : > { %v1310_v31 = vpop.permute.xlu0 %1309  ;;  %v6938_v32 = vpop.permute.xlu1 %1913 }
  0xa2   : > { %v1316_v35 = vpop.permute.xlu0 %1315  ;;  %v6948_v36 = vpop.permute.xlu1 %1917 }
  0xa3   : > { %v6951_v37 = vsel %vm8748_vm7, %v1316_v35, %v1310_v31  ;;  %v1331_v38 = vsel %vm8748_vm7, %v1310_v31, %v1316_v35  ;;  %v2282_v31 = vrot.slane %v7073_v23, %v6930_v25 }
  0xa4   : > { %5332 = vmatprep.subr.msk.bf16.mxu0 %vm6940_vm8, %v6951_v37  ;;  %v6959_v39 = vsel %vm6944_vm9, %v1331_v38, 0 }
  0xa5   : > { %1465 = vmatpush1.bf16.msra.mxu0 %v6959_v39 }
  0xa6   : > { %5333 = vmatprep.subr.msk.bf16.mxu0 %vm6940_vm8, %v6963_v40  ;;  %v1314_v42 = vpop.permute.xlu0 %1313  ;;  %v6969_v43 = vpop.permute.xlu1 %1921 }
  0xa7   : > { %v6972_v44 = vsel %vm8748_vm7, %v1320_v27, %v1314_v42  ;;  %v1339_v45 = vsel %vm8748_vm7, %v1314_v42, %v1320_v27  ;;  %vm7064_vm7 = vcmp.ne.s16.totalorder %v1956_v62, 0 }
  0xa8   : > { %v6988_v48 = vsel %vm6944_vm9, %v1339_v45, 0  ;;  %vm7038_vm9 = vcmp.ne.s16.totalorder %v522_v56, 0  ;;  %v6397_v45 = vld [vmem:[%s8741_s1 + $0x50] sm:$0xff]  }
  0xa9   : > { %1467 = vmatpush1.bf16.msra.mxu0 %v6977_v46 }
  0xaa   : > { %v6981_v47 = vpop.permute.xlu0 %1911  ;;  %5334 = vmatprep.subr.msk.bf16.mxu0 %vm6940_vm8, %v6972_v44  ;;  %v484_v49 = vpop.permute.xlu1 %483 }
  0xab   : > { %v1933_v10 = vsel %vm1923_vm6, %v6938_v32, %v6981_v47 }
  0xad   : > { %1469 = vmatpush1.bf16.msra.mxu0 %v6988_v48 }
  0xae   : > { %v7005_v53 = vpop.permute.xlu0 %1915  ;;  %1738 = vmatprep.subr.bf16.mxu0 %v6846_v12  ;;  %v486_v55 = vpop.permute.xlu1 %485 }
  0xb0   : > { %5335 = vmatmul.mubr.msk.bf16.vlgmr.msra.gmra.mrb[0].mxu0 %vm602_vm14, %v6394_v51 }
  0xb1   : > { %1739 = vmatpush1.bf16.msra.mxu0 %v6850_v13  ;;  %1506 = vmatprep.mubr.bf16.mxu0 %v8750_v9 }
  0xb2   : > { %v7022_v59 = vpop.permute.xlu0 %1919  ;;  %v488_v60 = vpop.permute.xlu1 %487  ;;  %1740 = vmatprep.subr.bf16.mxu0 %v6830_v2 }
  0xb5   : > { %1741 = vmatpush1.bf16.msra.mxu0 %v6834_v6 }
  0xb6   : > { %v478_v3 = vpop.permute.xlu0 %477  ;;  %1742 = vmatprep.subr.bf16.mxu0 %v6856_v14  ;;  %v7048_v4 = vpop.permute.xlu1 %2241 }
  0xb7   : > { %v490_v5 = vsel %vm489_vm2, %v484_v49, %v478_v3  ;;  %v499_v7 = vsel %vm489_vm2, %v478_v3, %v484_v49  ;;  %v6425_v49 = vld [vmem:[%s8741_s1 + $0x20] sm:$0xff]  }
  0xb8   : > { %5223 = vmatprep.subr.msk.bf16.mxu1 %vm7038_vm9, %v490_v5  ;;  %5336 = vmatmul.mubr.msk.bf16.gmra.mrb[4].mxu0 %vm602_vm14, %v6395_v61  ;;  %v525_v8 = vsel %vm7042_vm12, %v499_v7, 0  ;;  %v1924_v5 = vsel %vm1923_vm6, %v6981_v47, %v6938_v32 }
  0xb9   : > { %634 = vmatpush1.bf16.msra.mxu1 %v525_v8  ;;  %1516 = vmatprep.mubr.bf16.mxu0 %v8750_v9 }
  0xba   : > { %v480_v19 = vpop.permute.xlu0 %479  ;;  %1743 = vmatpush1.bf16.msra.mxu0 %v6842_v11  ;;  %v7070_v20 = vpop.permute.xlu1 %2245  ;;  %v6405_v11 = vld [vmem:[%s8741_s1 + $0x70] sm:$0xff]  }
  0xbb   : > { %v491_v27 = vsel %vm489_vm2, %v486_v55, %v480_v19  ;;  %v503_v28 = vsel %vm489_vm2, %v480_v19, %v486_v55  ;;  %5415 = vmatprep.subr.msk.bf16.mxu0 %vm7064_vm7, %v1933_v10  ;;  %v6400_v10 = vld [vmem:[%s8741_s1 + $0x140] sm:$0xff]  }
  0xbc   : > { %5224 = vmatprep.subr.msk.bf16.mxu1 %vm7038_vm9, %v491_v27  ;;  %v527_v29 = vsel %vm7042_vm12, %v503_v28, 0  ;;  %v1959_v28 = vsel %vm7151_vm4, %v1924_v5, 0 }
  0xbd   : > { %636 = vmatpush1.bf16.msra.mxu1 %v527_v29 }
  0xbe   : > { %v482_v34 = vpop.permute.xlu0 %481  ;;  %v7088_v35 = vpop.permute.xlu1 %2249 }
  0xbf   : > { %v492_v38 = vsel %vm489_vm2, %v488_v60, %v482_v34  ;;  %v507_v41 = vsel %vm489_vm2, %v482_v34, %v488_v60  ;;  %vm7105_vm2 = vcmp.ne.s16.totalorder %v2282_v31, 0  ;;  %v1937_v31 = vsel %vm1923_vm6, %v6948_v36, %v7005_v53 }
  0xc0   : > { %5225 = vmatprep.subr.msk.bf16.mxu1 %vm7038_vm9, %v492_v38  ;;  %5337 = vmatmul.mubr.msk.bf16.gmra.mrb[8].mxu0 %vm602_vm14, %v6396_v30  ;;  %v529_v42 = vsel %vm7042_vm12, %v507_v41, 0  ;;  %vm439_vm9 = vmpackc.low %vm6918_vm5, %vm433_vm0  ;;  %vm413_vm5 = vcmask 138240   ;;  %v1925_v30 = vsel %vm1923_vm6, %v7005_v53, %v6948_v36  ;;  %v6401_v41 = vld [vmem:[%s8741_s1 + $0x60] sm:$0xff]   ;;  %v1926_v36 = vsel %vm1923_vm6, %v7022_v59, %v6969_v43 }
  0xc1   : > { %638 = vmatpush1.bf16.msra.mxu1 %v529_v42  ;;  %1526 = vmatprep.mubr.bf16.mxu0 %v8750_v9  ;;  %v440_v61 = vsel %vm439_vm9, 65537, %v8750_v9  ;;  %v1961_v53 = vsel %vm7151_vm4, %v1925_v30, 0  ;;  %v1963_v12 = vsel %vm7151_vm4, %v1926_v36, 0  ;;  %v6407_v36 = vld [vmem:[%s8741_s1 + $0x78] sm:$0xff]  }
  0xc2   : > { %v7109_v51 = vpop.permute.xlu0 %2239  ;;  %v408_v54 = vpop.permute.xlu1 %407  ;;  %v444_v1 = vrot.slane %v440_v61, %v6930_v25  ;;  %v448_v58 = vrot.slane %v440_v61, %v6933_v26 }
  0xc3   : > { %v7114_v55 = vsel %vm2251_vm3, %v7109_v51, %v7048_v4 }
  0xc4   : > { %5226 = vmatmul.mubr.msk.bf16.vlgmr.msra.gmra.mrb[0].mxu1 %vm602_vm14, %v6397_v45  ;;  %v2289_v56 = vsel %vm7105_vm2, %v7114_v55, 0  ;;  %vm7168_vm12 = vcmp.ne.s16.totalorder %v448_v58, 0  ;;  %vm7172_vm0 = vcmp.ne.s16.totalorder %v444_v1, 0  ;;  %v2261_v1 = vsel %vm2251_vm3, %v7048_v4, %v7109_v51  ;;  %v6404_v51 = vld [vmem:[%s8741_s1 + $0x150] sm:$0xff]  }
  0xc5   : > { %675 = vmatprep.mubr.bf16.mxu1 %v8750_v9  ;;  %v6457_v55 = vld [vmem:[%s8741_s1 + $0x110] sm:$0xff]  }
  0xc6   : > { %v7126_v57 = vpop.permute.xlu0 %2243  ;;  %v410_v60 = vpop.permute.xlu1 %409 }
  0xc7   : > { %v7134_v62 = vsel %vm2251_vm3, %v7126_v57, %v7070_v20 }
  0xc8   : > { %5338 = vmatmul.mubr.msk.bf16.gmra.mrb[12].mxu0 %vm602_vm14, %v6398_v21  ;;  %v2291_v0 = vsel %vm7105_vm2, %v7134_v62, 0  ;;  %v2286_v21 = vrot.slane %v7073_v23, %v6933_v26  ;;  %v6402_v23 = vld [vmem:[%s8741_s1 + $0x148] sm:$0xff]   ;;  %v6424_v62 = vld [vmem:[%s8741_s1 + $0x1a0] sm:$0xff]  }
  0xc9   : > { %1770 = vmatprep.mubr.bf16.mxu0 %v8750_v9 }
  0xca   : > { %v7146_v3 = vpop.permute.xlu0 %2247  ;;  %v412_v19 = vpop.permute.xlu1 %411  ;;  %vm7233_vm9 = vcmp.ne.s16.totalorder %v2286_v21, 0  ;;  %v6410_v21 = vld [vmem:[%s8741_s1 + $0x168] sm:$0xff]  }
  0xcb   : > { %v7158_v8 = vsel %vm2251_vm3, %v7146_v3, %v7088_v35 }
  0xcc   : > { %5227 = vmatmul.mubr.msk.bf16.gmra.mrb[4].mxu1 %vm602_vm14, %v6399_v63  ;;  %v2293_v32 = vsel %vm7105_vm2, %v7158_v8, 0  ;;  %v1941_v63 = vsel %vm1923_vm6, %v6969_v43, %v7022_v59  ;;  %v6428_v8 = vld [vmem:[%s8741_s1 + $0x1b0] sm:$0xff]  }
  0xcd   : > { %685 = vmatprep.mubr.bf16.mxu1 %v8750_v9 }
  0xce   : > { %v399_v29 = vpop.permute.xlu0 %398 }
  0xcf   : > { %v423_v34 = vsel %vm413_vm5, %v399_v29, %v408_v54  ;;  %v414_v38 = vsel %vm413_vm5, %v408_v54, %v399_v29  ;;  %v7202_v54 = vpop.permute.xlu1 %2571 }
  0xd0   : > { %5375 = vmatmul.mubr.msk.bf16.vlgmr.msra.gmra.mrb[0].mxu0 %vm602_vm14, %v6400_v10  ;;  %5246 = vmatprep.subr.msk.bf16.mxu1 %vm7168_vm12, %v414_v38  ;;  %v451_v42 = vsel %vm7172_vm0, %v423_v34, 0  ;;  %v2265_v38 = vsel %vm2251_vm3, %v7070_v20, %v7126_v57  ;;  %v6422_v57 = vld [vmem:[%s8741_s1 + $0x198] sm:$0xff]  }
  0xd1   : > { %2067 = vmatpush1.bf16.msra.mxu0 %v1959_v28  ;;  %1780 = vmatprep.mubr.bf16.mxu0 %v8750_v9 }
  0xd2   : > { %5416 = vmatprep.subr.msk.bf16.mxu0 %vm7064_vm7, %v1937_v31  ;;  %v401_v45 = vpop.permute.xlu0 %400  ;;  %847 = vmatpush1.bf16.msra.mxu1 %v451_v42  ;;  %v6406_v31 = vld [vmem:[%s8741_s1 + $0x158] sm:$0xff]  }
  0xd3   : > { %v427_v61 = vsel %vm413_vm5, %v401_v45, %v410_v60  ;;  %v415_v22 = vsel %vm413_vm5, %v410_v60, %v401_v45  ;;  %v2576_v5 = vpop.permute.xlu1 %2575  ;;  %v6409_v45 = vld [vmem:[%s8741_s1 + $0x80] sm:$0xff]  }
  0xd4   : > { %5228 = vmatmul.mubr.msk.bf16.gmra.mrb[8].mxu1 %vm602_vm14, %v6401_v41  ;;  %5247 = vmatprep.subr.msk.bf16.mxu1 %vm7168_vm12, %v415_v22  ;;  %v453_v60 = vsel %vm7172_vm0, %v427_v61, 0  ;;  %v6411_v61 = vld [vmem:[%s8741_s1 + $0x88] sm:$0xff]   ;;  %v6412_v22 = vld [vmem:[%s8741_s1 + $0x170] sm:$0xff]  }
  0xd5   : > { %695 = vmatprep.mubr.bf16.mxu1 %v8750_v9  ;;  %2069 = vmatpush1.bf16.msra.mxu0 %v1961_v53  ;;  %v6408_v53 = vld [vmem:[%s8741_s1 + $0x160] sm:$0xff]  }
  0xd6   : > { %v403_v43 = vpop.permute.xlu0 %402  ;;  %5417 = vmatprep.subr.msk.bf16.mxu0 %vm7064_vm7, %v1941_v63  ;;  %849 = vmatpush1.bf16.msra.mxu1 %v453_v60  ;;  %vm7253_vm7 = vmand %vm387_vm10, %vm7001_vm15  ;;  %vm2581_vm10 = vcmask 916480   ;;  %v6413_v63 = vld [vmem:[%s8741_s1 + $0x90] sm:$0xff]   ;;  %v6415_v60 = vld [vmem:[%s8741_s1 + $0x98] sm:$0xff]  }
  0xd7   : > { %v431_v13 = vsel %vm413_vm5, %v403_v43, %v412_v19  ;;  %v416_v59 = vsel %vm413_vm5, %v412_v19, %v403_v43  ;;  %vm1017_vm4 = vmpackc.low %vm6993_vm13, %vm7253_vm7  ;;  %v2580_v10 = vpop.permute.xlu1 %2579  ;;  %vm991_vm5 = vcmask 121856  }
  0xd8   : > { %5376 = vmatmul.mubr.msk.bf16.gmra.mrb[4].mxu0 %vm602_vm14, %v6402_v23  ;;  %5248 = vmatprep.subr.msk.bf16.mxu1 %vm7168_vm12, %v416_v59  ;;  %v455_v4 = vsel %vm7172_vm0, %v431_v13, 0  ;;  %v1018_v19 = vsel %vm1017_vm4, 65537, %v8750_v9  ;;  %v6414_v23 = vld [vmem:[%s8741_s1 + $0x178] sm:$0xff]   ;;  %vm2605_vm7 = vmpackc.low %vm390_vm1, %vm6728_vm11  ;;  %vm3937_vm4 = vcmask 523264  }
  0xd9   : > { %1790 = vmatprep.mubr.bf16.mxu0 %v8750_v9  ;;  %2071 = vmatpush1.bf16.msra.mxu0 %v1963_v12  ;;  %v1026_v27 = vrot.slane %v1018_v19, %v6933_v26  ;;  %v1022_v43 = vrot.slane %v1018_v19, %v6930_v25  ;;  %v6416_v12 = vld [vmem:[%s8741_s1 + $0x180] sm:$0xff]  }
  0xda   : > { %v7258_v6 = vpop.permute.xlu0 %2569  ;;  %851 = vmatpush1.bf16.msra.mxu1 %v455_v4  ;;  %5458 = vmatprep.subr.msk.bf16.mxu0 %vm7233_vm9, %v2261_v1 }
  0xdb   : > { %v986_v34 = vpop.permute.xlu1 %985  ;;  %vm7299_vm12 = vcmp.ne.s16.totalorder %v1026_v27, 0  ;;  %vm7357_vm0 = vcmp.ne.s16.totalorder %v1022_v43, 0  ;;  %v6435_v43 = vld [vmem:[%s8741_s1 + $0x48] sm:$0xff]  }
  0xdc   : > { %5229 = vmatmul.mubr.msk.bf16.gmra.mrb[12].mxu1 %vm602_vm14, %v6403_v18 }
  0xdd   : > { %705 = vmatprep.mubr.bf16.mxu1 %v8750_v9 }
  0xde   : > { %v2574_v7 = vpop.permute.xlu0 %2573 }
  0xdf   : > { %v7277_v47 = vsel %vm2581_vm10, %v2574_v7, %v2576_v5  ;;  %v7280_v14 = vsel %vm2581_vm10, %v2576_v5, %v2574_v7  ;;  %v988_v13 = vpop.permute.xlu1 %987  ;;  %v6417_v5 = vld [vmem:[%s8741_s1] sm:$0xff]   ;;  %v6418_v7 = vld [vmem:[%s8741_s1 + $0x188] sm:$0xff]  }
  0xe0   : > { %5377 = vmatmul.mubr.msk.bf16.gmra.mrb[8].mxu0 %vm602_vm14, %v6404_v51 }
  0xe1   : > { %1800 = vmatprep.mubr.bf16.mxu0 %v8750_v9 }
  0xe2   : > { %v2578_v28 = vpop.permute.xlu0 %2577 }
  0xe3   : > { %v7289_v29 = vsel %vm2581_vm10, %v2578_v28, %v2580_v10  ;;  %v7292_v30 = vsel %vm2581_vm10, %v2580_v10, %v2578_v28  ;;  %v990_v10 = vpop.permute.xlu1 %989 }
  0xe4   : > { %5230 = vmatmul.mubr.msk.bf16.gmra.mrb[16].mxu1 %vm602_vm14, %v6405_v11 }
  0xe5   : > { %715 = vmatprep.mubr.bf16.mxu1 %v8750_v9 }
  0xe6   : > { %v980_v41 = vpop.permute.xlu0 %979 }
  0xe7   : > { %v992_v42 = vsel %vm991_vm5, %v986_v34, %v980_v41  ;;  %v1001_v18 = vsel %vm991_vm5, %v980_v41, %v986_v34  ;;  %v6420_v41 = vld [vmem:[%s8741_s1 + $0x190] sm:$0xff]   ;;  %v2900_v17 = vpop.permute.xlu1 %2899 }
  0xe8   : > { %5378 = vmatmul.mubr.msk.bf16.gmra.mrb[12].mxu0 %vm602_vm14, %v6406_v31  ;;  %5289 = vmatprep.subr.msk.bf16.mxu1 %vm7299_vm12, %v992_v42  ;;  %v1029_v4 = vsel %vm7357_vm0, %v1001_v18, 0  ;;  %v6419_v31 = vld [vmem:[%s8741_s1 + $0x8] sm:$0xff]   ;;  %v7406_v42 = vsel %vm2605_vm7, 65537, %v8750_v9 }
  0xe9   : > { %1810 = vmatprep.mubr.bf16.mxu0 %v8750_v9  ;;  %v2614_v20 = vrot.slane %v7406_v42, %v6933_v26 }
  0xea   : > { %v982_v59 = vpop.permute.xlu0 %981 }
  0xeb   : > { %v993_v2 = vsel %vm991_vm5, %v988_v13, %v982_v59  ;;  %v1005_v51 = vsel %vm991_vm5, %v982_v59, %v988_v13  ;;  %vm7438_vm11 = vcmp.ne.s16.totalorder %v2614_v20, 0  ;;  %v7538_v13 = vpop.permute.xlu1 %2903  ;;  %v6454_v20 = vld [vmem:[%s8741_s1 + $0x218] sm:$0xff]  }
  0xec   : > { %5231 = vmatmul.mubr.msk.bf16.gmra.mrb[20].mxu1 %vm602_vm14, %v6407_v36  ;;  %v1031_v11 = vsel %vm7357_vm0, %v1005_v51, 0  ;;  %v6421_v36 = vld [vmem:[%s8741_s1 + $0x10] sm:$0xff]   ;;  %v6439_v51 = vld [vmem:[%s8741_s1 + $0xa8] sm:$0xff]  }
  0xed   : > { %725 = vmatprep.mubr.bf16.mxu1 %v8750_v9 }
  0xee   : > { %v984_v19 = vpop.permute.xlu0 %983 }
  0xef   : > { %v994_v27 = vsel %vm991_vm5, %v990_v10, %v984_v19  ;;  %v1009_v28 = vsel %vm991_vm5, %v984_v19, %v990_v10  ;;  %v7624_v10 = vpop.permute.xlu1 %2907 }
  0xf0   : > { %5379 = vmatmul.mubr.msk.bf16.gmra.mrb[16].mxu0 %vm602_vm14, %v6408_v53  ;;  %v1033_v34 = vsel %vm7357_vm0, %v1009_v28, 0  ;;  %v6446_v28 = vld [vmem:[%s8741_s1 + $0x1f8] sm:$0xff]  }
  0xf1   : > { %1820 = vmatprep.mubr.bf16.mxu0 %v8750_v9 }
  0xf2   : > { %v2898_v52 = vpop.permute.xlu0 %2897 }
  0xf4   : > { %5232 = vmatmul.mubr.msk.bf16.gmra.mrb[24].mxu1 %vm602_vm14, %v6409_v45  ;;  %v6467_v45 = vld [vmem:[%s8741_s1 + $0x138] sm:$0xff]  }
  0xf5   : > { %735 = vmatprep.mubr.bf16.mxu1 %v8750_v9 }
  0xf6   : > { %v7540_v59 = vpop.permute.xlu0 %2901 }
  0xf8   : > { %5380 = vmatmul.mubr.msk.bf16.gmra.mrb[20].mxu0 %vm602_vm14, %v6410_v21 }
  0xf9   : > { %1830 = vmatprep.mubr.bf16.mxu0 %v8750_v9 }
  0xfa   : > { %v7626_v19 = vpop.permute.xlu0 %2905 }
  0xfc   : > { %5233 = vmatmul.mubr.msk.bf16.gmra.mrb[28].mxu1 %vm602_vm14, %v6411_v61 }
  0xfd   : > { %745 = vmatprep.mubr.bf16.mxu1 %v8750_v9 }
 0x100   : > { %5381 = vmatmul.mubr.msk.bf16.gmra.mrb[24].mxu0 %vm602_vm14, %v6412_v22  ;;  %v6431_v22 = vld [vmem:[%s8741_s1 + $0x38] sm:$0xff]  }
 0x101   : > { %1840 = vmatprep.mubr.bf16.mxu0 %v8750_v9 }
 0x104   : > { %5234 = vmatmul.mubr.msk.bf16.gmra.mrb[32].mxu1 %vm602_vm14, %v6413_v63  ;;  %v6432_v63 = vld [vmem:[%s8741_s1 + $0x1c0] sm:$0xff]  }
 0x105   : > { %755 = vmatprep.mubr.bf16.mxu1 %v8750_v9 }
 0x108   : > { %5382 = vmatmul.mubr.msk.bf16.gmra.mrb[28].mxu0 %vm602_vm14, %v6414_v23  ;;  %v6433_v23 = vld [vmem:[%s8741_s1 + $0x40] sm:$0xff]  }
 0x109   : > { %1850 = vmatprep.mubr.bf16.mxu0 %v8750_v9 }
 0x10c   : > { %5235 = vmatmul.mubr.msk.bf16.gmra.mrb[36].mxu1 %vm602_vm14, %v6415_v60  ;;  %v6434_v60 = vld [vmem:[%s8741_s1 + $0x1c8] sm:$0xff]  }
 0x10d   : > { %878 = vmatprep.mubr.bf16.mxu1 %v8750_v9 }
 0x110   : > { %5383 = vmatmul.mubr.msk.bf16.gmra.mrb[32].mxu0 %vm602_vm14, %v6416_v12  ;;  %v6436_v12 = vld [vmem:[%s8741_s1 + $0x1d0] sm:$0xff]  }
 0x111   : > { %1860 = vmatprep.mubr.bf16.mxu0 %v8750_v9 }
 0x114   : > { %5249 = vmatmul.mubr.msk.bf16.vlgmr.msra.gmra.mrb[0].mxu1 %vm602_vm14, %v6417_v5  ;;  %v6437_v5 = vld [vmem:[%s8741_s1 + $0xa0] sm:$0xff]  }
 0x115   : > { %1137 = vmatpush1.bf16.msra.mxu1 %v1029_v4  ;;  %888 = vmatprep.mubr.bf16.mxu1 %v8750_v9  ;;  %v6438_v4 = vld [vmem:[%s8741_s1 + $0x1d8] sm:$0xff]  }
 0x116   : > { %5290 = vmatprep.subr.msk.bf16.mxu1 %vm7299_vm12, %v993_v2  ;;  %v2610_v2 = vrot.slane %v7406_v42, %v6930_v25  ;;  %v6451_v42 = vld [vmem:[%s8741_s1 + $0xd8] sm:$0xff]  }
 0x118   : > { %5384 = vmatmul.mubr.msk.bf16.gmra.mrb[36].mxu0 %vm602_vm14, %v6418_v7  ;;  %v6443_v7 = vld [vmem:[%s8741_s1 + $0xb8] sm:$0xff]  }
 0x119   : > { %1139 = vmatpush1.bf16.msra.mxu1 %v1031_v11  ;;  %2098 = vmatprep.mubr.bf16.mxu0 %v8750_v9  ;;  %v6444_v11 = vld [vmem:[%s8741_s1 + $0x1f0] sm:$0xff]  }
 0x11a   : > { %5291 = vmatprep.subr.msk.bf16.mxu1 %vm7299_vm12, %v994_v27  ;;  %v6445_v27 = vld [vmem:[%s8741_s1 + $0xc0] sm:$0xff]   ;;  %vm4018_vm12 = vcmask 64512  }
 0x11c   : > { %5250 = vmatmul.mubr.msk.bf16.gmra.mrb[4].mxu1 %vm602_vm14, %v6419_v31  ;;  %v6447_v31 = vld [vmem:[%s8741_s1 + $0xc8] sm:$0xff]  }
 0x11d   : > { %1141 = vmatpush1.bf16.msra.mxu1 %v1033_v34  ;;  %898 = vmatprep.mubr.bf16.mxu1 %v8750_v9  ;;  %v6448_v34 = vld [vmem:[%s8741_s1 + $0x200] sm:$0xff]  }
 0x11e   : > { %5891 = vmatprep.subr.msk.bf16.mxu1 %vm6940_vm8, %v6951_v37  ;;  %v2269_v37 = vsel %vm2251_vm3, %v7088_v35, %v7146_v3  ;;  %v2591_v35 = vsel %vm2581_vm10, %v7202_v54, %v7258_v6  ;;  %v6427_v3 = vld [vmem:[%s8741_s1 + $0x28] sm:$0xff]   ;;  %vm2930_vm3 = vmand %vm390_vm1, %vm6993_vm13  ;;  %vm3659_vm1 = vcmask 1043456  }
 0x11f   : > { %vm2935_vm2 = vmpackc.low %vm2930_vm3, %vm7001_vm15  ;;  %vm7579_vm15 = vcmp.ne.s16.totalorder %v2610_v2, 0  ;;  %v3238_v2 = vld [vmem:[%s8742_s2 + $0x58] sm:$0xff] }
 0x120   : > { %5418 = vmatmul.mubr.msk.bf16.vlgmr.msra.gmra.mrb[0].mxu0 %vm602_vm14, %v6420_v41  ;;  %v7490_v58 = vsel %vm2935_vm2, 65537, %v8750_v9  ;;  %v6449_v41 = vld [vmem:[%s8741_s1 + $0xd0] sm:$0xff]  }
 0x121   : > { %2397 = vmatpush1.bf16.msra.mxu0 %v2289_v56  ;;  %2108 = vmatprep.mubr.bf16.mxu0 %v8750_v9  ;;  %v6423_v56 = vld [vmem:[%s8741_s1 + $0x18] sm:$0xff]   ;;  %v2940_v53 = vrot.slane %v7490_v58, %v6930_v25 }
 0x122   : > { %5459 = vmatprep.subr.msk.bf16.mxu0 %vm7233_vm9, %v2265_v38  ;;  %v6450_v38 = vld [vmem:[%s8741_s1 + $0x208] sm:$0xff]  }
 0x123   : > { %vm7499_vm13 = vcmp.ne.s16.totalorder %v2940_v53, 0  ;;  %v6464_v53 = vld [vmem:[%s8741_s1 + $0x240] sm:$0xff]  }
 0x124   : > { %5251 = vmatmul.mubr.msk.bf16.gmra.mrb[8].mxu1 %vm602_vm14, %v6421_v36  ;;  %v6452_v36 = vld [vmem:[%s8741_s1 + $0x210] sm:$0xff]  }
 0x125   : > { %908 = vmatprep.mubr.bf16.mxu1 %v8750_v9  ;;  %2399 = vmatpush1.bf16.msra.mxu0 %v2291_v0  ;;  %v6426_v0 = vld [vmem:[%s8741_s1 + $0x1a8] sm:$0xff]  }
 0x126   : > { %5460 = vmatprep.subr.msk.bf16.mxu0 %vm7233_vm9, %v2269_v37  ;;  %vm2909_vm9 = vcmask 908288   ;;  %v6453_v37 = vld [vmem:[%s8741_s1 + $0xe0] sm:$0xff]  }
 0x127   : > { %v7504_v21 = vsel %vm2909_vm9, %v2898_v52, %v2900_v17  ;;  %v7546_v1 = vsel %vm2909_vm9, %v7540_v59, %v7538_v13 }
 0x128   : > { %5419 = vmatmul.mubr.msk.bf16.gmra.mrb[4].mxu0 %vm602_vm14, %v6422_v57  ;;  %v2947_v61 = vsel %vm7499_vm13, %v7504_v21, 0  ;;  %v2949_v18 = vsel %vm7499_vm13, %v7546_v1, 0  ;;  %v6455_v57 = vld [vmem:[%s8741_s1 + $0xe8] sm:$0xff]   ;;  %v3227_v21 = vld [vmem:[%s8742_s2] sm:$0xff]  ;;  %v3242_v1 = vld [vmem:[%s8742_s2 + $0x78] sm:$0xff] }
 0x129   : > { %2118 = vmatprep.mubr.bf16.mxu0 %v8750_v9  ;;  %2401 = vmatpush1.bf16.msra.mxu0 %v2293_v32  ;;  %v6429_v32 = vld [vmem:[%s8741_s1 + $0x30] sm:$0xff]  }
 0x12a   : > { %5501 = vmatprep.subr.msk.bf16.mxu0 %vm7438_vm11, %v2591_v35  ;;  %v6456_v35 = vld [vmem:[%s8741_s1 + $0x220] sm:$0xff]   ;;  %3249 = vperm.xlu0 %6341, %v3227_v21  }
 0x12c   : > { %5252 = vmatmul.mubr.msk.bf16.gmra.mrb[12].mxu1 %vm602_vm14, %v6423_v56  ;;  %v6458_v56 = vld [vmem:[%s8741_s1 + $0x228] sm:$0xff]  }
 0x12d   : > { %918 = vmatprep.mubr.bf16.mxu1 %v8750_v9 }
 0x130   : > { %5420 = vmatmul.mubr.msk.bf16.gmra.mrb[8].mxu0 %vm602_vm14, %v6424_v62  ;;  %v6459_v62 = vld [vmem:[%s8741_s1 + $0x118] sm:$0xff]  }
 0x131   : > { %2128 = vmatprep.mubr.bf16.mxu0 %v8750_v9 }
 0x134   : > { %5253 = vmatmul.mubr.msk.bf16.gmra.mrb[16].mxu1 %vm602_vm14, %v6425_v49  ;;  %v6460_v49 = vld [vmem:[%s8741_s1 + $0x230] sm:$0xff]  }
 0x135   : > { %928 = vmatprep.mubr.bf16.mxu1 %v8750_v9 }
 0x138   : > { %5421 = vmatmul.mubr.msk.bf16.gmra.mrb[12].mxu0 %vm602_vm14, %v6426_v0  ;;  %v2923_v0 = vsel %vm2909_vm9, %v7538_v13, %v7540_v59  ;;  %v6469_v13 = vld [vmem:[%s8741_s1 + $0x258] sm:$0xff]   ;;  %v3237_v59 = vld [vmem:[%s8742_s2 + $0x50] sm:$0xff] }
 0x139   : > { %2138 = vmatprep.mubr.bf16.mxu0 %v8750_v9 }
 0x13c   : > { %5254 = vmatmul.mubr.msk.bf16.gmra.mrb[20].mxu1 %vm602_vm14, %v6427_v3  ;;  %v6461_v3 = vld [vmem:[%s8741_s1 + $0x120] sm:$0xff]  }
 0x13d   : > { %938 = vmatprep.mubr.bf16.mxu1 %v8750_v9 }
 0x140   : > { %5422 = vmatmul.mubr.msk.bf16.gmra.mrb[16].mxu0 %vm602_vm14, %v6428_v8  ;;  %v2927_v8 = vsel %vm2909_vm9, %v7624_v10, %v7626_v19 }
 0x141   : > { %2148 = vmatprep.mubr.bf16.mxu0 %v8750_v9 }
 0x144   : > { %5255 = vmatmul.mubr.msk.bf16.gmra.mrb[24].mxu1 %vm602_vm14, %v6429_v32  ;;  %v6462_v32 = vld [vmem:[%s8741_s1 + $0x238] sm:$0xff]  }
 0x145   : > { %948 = vmatprep.mubr.bf16.mxu1 %v8750_v9 }
 0x148   : > { %5423 = vmatmul.mubr.msk.bf16.gmra.mrb[20].mxu0 %vm602_vm14, %v6430_v50  ;;  %v6465_v50 = vld [vmem:[%s8741_s1 + $0x130] sm:$0xff]  }
 0x149   : > { %2158 = vmatprep.mubr.bf16.mxu0 %v8750_v9 }
 0x14c   : > { %5256 = vmatmul.mubr.msk.bf16.gmra.mrb[28].mxu1 %vm602_vm14, %v6431_v22  ;;  %v3233_v22 = vld [vmem:[%s8742_s2 + $0x30] sm:$0xff] }
 0x14d   : > { %958 = vmatprep.mubr.bf16.mxu1 %v8750_v9  ;;  %3279 = vperm.xlu0 %6341, %v3233_v22  }
 0x150   : > { %5424 = vmatmul.mubr.msk.bf16.gmra.mrb[24].mxu0 %vm602_vm14, %v6432_v63  ;;  %v6468_v63 = vld [vmem:[%s8741_s1 + $0x250] sm:$0xff]  }
 0x151   : > { %2168 = vmatprep.mubr.bf16.mxu0 %v8750_v9 }
 0x154   : > { %5257 = vmatmul.mubr.msk.bf16.gmra.mrb[32].mxu1 %vm602_vm14, %v6433_v23  ;;  %v3229_v23 = vld [vmem:[%s8742_s2 + $0x10] sm:$0xff] }
 0x155   : > { %968 = vmatprep.mubr.bf16.mxu1 %v8750_v9 }
 0x158   : > { %5425 = vmatmul.mubr.msk.bf16.gmra.mrb[28].mxu0 %vm602_vm14, %v6434_v60  ;;  %v3234_v60 = vld [vmem:[%s8742_s2 + $0x38] sm:$0xff] }
 0x159   : > { %2178 = vmatprep.mubr.bf16.mxu0 %v8750_v9  ;;  %3284 = vperm.xlu0 %6341, %v3234_v60  }
 0x15c   : > { %5258 = vmatmul.mubr.msk.bf16.gmra.mrb[36].mxu1 %vm602_vm14, %v6435_v43  ;;  %v3230_v43 = vld [vmem:[%s8742_s2 + $0x18] sm:$0xff] }
 0x15d   : > { %1168 = vmatprep.mubr.bf16.mxu1 %v8750_v9 }
 0x160   : > { %5426 = vmatmul.mubr.msk.bf16.gmra.mrb[32].mxu0 %vm602_vm14, %v6436_v12  ;;  %v3235_v12 = vld [vmem:[%s8742_s2 + $0x40] sm:$0xff] }
 0x161   : > { %2188 = vmatprep.mubr.bf16.mxu0 %v8750_v9  ;;  %3289 = vperm.xlu0 %6341, %v3235_v12  }
 0x164   : > { %5292 = vmatmul.mubr.msk.bf16.vlgmr.msra.gmra.mrb[0].mxu1 %vm602_vm14, %v6437_v5  ;;  %v3236_v5 = vld [vmem:[%s8742_s2 + $0x48] sm:$0xff] }
 0x165   : > { %5894 = vmatpush1.bf16.msra.mxu1 %v6959_v39  ;;  %1178 = vmatprep.mubr.bf16.mxu1 %v8750_v9  ;;  %v2582_v39 = vsel %vm2581_vm10, %v7258_v6, %v7202_v54  ;;  %v2619_v54 = vsel %vm7579_vm15, %v7277_v47, 0  ;;  %v6442_v6 = vld [vmem:[%s8741_s1 + $0x1e8] sm:$0xff]   ;;  %v2621_v47 = vsel %vm7579_vm15, %v7289_v29, 0  ;;  %v7632_v29 = vsel %vm2909_vm9, %v7626_v19, %v7624_v10  ;;  %v6477_v10 = vld [vmem:[%s8741_s1 + $0x298] sm:$0xff]   ;;  %v6478_v19 = vld [vmem:[%s8741_s1 + $0x2a0] sm:$0xff]  }
 0x166   : > { %5892 = vmatprep.subr.msk.bf16.mxu1 %vm6940_vm8, %v6963_v40  ;;  %v2617_v33 = vsel %vm7579_vm15, %v2582_v39, 0  ;;  %3324 = vperm.xlu0 %6341, %v3242_v1   ;;  %v3239_v39 = vld [vmem:[%s8742_s2 + $0x60] sm:$0xff]  ;;  %v3244_v40 = vld [vmem:[%s8742_s2 + $0x88] sm:$0xff] }
 0x168   : > { %5427 = vmatmul.mubr.msk.bf16.gmra.mrb[36].mxu0 %vm602_vm14, %v6438_v4  ;;  %v6470_v4 = vld [vmem:[%s8741_s1 + $0x260] sm:$0xff]  }
 0x169   : > { %5895 = vmatpush1.bf16.msra.mxu1 %v6977_v46  ;;  %2428 = vmatprep.mubr.bf16.mxu0 %v8750_v9  ;;  %v6440_v46 = vld [vmem:[%s8741_s1 + $0x1e0] sm:$0xff]  }
 0x16a   : > { %5893 = vmatprep.subr.msk.bf16.mxu1 %vm6940_vm8, %v6972_v44  ;;  %v6441_v44 = vld [vmem:[%s8741_s1 + $0xb0] sm:$0xff]   ;;  %3294 = vperm.xlu0 %6341, %v3236_v5  }
 0x16c   : > { %5293 = vmatmul.mubr.msk.bf16.gmra.mrb[4].mxu1 %vm602_vm14, %v6439_v51  ;;  %v3243_v51 = vld [vmem:[%s8742_s2 + $0x80] sm:$0xff] }
 0x16d   : > { %5896 = vmatpush1.bf16.msra.mxu1 %v6988_v48  ;;  %1188 = vmatprep.mubr.bf16.mxu1 %v8750_v9  ;;  %v2944_v48 = vrot.slane %v7490_v58, %v6933_v26  ;;  %v6463_v58 = vld [vmem:[%s8741_s1 + $0x128] sm:$0xff]  }
 0x16e   : > { %3329 = vperm.xlu0 %6341, %v3243_v51   ;;  %v6475_v26 = vld [vmem:[%s8741_s1 + $0x288] sm:$0xff]  }
 0x16f   : > { %vm7616_vm8 = vcmp.ne.s16.totalorder %v2944_v48, 0  ;;  %v3245_v48 = vld [vmem:[%s8742_s2 + $0x90] sm:$0xff] }
 0x170   : > { %5461 = vmatmul.mubr.msk.bf16.vlgmr.msra.gmra.mrb[0].mxu0 %vm602_vm14, %v6440_v46  ;;  %v6471_v46 = vld [vmem:[%s8741_s1 + $0x268] sm:$0xff]  }
 0x171   : > { %2725 = vmatpush1.bf16.msra.mxu0 %v2617_v33  ;;  %2438 = vmatprep.mubr.bf16.mxu0 %v8750_v9  ;;  %v6472_v33 = vld [vmem:[%s8741_s1 + $0x270] sm:$0xff]  }
 0x172   : > { %5502 = vmatprep.subr.msk.bf16.mxu0 %vm7438_vm11, %v7280_v14  ;;  %v2919_v14 = vsel %vm2909_vm9, %v2900_v17, %v2898_v52  ;;  %v6466_v17 = vld [vmem:[%s8741_s1 + $0x248] sm:$0xff]   ;;  %3334 = vperm.xlu0 %6341, %v3244_v40   ;;  %vm3976_vm9 = vcmask 72704  }
 0x173   : > { %v3232_v52 = vld [vmem:[%s8742_s2 + $0x28] sm:$0xff] }
 0x174   : > { %5294 = vmatmul.mubr.msk.bf16.gmra.mrb[8].mxu1 %vm602_vm14, %v6441_v44  ;;  %3274 = vperm.xlu1 %6342, %v3232_v52   ;;  %v6473_v44 = vld [vmem:[%s8741_s1 + $0x278] sm:$0xff]  }
 0x175   : > { %1198 = vmatprep.mubr.bf16.mxu1 %v8750_v9  ;;  %2727 = vmatpush1.bf16.msra.mxu0 %v2619_v54  ;;  %v3240_v54 = vld [vmem:[%s8742_s2 + $0x68] sm:$0xff] }
 0x176   : > { %5503 = vmatprep.subr.msk.bf16.mxu0 %vm7438_vm11, %v7292_v30  ;;  %v2951_v30 = vsel %vm7499_vm13, %v7632_v29, 0  ;;  %3339 = vperm.xlu0 %6341, %v3245_v48   ;;  %v6479_v29 = vld [vmem:[%s8741_s1 + $0x2a8] sm:$0xff]  }
 0x178   : > { %5462 = vmatmul.mubr.msk.bf16.gmra.mrb[4].mxu0 %vm602_vm14, %v6442_v6  ;;  %v6474_v6 = vld [vmem:[%s8741_s1 + $0x280] sm:$0xff]  }
 0x179   : > { %2448 = vmatprep.mubr.bf16.mxu0 %v8750_v9  ;;  %2729 = vmatpush1.bf16.msra.mxu0 %v2621_v47  ;;  %v3241_v47 = vld [vmem:[%s8742_s2 + $0x70] sm:$0xff] }
 0x17a   : > { %5544 = vmatprep.subr.msk.bf16.mxu0 %vm7616_vm8, %v2919_v14  ;;  %v3246_v14 = vld [vmem:[%s8742_s2 + $0x98] sm:$0xff] }
 0x17b   : > { %3344 = vperm.xlu0 %6341, %v3246_v14  }
 0x17c   : > { %5295 = vmatmul.mubr.msk.bf16.gmra.mrb[12].mxu1 %vm602_vm14, %v6443_v7  ;;  %v6476_v7 = vld [vmem:[%s8741_s1 + $0x290] sm:$0xff]  }
 0x17d   : > { %1208 = vmatprep.mubr.bf16.mxu1 %v8750_v9 }
 0x180   : > { %5463 = vmatmul.mubr.msk.bf16.gmra.mrb[8].mxu0 %vm602_vm14, %v6444_v11 }
 0x181   : > { %2458 = vmatprep.mubr.bf16.mxu0 %v8750_v9 }
 0x184   : > { %5296 = vmatmul.mubr.msk.bf16.gmra.mrb[16].mxu1 %vm602_vm14, %v6445_v27 }
 0x185   : > { %1218 = vmatprep.mubr.bf16.mxu1 %v8750_v9 }
 0x188   : > { %5464 = vmatmul.mubr.msk.bf16.gmra.mrb[12].mxu0 %vm602_vm14, %v6446_v28 }
 0x189   : > { %2468 = vmatprep.mubr.bf16.mxu0 %v8750_v9 }
 0x18c   : > { %5297 = vmatmul.mubr.msk.bf16.gmra.mrb[20].mxu1 %vm602_vm14, %v6447_v31  ;;  %v6480_v31 = vld [vmem:[%s8741_s1 + $0x2b0] sm:$0xff]  }
 0x18d   : > { %1228 = vmatprep.mubr.bf16.mxu1 %v8750_v9 }
 0x190   : > { %5465 = vmatmul.mubr.msk.bf16.gmra.mrb[16].mxu0 %vm602_vm14, %v6448_v34 }
 0x191   : > { %2478 = vmatprep.mubr.bf16.mxu0 %v8750_v9 }
 0x194   : > { %5298 = vmatmul.mubr.msk.bf16.gmra.mrb[24].mxu1 %vm602_vm14, %v6449_v41 }
 0x195   : > { %1238 = vmatprep.mubr.bf16.mxu1 %v8750_v9 }
 0x198   : > { %5466 = vmatmul.mubr.msk.bf16.gmra.mrb[20].mxu0 %vm602_vm14, %v6450_v38 }
 0x199   : > { %2488 = vmatprep.mubr.bf16.mxu0 %v8750_v9 }
 0x19c   : > { %5299 = vmatmul.mubr.msk.bf16.gmra.mrb[28].mxu1 %vm602_vm14, %v6451_v42 }
 0x19d   : > { %1248 = vmatprep.mubr.bf16.mxu1 %v8750_v9 }
 0x1a0   : > { %5467 = vmatmul.mubr.msk.bf16.gmra.mrb[24].mxu0 %vm602_vm14, %v6452_v36  ;;  %v6481_v36 = vld [vmem:[%s8741_s1 + $0x2b8] sm:$0xff]  }
 0x1a1   : > { %2498 = vmatprep.mubr.bf16.mxu0 %v8750_v9 }
 0x1a4   : > { %5300 = vmatmul.mubr.msk.bf16.gmra.mrb[32].mxu1 %vm602_vm14, %v6453_v37 }
 0x1a5   : > { %1258 = vmatprep.mubr.bf16.mxu1 %v8750_v9 }
 0x1a8   : > { %5468 = vmatmul.mubr.msk.bf16.gmra.mrb[28].mxu0 %vm602_vm14, %v6454_v20 }
 0x1a9   : > { %2508 = vmatprep.mubr.bf16.mxu0 %v8750_v9 }
 0x1ac   : > { %5301 = vmatmul.mubr.msk.bf16.gmra.mrb[36].mxu1 %vm602_vm14, %v6455_v57 }
 0x1ad   : > { %1536 = vmatprep.mubr.bf16.mxu1 %v8750_v9 }
 0x1b0   : > { %5469 = vmatmul.mubr.msk.bf16.gmra.mrb[32].mxu0 %vm602_vm14, %v6456_v35 }
 0x1b1   : > { %2518 = vmatprep.mubr.bf16.mxu0 %v8750_v9 }
 0x1b4   : > { %5339 = vmatmul.mubr.msk.bf16.vlgmr.msra.gmra.mrb[16].mxu1 %vm602_vm14, %v6457_v55  ;;  %v6482_v55 = vld [vmem:[%s8741_s1 + $0x2c0] sm:$0xff]  }
 0x1b5   : > { %1546 = vmatprep.mubr.bf16.mxu1 %v8750_v9 }
 0x1b8   : > { %5470 = vmatmul.mubr.msk.bf16.gmra.mrb[36].mxu0 %vm602_vm14, %v6458_v56 }
 0x1b9   : > { %2756 = vmatprep.mubr.bf16.mxu0 %v8750_v9 }
 0x1bc   : > { %5340 = vmatmul.mubr.msk.bf16.gmra.mrb[20].mxu1 %vm602_vm14, %v6459_v62 }
 0x1bd   : > { %1556 = vmatprep.mubr.bf16.mxu1 %v8750_v9 }
 0x1c0   : > { %5504 = vmatmul.mubr.msk.bf16.vlgmr.msra.gmra.mrb[0].mxu0 %vm602_vm14, %v6460_v49 }
 0x1c1   : > { %3055 = vmatpush1.bf16.msra.mxu0 %v2947_v61  ;;  %2766 = vmatprep.mubr.bf16.mxu0 %v8750_v9  ;;  %v3228_v61 = vld [vmem:[%s8742_s2 + $0x8] sm:$0xff] }
 0x1c2   : > { %5545 = vmatprep.subr.msk.bf16.mxu0 %vm7616_vm8, %v2923_v0  ;;  %3254 = vperm.xlu1 %6342, %v3228_v61  }
 0x1c4   : > { %5341 = vmatmul.mubr.msk.bf16.gmra.mrb[24].mxu1 %vm602_vm14, %v6461_v3  ;;  %v6483_v3 = vld [vmem:[%s8741_s1 + $0x2c8] sm:$0xff]  }
 0x1c5   : > { %1566 = vmatprep.mubr.bf16.mxu1 %v8750_v9  ;;  %3057 = vmatpush1.bf16.msra.mxu0 %v2949_v18  ;;  %v3231_v18 = vld [vmem:[%s8742_s2 + $0x20] sm:$0xff] }
 0x1c6   : > { %5546 = vmatprep.subr.msk.bf16.mxu0 %vm7616_vm8, %v2927_v8  ;;  %3259 = vperm.xlu1 %6342, %v3229_v23  }
 0x1c8   : > { %5505 = vmatmul.mubr.msk.bf16.gmra.mrb[4].mxu0 %vm602_vm14, %v6462_v32 }
 0x1c9   : > { %2776 = vmatprep.mubr.bf16.mxu0 %v8750_v9  ;;  %3059 = vmatpush1.bf16.msra.mxu0 %v2951_v30 }
 0x1ca   : > { %3264 = vperm.xlu1 %6342, %v3230_v43  }
 0x1cc   : > { %5342 = vmatmul.mubr.msk.bf16.gmra.mrb[28].mxu1 %vm602_vm14, %v6463_v58 }
 0x1cd   : > { %1576 = vmatprep.mubr.bf16.mxu1 %v8750_v9 }
 0x1ce   : > { %3299 = vperm.xlu1 %6342, %v3237_v59  }
 0x1d0   : > { %5506 = vmatmul.mubr.msk.bf16.gmra.mrb[8].mxu0 %vm602_vm14, %v6464_v53 }
 0x1d1   : > { %2786 = vmatprep.mubr.bf16.mxu0 %v8750_v9 }
 0x1d2   : > { %3269 = vperm.xlu1 %6342, %v3231_v18  }
 0x1d4   : > { %5343 = vmatmul.mubr.msk.bf16.gmra.mrb[32].mxu1 %vm602_vm14, %v6465_v50 }
 0x1d5   : > { %1586 = vmatprep.mubr.bf16.mxu1 %v8750_v9 }
 0x1d6   : > { %3304 = vperm.xlu1 %6342, %v3238_v2  }
 0x1d8   : > { %5507 = vmatmul.mubr.msk.bf16.gmra.mrb[12].mxu0 %vm602_vm14, %v6466_v17 }
 0x1d9   : > { %2796 = vmatprep.mubr.bf16.mxu0 %v8750_v9 }
 0x1da   : > { %3309 = vperm.xlu1 %6342, %v3239_v39  }
 0x1dc   : > { %5344 = vmatmul.mubr.msk.bf16.gmra.mrb[36].mxu1 %vm602_vm14, %v6467_v45 }
 0x1de   : > { %3314 = vperm.xlu1 %6342, %v3240_v54  }
 0x1e0   : > { %5508 = vmatmul.mubr.msk.bf16.gmra.mrb[16].mxu0 %vm602_vm14, %v6468_v63 }
 0x1e1   : > { %2806 = vmatprep.mubr.bf16.mxu0 %v8750_v9 }
 0x1e2   : > { %3319 = vperm.xlu1 %6342, %v3241_v47  }
 0x1e8   : > { %5509 = vmatmul.mubr.msk.bf16.gmra.mrb[20].mxu0 %vm602_vm14, %v6469_v13 }
 0x1e9   : > { %2816 = vmatprep.mubr.bf16.mxu0 %v8750_v9 }
 0x1f0   : > { %5510 = vmatmul.mubr.msk.bf16.gmra.mrb[24].mxu0 %vm602_vm14, %v6470_v4 }
 0x1f1   : > { %2826 = vmatprep.mubr.bf16.mxu0 %v8750_v9 }
 0x1f3   : > { %v7993_v39 = vpop.permute.xlu1 %3274 }
 0x1f8   : > { %5511 = vmatmul.mubr.msk.bf16.gmra.mrb[28].mxu0 %vm602_vm14, %v6471_v46 }
 0x1f9   : > { %2836 = vmatprep.mubr.bf16.mxu0 %v8750_v9 }
 0x200   : > { %5512 = vmatmul.mubr.msk.bf16.gmra.mrb[32].mxu0 %vm602_vm14, %v6472_v33  ;;  %v3250_v33 = vpop.permute.xlu0 %3249 }
 0x201   : > { %2846 = vmatprep.mubr.bf16.mxu0 %v8750_v9 }
 0x208   : > { %5513 = vmatmul.mubr.msk.bf16.gmra.mrb[36].mxu0 %vm602_vm14, %v6473_v44 }
 0x209   : > { %3086 = vmatprep.mubr.bf16.mxu0 %v8750_v9 }
 0x210   : > { %5547 = vmatmul.mubr.msk.bf16.vlgmr.msra.gmra.mrb[0].mxu0 %vm602_vm14, %v6474_v6 }
 0x211   : > { %3096 = vmatprep.mubr.bf16.mxu0 %v8750_v9 }
 0x218   : > { %5548 = vmatmul.mubr.msk.bf16.gmra.mrb[4].mxu0 %vm602_vm14, %v6475_v26 }
 0x219   : > { %3106 = vmatprep.mubr.bf16.mxu0 %v8750_v9 }
 0x220   : > { %5549 = vmatmul.mubr.msk.bf16.gmra.mrb[8].mxu0 %vm602_vm14, %v6476_v7 }
 0x221   : > { %3116 = vmatprep.mubr.bf16.mxu0 %v8750_v9 }
 0x228   : > { %5550 = vmatmul.mubr.msk.bf16.gmra.mrb[12].mxu0 %vm602_vm14, %v6477_v10 }
 0x229   : > { %3126 = vmatprep.mubr.bf16.mxu0 %v8750_v9 }
 0x230   : > { %5551 = vmatmul.mubr.msk.bf16.gmra.mrb[16].mxu0 %vm602_vm14, %v6478_v19 }
 0x231   : > { %3136 = vmatprep.mubr.bf16.mxu0 %v8750_v9 }
 0x237   : > { %v1170_v30 = vpop.f32.mrb[0].mxu1 }
 0x238   : > { %v1172_v11 = vpop.f32.mrb[1].mxu1  ;;  %5552 = vmatmul.mubr.msk.bf16.gmra.mrb[20].mxu0 %vm602_vm14, %v6479_v29 }
 0x239   : > { %v1174_v27 = vpop.f32.mrb[2].mxu1  ;;  %3146 = vmatprep.mubr.bf16.mxu0 %v8750_v9 }
 0x23a   : > { %v1176_v28 = vpop.f32.mrb[3].mxu1 }
 0x23f   : > { %v7905_v34 = vpop.f32.mrb[4].mxu1 }
 0x240   : > { %v7907_v41 = vpop.f32.mrb[5].mxu1  ;;  %5553 = vmatmul.mubr.msk.bf16.gmra.mrb[24].mxu0 %vm602_vm14, %v6480_v31 }
 0x241   : > { %v7910_v38 = vpop.f32.mrb[6].mxu1  ;;  %3156 = vmatprep.mubr.bf16.mxu0 %v8750_v9  ;;  %v3255_v40 = vpop.permute.xlu1 %3254 }
 0x242   : > { %v7913_v42 = vpop.f32.mrb[7].mxu1 }
 0x245   : > { %v3260_v47 = vpop.permute.xlu1 %3259 }
 0x247   : > { %v7918_v37 = vpop.f32.mrb[8].mxu1 }
 0x248   : > { %v7920_v20 = vpop.f32.mrb[9].mxu1  ;;  %5554 = vmatmul.mubr.msk.bf16.gmra.mrb[28].mxu0 %vm602_vm14, %v6481_v36 }
 0x249   : > { %v7923_v57 = vpop.f32.mrb[10].mxu1  ;;  %3166 = vmatprep.mubr.bf16.mxu0 %v8750_v9 }
 0x24a   : > { %v7926_v35 = vpop.f32.mrb[11].mxu1 }
 0x24f   : > { %v7931_v56 = vpop.f32.mrb[12].mxu1 }
 0x250   : > { %v7933_v62 = vpop.f32.mrb[13].mxu1  ;;  %5555 = vmatmul.mubr.msk.bf16.gmra.mrb[32].mxu0 %vm602_vm14, %v6482_v55 }
 0x251   : > { %v7936_v49 = vpop.f32.mrb[14].mxu1  ;;  %3176 = vmatprep.mubr.bf16.mxu0 %v8750_v9 }
 0x252   : > { %v7939_v0 = vpop.f32.mrb[15].mxu1 }
 0x258   : > { %5556 = vmatmul.mubr.msk.bf16.gmra.mrb[36].mxu0 %vm602_vm14, %v6483_v3  ;;  %v3265_v3 = vpop.permute.xlu1 %3264 }
 0x287   : > { %v7945_v8 = vpop.f32.mrb[16].mxu1 }
 0x288   : > { %v7947_v32 = vpop.f32.mrb[17].mxu1 }
 0x289   : > { %v7949_v58 = vpop.f32.mrb[18].mxu1 }
 0x28a   : > { %v7951_v53 = vpop.f32.mrb[19].mxu1 }
 0x28f   : > { %v7953_v50 = vpop.f32.mrb[20].mxu1 }
 0x290   : > { %v7955_v17 = vpop.f32.mrb[21].mxu1 }
 0x291   : > { %v7957_v45 = vpop.f32.mrb[22].mxu1 }
 0x292   : > { %v7959_v52 = vpop.f32.mrb[23].mxu1 }
 0x297   : > { %v7961_v21 = vpop.f32.mrb[24].mxu1 }
 0x298   : > { %v7963_v61 = vpop.f32.mrb[25].mxu1 }
 0x299   : > { %v7965_v22 = vpop.f32.mrb[26].mxu1 }
 0x29a   : > { %v7967_v63 = vpop.f32.mrb[27].mxu1 }
 0x29f   : > { %v7969_v23 = vpop.f32.mrb[28].mxu1 }
 0x2a0   : > { %v7971_v60 = vpop.f32.mrb[29].mxu1 }
 0x2a1   : > { %v7973_v43 = vpop.f32.mrb[30].mxu1 }
 0x2a2   : > { %v7975_v12 = vpop.f32.mrb[31].mxu1 }
 0x2a7   : > { %v7977_v13 = vpop.f32.mrb[32].mxu1 }
 0x2a8   : > { %v7979_v59 = vpop.f32.mrb[33].mxu1 }
 0x2a9   : > { %v7981_v1 = vpop.f32.mrb[34].mxu1 }
 0x2aa   : > { %v7983_v18 = vpop.f32.mrb[35].mxu1 }
 0x2af   : > { %v7985_v5 = vpop.f32.mrb[36].mxu1 }
 0x2b0   : > { %v7987_v4 = vpop.f32.mrb[37].mxu1 }
 0x2b1   : > { %v7989_v2 = vpop.f32.mrb[38].mxu1 }
 0x2b2   : > { %v7991_v51 = vpop.f32.mrb[39].mxu1 }
 0x2e3   : > { %v3088_v46 = vpop.f32.mrb[0].mxu0 }
 0x2e4   : > { %v5897_v44 = vadd.f32 %v3088_v46, %v1170_v30  ;;  %v3090_v54 = vpop.f32.mrb[1].mxu0 }
 0x2e5   : > { %v5898_v48 = vadd.f32 %v3090_v54, %v1172_v11  ;;  %v3092_v6 = vpop.f32.mrb[2].mxu0 }
 0x2e6   : > { %v5899_v14 = vadd.f32 %v3092_v6, %v1174_v27  ;;  %v3347_v26 = vadd.f32 %v5897_v44, %v3250_v33  ;;  %v3094_v7 = vpop.f32.mrb[3].mxu0  ;;  %v7999_v6 = vpop.permute.xlu1 %3299 }
 0x2e7   : > { %v3348_v10 = vadd.f32 %v5898_v48, %v3250_v33  ;;  %v5900_v19 = vadd.f32 %v3094_v7, %v1176_v28  ;;  %v3280_v33 = vpop.permute.xlu0 %3279 }
 0x2e8   : > { %v3349_v29 = vadd.f32 %v5899_v14, %v3255_v40  ;;  %v5557_v31 = vmul.f32 -1.442695, %v3347_v26 }
 0x2e9   : > { %v5558_v36 = vmul.f32 -1.442695, %v3348_v10  ;;  %v3350_v44 = vadd.f32 %v5900_v19, %v3255_v40 }
 0x2ea   : > { %v5559_v15 = vmul.f32 -1.442695, %v3349_v29  ;;  %6502 = vpow2.f32 %v5557_v31 }
 0x2eb   : > { %v3098_v55 = vpop.f32.mrb[4].mxu0  ;;  %6504 = vpow2.f32 %v5558_v36  ;;  %v5560_v14 = vmul.f32 -1.442695, %v3350_v44 }
 0x2ec   : > { %v5901_v9 = vadd.f32 %v3098_v55, %v7905_v34  ;;  %v3100_v24 = vpop.f32.mrb[5].mxu0  ;;  %6506 = vpow2.f32 %v5559_v15 }
 0x2ed   : > { %v5902_v30 = vadd.f32 %v3100_v24, %v7907_v41  ;;  %v3102_v46 = vpop.f32.mrb[6].mxu0  ;;  %6508 = vpow2.f32 %v5560_v14 }
 0x2ee   : > { %v5903_v11 = vadd.f32 %v3102_v46, %v7910_v38  ;;  %v3104_v27 = vpop.f32.mrb[7].mxu0  ;;  %v3351_v54 = vadd.f32 %v5901_v9, %v3260_v47  ;;  %v3285_v38 = vpop.permute.xlu0 %3284 }
 0x2ef   : > { %v5904_v28 = vadd.f32 %v3104_v27, %v7913_v42  ;;  %v3352_v48 = vadd.f32 %v5902_v30, %v3260_v47  ;;  %v3270_v9 = vpop.permute.xlu1 %3269 }
 0x2f0   : > { %v5561_v26 = vmul.f32 -1.442695, %v3351_v54  ;;  %v3353_v7 = vadd.f32 %v5903_v11, %v3265_v3 }
 0x2f1   : > { %v5562_v10 = vmul.f32 -1.442695, %v3352_v48  ;;  %v3354_v19 = vadd.f32 %v5904_v28, %v3265_v3 }
 0x2f2   : > { %6510 = vpow2.f32 %v5561_v26  ;;  %v5563_v36 = vmul.f32 -1.442695, %v3353_v7 }
 0x2f3   : > { %v3108_v34 = vpop.f32.mrb[8].mxu0  ;;  %6512 = vpow2.f32 %v5562_v10  ;;  %v5564_v30 = vmul.f32 -1.442695, %v3354_v19 }
 0x2f4   : > { %v5905_v24 = vadd.f32 %v3108_v34, %v7918_v37  ;;  %v3110_v41 = vpop.f32.mrb[9].mxu0  ;;  %v6503_v31 = vpop.eup %6502  ;;  %6514 = vpow2.f32 %v5563_v36 }
 0x2f5   : > { %v5906_v29 = vadd.f32 %v3110_v41, %v7920_v20  ;;  %v3112_v40 = vpop.f32.mrb[10].mxu0  ;;  %v6505_v55 = vpop.eup %6504  ;;  %v3417_v11 = vadd.f32 1.0, %v6503_v31  ;;  %6516 = vpow2.f32 %v5564_v30 }
 0x2f6   : > { %v5907_v42 = vadd.f32 %v3112_v40, %v7923_v57  ;;  %v3114_v15 = vpop.f32.mrb[11].mxu0  ;;  %v6507_v37 = vpop.eup %6506  ;;  %v3355_v46 = vadd.f32 %v5905_v24, %v3270_v9  ;;  %v3418_v3 = vadd.f32 1.0, %v6505_v55 }
 0x2f7   : > { %v5908_v47 = vadd.f32 %v3114_v15, %v7926_v35  ;;  %v3356_v27 = vadd.f32 %v5906_v29, %v3270_v9  ;;  %v3290_v20 = vpop.permute.xlu0 %3289  ;;  %v3419_v35 = vadd.f32 1.0, %v6507_v37  ;;  %6518 = vrcp.f32 %v3417_v11  ;;  %v6509_v19 = vpop.eup %6508 }
 0x2f8   : > { %v3357_v57 = vadd.f32 %v5907_v42, %v7993_v39  ;;  %v5565_v26 = vmul.f32 -1.442695, %v3355_v46  ;;  %6520 = vrcp.f32 %v3418_v3  ;;  %v3420_v36 = vadd.f32 1.0, %v6509_v19 }
 0x2f9   : > { %v3358_v48 = vadd.f32 %v5908_v47, %v7993_v39  ;;  %v5566_v10 = vmul.f32 -1.442695, %v3356_v27  ;;  %6522 = vrcp.f32 %v3419_v35 }
 0x2fa   : > { %6524 = vpow2.f32 %v5565_v26 }
 0x2fb   : > { %v3118_v44 = vpop.f32.mrb[12].mxu0  ;;  %v5568_v42 = vmul.f32 -1.442695, %v3358_v48  ;;  %v8011_v39 = vpop.permute.xlu0 %3324  ;;  %6526 = vpow2.f32 %v5566_v10 }
 0x2fc   : > { %v5909_v28 = vadd.f32 %v3118_v44, %v7931_v56  ;;  %v3120_v54 = vpop.f32.mrb[13].mxu0  ;;  %v5567_v56 = vmul.f32 -1.442695, %v3357_v57 }
 0x2fd   : > { %v5910_v14 = vadd.f32 %v3120_v54, %v7933_v62  ;;  %v3122_v34 = vpop.f32.mrb[14].mxu0  ;;  %v6511_v62 = vpop.eup %6510 }
 0x2fe   : > { %v3359_v7 = vadd.f32 %v5909_v28, %v3280_v33  ;;  %v5911_v24 = vadd.f32 %v3122_v34, %v7936_v49  ;;  %v3124_v41 = vpop.f32.mrb[15].mxu0  ;;  %v6513_v9 = vpop.eup %6512  ;;  %6528 = vpow2.f32 %v5567_v56  ;;  %v3421_v37 = vadd.f32 1.0, %v6511_v62 }
 0x2ff   : > { %v3360_v29 = vadd.f32 %v5910_v14, %v3280_v33  ;;  %v5912_v40 = vadd.f32 %v3124_v41, %v7939_v0  ;;  %6530 = vpow2.f32 %v5568_v42  ;;  %v6515_v11 = vpop.eup %6514  ;;  %v3422_v27 = vadd.f32 1.0, %v6513_v9  ;;  %v3295_v54 = vpop.permute.xlu0 %3294 }
 0x300   : > { %v5569_v15 = vmul.f32 -1.442695, %v3359_v7  ;;  %v3361_v49 = vadd.f32 %v5911_v24, %v3285_v38 }
 0x301   : > { %v5570_v47 = vmul.f32 -1.442695, %v3360_v29  ;;  %v3362_v33 = vadd.f32 %v5912_v40, %v3285_v38 }
 0x302   : > { %6532 = vpow2.f32 %v5569_v15  ;;  %v5571_v28 = vmul.f32 -1.442695, %v3361_v49 }
 0x303   : > { %v3128_v31 = vpop.f32.mrb[16].mxu0  ;;  %6534 = vpow2.f32 %v5570_v47  ;;  %v5572_v48 = vmul.f32 -1.442695, %v3362_v33 }
 0x304   : > { %v5913_v0 = vadd.f32 %v3128_v31, %v7945_v8  ;;  %v3130_v55 = vpop.f32.mrb[17].mxu0  ;;  %v6517_v8 = vpop.eup %6516  ;;  %6536 = vrcp.f32 %v3420_v36 }
 0x305   : > { %v5914_v30 = vadd.f32 %v3130_v55, %v7947_v32  ;;  %v3132_v46 = vpop.f32.mrb[18].mxu0  ;;  %v8017_v34 = vpop.eup %6518  ;;  %6538 = vrcp.f32 %v3421_v37  ;;  %v3423_v32 = vadd.f32 1.0, %v6515_v11  ;;  %v3424_v9 = vadd.f32 1.0, %v6517_v8 }
 0x306   : > { %v3363_v44 = vadd.f32 %v5913_v0, %v3290_v20  ;;  %v5915_v3 = vadd.f32 %v3132_v46, %v7949_v58  ;;  %v3134_v57 = vpop.f32.mrb[19].mxu0  ;;  %v8019_v7 = vpop.eup %6520  ;;  %6540 = vrcp.f32 %v3422_v27 }
 0x307   : > { %v3364_v35 = vadd.f32 %v5914_v30, %v3290_v20  ;;  %v5916_v38 = vadd.f32 %v3134_v57, %v7951_v53  ;;  %v8021_v24 = vpop.eup %6522  ;;  %6542 = vpow2.f32 %v5571_v28  ;;  %v3305_v55 = vpop.permute.xlu1 %3304 }
 0x308   : > { %v3365_v14 = vadd.f32 %v5915_v3, %v3295_v54  ;;  %v5573_v58 = vmul.f32 -1.442695, %v3363_v44  ;;  %v6525_v10 = vpop.eup %6524  ;;  %6544 = vpow2.f32 %v5572_v48 }
 0x309   : > { %v3366_v26 = vadd.f32 %v5916_v38, %v3295_v54  ;;  %v5574_v41 = vmul.f32 -1.442695, %v3364_v35  ;;  %v6527_v56 = vpop.eup %6526  ;;  %6546 = vrcp.f32 %v3423_v32  ;;  %v3425_v36 = vadd.f32 1.0, %v6525_v10 }
 0x30a   : > { %v5575_v53 = vmul.f32 -1.442695, %v3365_v14  ;;  %v6529_v15 = vpop.eup %6528  ;;  %6548 = vpow2.f32 %v5573_v58 }
 0x30b   : > { %v3138_v20 = vpop.f32.mrb[20].mxu0  ;;  %v5576_v19 = vmul.f32 -1.442695, %v3366_v26  ;;  %v6531_v31 = vpop.eup %6530  ;;  %6550 = vpow2.f32 %v5574_v41  ;;  %v3477_v30 = vadd.f32 1.0, %v6529_v15 }
 0x30c   : > { %v5917_v29 = vadd.f32 %v3138_v20, %v7953_v50  ;;  %v3140_v40 = vpop.f32.mrb[21].mxu0  ;;  %v6533_v0 = vpop.eup %6532  ;;  %v3426_v50 = vadd.f32 1.0, %v6527_v56  ;;  %6552 = vpow2.f32 %v5575_v53  ;;  %v3478_v11 = vadd.f32 1.0, %v6531_v31 }
 0x30d   : > { %v5918_v42 = vadd.f32 %v3140_v40, %v7955_v17  ;;  %v3142_v62 = vpop.f32.mrb[22].mxu0  ;;  %v6535_v37 = vpop.eup %6534  ;;  %6554 = vpow2.f32 %v5576_v19  ;;  %v3479_v44 = vadd.f32 1.0, %v6533_v0 }
 0x30e   : > { %v5919_v47 = vadd.f32 %v3142_v62, %v7957_v45  ;;  %v3144_v49 = vpop.f32.mrb[23].mxu0  ;;  %v3367_v17 = vadd.f32 %v5917_v29, %v7999_v6  ;;  %v8028_v46 = vpop.eup %6536  ;;  %6556 = vrcp.f32 %v3424_v9  ;;  %v3480_v28 = vadd.f32 1.0, %v6535_v37 }
 0x30f   : > { %v5920_v33 = vadd.f32 %v3144_v49, %v7959_v52  ;;  %v3368_v45 = vadd.f32 %v5918_v42, %v7999_v6  ;;  %v8031_v27 = vpop.eup %6538  ;;  %6558 = vrcp.f32 %v3425_v36  ;;  %v3310_v32 = vpop.permute.xlu1 %3309 }
 0x310   : > { %v3369_v52 = vadd.f32 %v5919_v47, %v3305_v55  ;;  %v8033_v57 = vpop.eup %6540  ;;  %6560 = vrcp.f32 %v3426_v50  ;;  %v5577_v8 = vmul.f32 -1.442695, %v3367_v17  ;;  %v3330_v50 = vpop.permute.xlu0 %3329 }
 0x311   : > { %v6543_v38 = vpop.eup %6542  ;;  %6562 = vrcp.f32 %v3477_v30  ;;  %v5578_v26 = vmul.f32 -1.442695, %v3368_v45  ;;  %v3370_v58 = vadd.f32 %v5920_v33, %v3305_v55 }
 0x312   : > { %v6545_v6 = vpop.eup %6544  ;;  %6564 = vrcp.f32 %v3478_v11  ;;  %v5579_v53 = vmul.f32 -1.442695, %v3369_v52  ;;  %v3481_v40 = vadd.f32 1.0, %v6543_v38 }
 0x313   : > { %v3148_v3 = vpop.f32.mrb[24].mxu0  ;;  %v8038_v10 = vpop.eup %6546  ;;  %6566 = vrcp.f32 %v3479_v44  ;;  %v5580_v42 = vmul.f32 -1.442695, %v3370_v58 }
 0x314   : > { %v5921_v54 = vadd.f32 %v3148_v3, %v7961_v21  ;;  %v3150_v35 = vpop.f32.mrb[25].mxu0  ;;  %v6549_v29 = vpop.eup %6548  ;;  %6568 = vrcp.f32 %v3480_v28 }
 0x315   : > { %v5922_v48 = vadd.f32 %v3150_v35, %v7963_v61  ;;  %v3152_v14 = vpop.f32.mrb[26].mxu0  ;;  %v6551_v56 = vpop.eup %6550  ;;  %v3482_v61 = vadd.f32 1.0, %v6545_v6  ;;  %6570 = vpow2.f32 %v5577_v8  ;;  %v3483_v15 = vadd.f32 1.0, %v6549_v29 }
 0x316   : > { %v5923_v41 = vadd.f32 %v3152_v14, %v7965_v22  ;;  %v3154_v20 = vpop.f32.mrb[27].mxu0  ;;  %v6553_v19 = vpop.eup %6552  ;;  %6572 = vpow2.f32 %v5578_v26  ;;  %v3371_v22 = vadd.f32 %v5921_v54, %v3310_v32  ;;  %v3484_v49 = vadd.f32 1.0, %v6551_v56 }
 0x317   : > { %v5924_v21 = vadd.f32 %v3154_v20, %v7967_v63  ;;  %v6555_v62 = vpop.eup %6554  ;;  %6574 = vpow2.f32 %v5579_v53  ;;  %v3315_v31 = vpop.permute.xlu1 %3314  ;;  %v3372_v63 = vadd.f32 %v5922_v48, %v3310_v32  ;;  %v3485_v55 = vadd.f32 1.0, %v6553_v19 }
 0x318   : > { %v8041_v47 = vpop.eup %6556  ;;  %6576 = vrcp.f32 %v3481_v40  ;;  %v3373_v37 = vadd.f32 %v5923_v41, %v3315_v31  ;;  %v3486_v45 = vadd.f32 1.0, %v6555_v62  ;;  %v3335_v6 = vpop.permute.xlu0 %3334 }
 0x319   : > { %v8044_v0 = vpop.eup %6558  ;;  %6578 = vrcp.f32 %v3482_v61  ;;  %v3374_v44 = vadd.f32 %v5924_v21, %v3315_v31  ;;  %v5582_v38 = vmul.f32 -1.442695, %v3372_v63 }
 0x31a   : > { %v8047_v11 = vpop.eup %6560  ;;  %6580 = vpow2.f32 %v5580_v42  ;;  %v5583_v8 = vmul.f32 -1.442695, %v3373_v37 }
 0x31b   : > { %v3158_v9 = vpop.f32.mrb[28].mxu0  ;;  %v8050_v28 = vpop.eup %6562  ;;  %6582 = vrcp.f32 %v3483_v15  ;;  %v5584_v14 = vmul.f32 -1.442695, %v3374_v44 }
 0x31c   : > { %v5925_v36 = vadd.f32 %v3158_v9, %v7969_v23  ;;  %v3160_v33 = vpop.f32.mrb[29].mxu0  ;;  %v5581_v23 = vmul.f32 -1.442695, %v3371_v22  ;;  %v8053_v35 = vpop.eup %6564  ;;  %6584 = vrcp.f32 %v3484_v49 }
 0x31d   : > { %v5926_v30 = vadd.f32 %v3160_v33, %v7971_v60  ;;  %v3162_v17 = vpop.f32.mrb[30].mxu0  ;;  %v8055_v60 = vpop.eup %6566  ;;  %6586 = vrcp.f32 %v3485_v55 }
 0x31e   : > { %v5927_v52 = vadd.f32 %v3162_v17, %v7973_v43  ;;  %v3164_v3 = vpop.f32.mrb[31].mxu0  ;;  %v8057_v48 = vpop.eup %6568  ;;  %6588 = vrcp.f32 %v3486_v45 }
 0x31f   : > { %v5928_v54 = vadd.f32 %v3164_v3, %v7975_v12  ;;  %v6571_v43 = vpop.eup %6570  ;;  %6590 = vpow2.f32 %v5581_v23  ;;  %v3320_v12 = vpop.permute.xlu1 %3319 }
 0x320   : > { %v3377_v32 = vadd.f32 %v5927_v52, %v8011_v39  ;;  %v6573_v58 = vpop.eup %6572  ;;  %6592 = vpow2.f32 %v5582_v38  ;;  %v3375_v29 = vadd.f32 %v5925_v36, %v3320_v12  ;;  %v3537_v19 = vadd.f32 1.0, %v6571_v43  ;;  %v3340_v36 = vpop.permute.xlu0 %3339 }
 0x321   : > { %v3378_v41 = vadd.f32 %v5928_v54, %v8011_v39  ;;  %v6575_v21 = vpop.eup %6574  ;;  %6594 = vpow2.f32 %v5583_v8  ;;  %v3538_v39 = vadd.f32 1.0, %v6573_v58  ;;  %v3376_v55 = vadd.f32 %v5926_v30, %v3320_v12  ;;  %v3578_v58 = vld [vmem:[#allocation3 + $0x8] sm:$0xff] }
 0x322   : > { %v8063_v61 = vpop.eup %6576  ;;  %6596 = vpow2.f32 %v5584_v14  ;;  %v3539_v49 = vadd.f32 1.0, %v6575_v21 }
 0x323   : > { %v3168_v26 = vpop.f32.mrb[32].mxu0  ;;  %v8066_v22 = vpop.eup %6578  ;;  %6598 = vtanh.f32 %v3377_v32  ;;  %v3577_v32 = vld [vmem:[#allocation3] sm:$0xff] }
 0x324   : > { %v5929_v20 = vadd.f32 %v3168_v26, %v7977_v13  ;;  %v3170_v53 = vpop.f32.mrb[33].mxu0  ;;  %v6581_v9 = vpop.eup %6580  ;;  %6600 = vtanh.f32 %v3378_v41  ;;  %v5586_v26 = vmul.f32 -1.442695, %v3376_v55 }
 0x325   : > { %v5930_v40 = vadd.f32 %v3170_v53, %v7979_v59  ;;  %v3172_v56 = vpop.f32.mrb[34].mxu0  ;;  %v8069_v31 = vpop.eup %6582  ;;  %v5585_v59 = vmul.f32 -1.442695, %v3375_v29 }
 0x326   : > { %v3379_v42 = vadd.f32 %v5929_v20, %v3330_v50  ;;  %v5931_v62 = vadd.f32 %v3172_v56, %v7981_v1  ;;  %v3174_v15 = vpop.f32.mrb[35].mxu0  ;;  %v8071_v63 = vpop.eup %6584  ;;  %v3579_v20 = vld [vmem:[#allocation3 + $0x10] sm:$0xff]  ;;  %v3588_v56 = vmul.f32 %v8053_v35, %v3578_v58 }
 0x327   : > { %v5932_v13 = vadd.f32 %v3174_v15, %v7983_v18  ;;  %v3380_v33 = vadd.f32 %v5930_v40, %v3330_v50  ;;  %v8073_v1 = vpop.eup %6586  ;;  %v3540_v50 = vadd.f32 1.0, %v6581_v9  ;;  %v3345_v12 = vpop.permute.xlu0 %3344  ;;  %v3580_v9 = vld [vmem:[#allocation3 + $0x18] sm:$0xff] }
 0x328   : > { %6602 = vtanh.f32 %v3379_v42  ;;  %v3381_v37 = vadd.f32 %v5931_v62, %v3335_v6  ;;  %v8075_v45 = vpop.eup %6588  ;;  %v3589_v42 = vmul.f32 %v8055_v60, %v3579_v20 }
 0x329   : > { %6604 = vrcp.f32 %v3537_v19  ;;  %v3382_v18 = vadd.f32 %v5932_v13, %v3335_v6  ;;  %v6591_v3 = vpop.eup %6590 }
 0x32a   : > { %6606 = vrcp.f32 %v3538_v39  ;;  %v6593_v38 = vpop.eup %6592  ;;  %v3541_v35 = vadd.f32 1.0, %v6591_v3 }
 0x32b   : > { %v3178_v17 = vpop.f32.mrb[36].mxu0  ;;  %6608 = vrcp.f32 %v3539_v49  ;;  %v6595_v43 = vpop.eup %6594 }
 0x32c   : > { %v5933_v44 = vadd.f32 %v3178_v17, %v7985_v5  ;;  %v3180_v52 = vpop.f32.mrb[37].mxu0  ;;  %6610 = vpow2.f32 %v5585_v59  ;;  %v8081_v5 = vpop.eup %6596  ;;  %v3581_v59 = vld [vmem:[#allocation3 + $0x20] sm:$0xff]  ;;  %v3583_v17 = vld [vmem:[#allocation3 + $0x30] sm:$0xff] }
 0x32d   : > { %v5934_v23 = vadd.f32 %v3180_v52, %v7987_v4  ;;  %v3182_v54 = vpop.f32.mrb[38].mxu0  ;;  %6612 = vtanh.f32 %v3380_v33  ;;  %v6599_v41 = vpop.eup %6598  ;;  %v3543_v33 = vadd.f32 1.0, %v6595_v43  ;;  %v3591_v52 = vmul.f32 %v8063_v61, %v3581_v59  ;;  %v3585_v61 = vld [vmem:[#allocation3 + $0x40] sm:$0xff] }
 0x32e   : > { %v3383_v8 = vadd.f32 %v5933_v44, %v3340_v36  ;;  %v5935_v30 = vadd.f32 %v3182_v54, %v7989_v2  ;;  %v3184_v14 = vpop.f32.mrb[39].mxu0  ;;  %6614 = vtanh.f32 %v3381_v37  ;;  %v6601_v21 = vpop.eup %6600  ;;  %v3587_v2 = vmul.f32 %v8050_v28, %v3577_v32 }
 0x32f   : > { %v5936_v6 = vadd.f32 %v3184_v14, %v7991_v51  ;;  %6616 = vtanh.f32 %v3382_v18  ;;  %v3384_v4 = vadd.f32 %v5934_v23, %v3340_v36  ;;  %v3597_v29 = vmul.f32 %v6599_v41, %v8017_v34  ;;  %v3586_v41 = vld [vmem:[#allocation3 + $0x48] sm:$0xff] }
 0x330   : > { %6618 = vtanh.f32 %v3383_v8  ;;  %v3385_v53 = vadd.f32 %v5935_v30, %v3345_v12  ;;  %v3598_v51 = vmul.f32 %v6601_v21, %v8019_v7  ;;  %v3542_v36 = vadd.f32 1.0, %v6593_v38  ;;  %v3584_v30 = vld [vmem:[#allocation3 + $0x38] sm:$0xff] }
 0x331   : > { %6620 = vrcp.f32 %v3540_v50  ;;  %v3607_v62 = vadd.f32 %v3597_v29, %v3587_v2  ;;  %v3386_v13 = vadd.f32 %v5936_v6, %v3345_v12  ;;  %v3590_v37 = vmul.f32 %v8057_v48, %v3580_v9 }
 0x332   : > { %v6603_v40 = vpop.eup %6602  ;;  %6622 = vpow2.f32 %v5586_v26  ;;  %v3608_v28 = vadd.f32 %v3598_v51, %v3588_v56  ;;  %v3593_v48 = vmul.f32 %v8069_v31, %v3583_v17  ;;  %v3544_v32 = vadd.f32 1.0, %v8081_v5 }
 0x333   : > { %v8087_v19 = vpop.eup %6604  ;;  %v3599_v15 = vmul.f32 %v6603_v40, %v8021_v24  ;;  %6624 = vtanh.f32 %v3384_v4  ;;  %3637 = vst [vmem:[#allocation3] sm:$0xff] %v3607_v62  ;;  %v3582_v24 = vld [vmem:[#allocation3 + $0x28] sm:$0xff]  ;;  %v3594_v31 = vmul.f32 %v8071_v63, %v3584_v30  ;;  %v3595_v12 = vmul.f32 %v8073_v1, %v3585_v61  ;;  %v3812_v30 = vld [vmem:[%s8745_s5] sm:$0xff]  ;;  %v3813_v61 = vld [vmem:[%s8745_s5 + $0x8] sm:$0xff] }
 0x334   : > { %v8091_v39 = vpop.eup %6606  ;;  %6626 = vtanh.f32 %v3385_v53  ;;  %3638 = vst [vmem:[#allocation3 + $0x8] sm:$0xff] %v3608_v28  ;;  %v3592_v54 = vmul.f32 %v8066_v22, %v3582_v24  ;;  %v3596_v40 = vmul.f32 %v8075_v45, %v3586_v41 }
 0x335   : > { %v8093_v34 = vpop.eup %6608  ;;  %6628 = vtanh.f32 %v3607_v62  ;;  %v3609_v7 = vadd.f32 %v3599_v15, %v3589_v42 }
 0x336   : > { %v6611_v49 = vpop.eup %6610  ;;  %6630 = vtanh.f32 %v3608_v28 }
 0x337   : > { %v6613_v60 = vpop.eup %6612  ;;  %6632 = vtanh.f32 %v3609_v7  ;;  %3639 = vst [vmem:[#allocation3 + $0x10] sm:$0xff] %v3609_v7  ;;  %v3545_v26 = vadd.f32 1.0, %v6611_v49 }
 0x338   : > { %v6615_v55 = vpop.eup %6614  ;;  %v3600_v18 = vmul.f32 %v6613_v60, %v8028_v46  ;;  %6634 = vtanh.f32 %v3386_v13 }
 0x339   : > { %v6617_v44 = vpop.eup %6616  ;;  %6636 = vrcp.f32 %v3541_v35  ;;  %v3601_v3 = vmul.f32 %v6615_v55, %v8031_v27 }
 0x33a   : > { %v6619_v23 = vpop.eup %6618  ;;  %6638 = vrcp.f32 %v3542_v36  ;;  %v3610_v38 = vadd.f32 %v3600_v18, %v3590_v37  ;;  %v3602_v50 = vmul.f32 %v6617_v44, %v8033_v57 }
 0x33b   : > { %v6621_v8 = vpop.eup %6620  ;;  %6640 = vrcp.f32 %v3543_v33  ;;  %v3611_v46 = vadd.f32 %v3601_v3, %v3591_v52  ;;  %v3603_v14 = vmul.f32 %v6619_v23, %v8038_v10 }
 0x33c   : > { %v6623_v43 = vpop.eup %6622  ;;  %6642 = vtanh.f32 %v3610_v38  ;;  %3640 = vst [vmem:[#allocation3 + $0x18] sm:$0xff] %v3610_v38  ;;  %v3612_v27 = vadd.f32 %v3602_v50, %v3592_v54 }
 0x33d   : > { %v6625_v22 = vpop.eup %6624  ;;  %6644 = vtanh.f32 %v3611_v46  ;;  %3641 = vst [vmem:[#allocation3 + $0x20] sm:$0xff] %v3611_v46  ;;  %v3613_v57 = vadd.f32 %v3603_v14, %v3593_v48  ;;  %v3546_v29 = vadd.f32 1.0, %v6623_v43  ;;  %v3829_v48 = vld [vmem:[%s8745_s5 + $0x88] sm:$0xff] }
 0x33e   : > { %v6627_v6 = vpop.eup %6626  ;;  %6646 = vtanh.f32 %v3612_v27  ;;  %3642 = vst [vmem:[#allocation3 + $0x28] sm:$0xff] %v3612_v27  ;;  %v3604_v58 = vmul.f32 %v6625_v22, %v8041_v47  ;;  %v3831_v27 = vld [vmem:[%s8745_s5 + $0x98] sm:$0xff] }
 0x33f   : > { %v6629_v10 = vpop.eup %6628  ;;  %6648 = vtanh.f32 %v3613_v57  ;;  %3643 = vst [vmem:[#allocation3 + $0x30] sm:$0xff] %v3613_v57  ;;  %v3605_v5 = vmul.f32 %v6627_v6, %v8044_v0  ;;  %v5845_v57 = vpack.c.bf16 %v3813_v61, %v3812_v30  ;;  %v3826_v30 = vld [vmem:[%s8745_s5 + $0x70] sm:$0xff] }
 0x340   : > { %v6631_v4 = vpop.eup %6630  ;;  %6650 = vrcp.f32 %v3544_v32  ;;  %v3614_v20 = vadd.f32 %v3604_v58, %v3594_v31  ;;  %v8109_v53 = vmul.f32 %v6629_v10, %v8087_v19  ;;  %v3830_v32 = vld [vmem:[%s8745_s5 + $0x90] sm:$0xff]  ;;  %v3815_v58 = vld [vmem:[%s8745_s5 + $0x18] sm:$0xff]  ;;  %v3832_v10 = vld [vmem:[%s8745_s5 + $0xa0] sm:$0xff] }
 0x341   : > { %v6633_v21 = vpop.eup %6632  ;;  %6652 = vrcp.f32 %v3545_v26  ;;  %v3615_v63 = vadd.f32 %v3605_v5, %v3595_v12  ;;  %v8112_v2 = vmul.f32 %v6631_v4, %v8091_v39  ;;  %v5847_v6 = vpack.c.bf16 %v3831_v27, %v3830_v32  ;;  %v3814_v31 = vld [vmem:[%s8745_s5 + $0x10] sm:$0xff]  ;;  %v3833_v5 = vld [vmem:[%s8745_s5 + $0xa8] sm:$0xff] }
 0x342   : > { %v6635_v47 = vpop.eup %6634  ;;  %6654 = vtanh.f32 %v3614_v20  ;;  %3644 = vst [vmem:[#allocation3 + $0x38] sm:$0xff] %v3614_v20  ;;  %v8115_v1 = vmul.f32 %v6633_v21, %v8093_v34  ;;  %v5849_v21 = vpack.c.bf16 %v3815_v58, %v3814_v31 }
 0x343   : > { %v6637_v0 = vpop.eup %6636  ;;  %6656 = vtanh.f32 %v3615_v63  ;;  %3645 = vst [vmem:[#allocation3 + $0x40] sm:$0xff] %v3615_v63  ;;  %v3606_v56 = vmul.f32 %v6635_v47, %v8047_v11  ;;  %v6343_v51 = vpack.i.bf16 %v8112_v2, %v8109_v53  ;;  %v5851_v63 = vpack.c.bf16 %v3833_v5, %v3832_v10  ;;  %v3816_v47 = vld [vmem:[%s8745_s5 + $0x20] sm:$0xff] }
 0x344   : > { %v6639_v19 = vpop.eup %6638  ;;  %v3647_v42 = vpack.c.bf16 %v8115_v1, %v8109_v53  ;;  %6658 = vrcp.f32 %v3546_v29  ;;  %v3817_v29 = vld [vmem:[%s8745_s5 + $0x28] sm:$0xff] }
 0x345   : > { %v6641_v62 = vpop.eup %6640  ;;  %v3616_v15 = vadd.f32 %v3606_v56, %v3596_v40  ;;  %6344 = vrot.lane.b32.xlu1 %v6343_v51, %s6726_s24  ;;  %v3834_v40 = vld [vmem:[%s8745_s5 + $0xb0] sm:$0xff]  ;;  %v3835_v56 = vld [vmem:[%s8745_s5 + $0xb8] sm:$0xff] }
 0x346   : > { %v6643_v39 = vpop.eup %6642  ;;  %v3660_v28 = vrot.slane %v3647_v42, 4  ;;  %v5855_v42 = vpack.c.bf16 %v3835_v56, %v3834_v40 }
 0x347   : > { %v6645_v13 = vpop.eup %6644  ;;  %6660 = vtanh.f32 %v3616_v15  ;;  %3646 = vst [vmem:[#allocation3 + $0x48] sm:$0xff] %v3616_v15  ;;  %v8124_v45 = vmul.f32 %v6643_v39, %v6621_v8  ;;  %v3828_v8 = vld [vmem:[%s8745_s5 + $0x80] sm:$0xff]  ;;  %v3819_v15 = vld [vmem:[%s8745_s5 + $0x38] sm:$0xff] }
 0x348   : > { %v6647_v11 = vpop.eup %6646  ;;  %3676 = vst [vmem:[#allocation2] sm:$0xf0] %v3660_v28  ;;  %v8126_v34 = vmul.f32 %v6645_v13, %v6637_v0  ;;  %v5843_v43 = vpack.c.bf16 %v3829_v48, %v3828_v8  ;;  %v3836_v39 = vld [vmem:[%s8745_s5 + $0xc0] sm:$0xff]  ;;  %v3843_v8 = vld [vmem:[%s8745_s5 + $0xf8] sm:$0xff] }
 0x349   : > { %v6649_v9 = vpop.eup %6648  ;;  %v3648_v35 = vpack.c.bf16 %v8124_v45, %v8112_v2  ;;  %v6348_v7 = vpack.i.bf16 %v8124_v45, %v8115_v1  ;;  %v8132_v49 = vmul.f32 %v6647_v11, %v6639_v19  ;;  %v5853_v19 = vpack.c.bf16 %v3817_v29, %v3816_v47 }
 0x34a   : > { %v6651_v59 = vpop.eup %6650  ;;  %v8134_v36 = vmul.f32 %v6649_v9, %v6641_v62  ;;  %5844 = vmatprep.subr.bf16.mxu1 %v5843_v43  ;;  %v3818_v62 = vld [vmem:[%s8745_s5 + $0x30] sm:$0xff]  ;;  %v3820_v9 = vld [vmem:[%s8745_s5 + $0x40] sm:$0xff] }
 0x34b   : > { %v6653_v60 = vpop.eup %6652  ;;  %v3661_v24 = vrot.slane %v3648_v35, 4  ;;  %6349 = vrot.lane.b32.xlu0 %v6348_v7, %s6726_s24  ;;  %v6353_v33 = vpack.i.bf16 %v8132_v49, %v8126_v34  ;;  %5846 = vmatpush3.bf16.msra.mxu1 %v5845_v57  ;;  %v5857_v13 = vpack.c.bf16 %v3819_v15, %v3818_v62  ;;  %v3821_v35 = vld [vmem:[%s8745_s5 + $0x48] sm:$0xff]  ;;  %v3838_v7 = vld [vmem:[%s8745_s5 + $0xd0] sm:$0xff] }
 0x34c   : > { %v6655_v55 = vpop.eup %6654  ;;  %v3649_v37 = vpack.c.bf16 %v8134_v36, %v8126_v34  ;;  %5848 = vmatprep.subr.bf16.mxu1 %v5847_v6 }
 0x34d   : > { %v6657_v17 = vpop.eup %6656  ;;  %3677 = vst [vmem:[#allocation2 + $0x8] sm:$0xf0] %v3661_v24  ;;  %6354 = vrot.lane.b32.xlu1 %v6353_v33, %s6726_s24  ;;  %v8142_v18 = vmul.f32 %v6655_v55, %v6651_v59  ;;  %v3839_v59 = vld [vmem:[%s8745_s5 + $0xd8] sm:$0xff]  ;;  %v3822_v33 = vld [vmem:[%s8745_s5 + $0x50] sm:$0xff] }
 0x34e   : > { %v3662_v44 = vrot.slane %v3649_v37, 4  ;;  %v8144_v52 = vmul.f32 %v6657_v17, %v6653_v60  ;;  %v6659_v54 = vpop.eup %6658  ;;  %v5861_v60 = vpack.c.bf16 %v3821_v35, %v3820_v9  ;;  %v3823_v55 = vld [vmem:[%s8745_s5 + $0x58] sm:$0xff]  ;;  %v3840_v37 = vld [vmem:[%s8745_s5 + $0xe0] sm:$0xff]  ;;  %v3841_v17 = vld [vmem:[%s8745_s5 + $0xe8] sm:$0xff] }
 0x34f   : > { %v3650_v3 = vpack.c.bf16 %v8142_v18, %v8132_v49  ;;  %v6358_v23 = vpack.i.bf16 %v8142_v18, %v8134_v36  ;;  %5850 = vmatpush3.bf16.msra.mxu1 %v5849_v21 }
 0x350   : > { %v3663_v38 = vsel %vm3659_vm1, %v3660_v28, %v3662_v44  ;;  %v3651_v50 = vpack.c.bf16 %v8144_v52, %v8144_v52  ;;  %5852 = vmatprep.subr.bf16.mxu1 %v5851_v63  ;;  %v3837_v28 = vld [vmem:[%s8745_s5 + $0xc8] sm:$0xff] }
 0x351   : > { %v6661_v46 = vpop.eup %6660  ;;  %v3664_v14 = vrot.slane %v3650_v3, 4  ;;  %6359 = vrot.lane.b32.xlu0 %v6358_v23, %s6726_s24  ;;  %3678 = vst [vmem:[#allocation2 + $0x10] sm:$0xff] %v3663_v38  ;;  %v5859_v11 = vpack.c.bf16 %v3837_v28, %v3836_v39  ;;  %v5867_v3 = vpack.c.bf16 %v3841_v17, %v3840_v37  ;;  %v3824_v23 = vld [vmem:[%s8745_s5 + $0x60] sm:$0xff] }
 0x352   : > { %v8172_v22 = vmul.f32 %v6661_v46, %v6659_v54  ;;  %v3666_v26 = vrot.slane %v3651_v50, 4  ;;  %v3825_v54 = vld [vmem:[%s8745_s5 + $0x68] sm:$0xff]  ;;  %v3842_v50 = vld [vmem:[%s8745_s5 + $0xf0] sm:$0xff]  ;;  %v3827_v46 = vld [vmem:[%s8745_s5 + $0x78] sm:$0xff] }
 0x353   : > { %v3665_v12 = vsel %vm3659_vm1, %v3661_v24, %v3664_v14  ;;  %5854 = vmatpush3.bf16.msra.mxu1 %v5853_v19  ;;  %v5863_v24 = vpack.c.bf16 %v3839_v59, %v3838_v7  ;;  %v5869_v38 = vpack.c.bf16 %v3825_v54, %v3824_v23  ;;  %v5871_v48 = vpack.c.bf16 %v3843_v8, %v3842_v50 }
 0x354   : > { %3679 = vst [vmem:[#allocation2 + $0x18] sm:$0xff] %v3665_v12  ;;  %v3652_v4 = vpack.c.bf16 %v8172_v22, %v8172_v22  ;;  %v6363_v41 = vpack.i.bf16 %v8172_v22, %v8144_v52  ;;  %v3667_v20 = vsel %vm3659_vm1, %v3662_v44, %v3666_v26  ;;  %5856 = vmatprep.subr.bf16.mxu1 %v5855_v42 }
 0x355   : > { %3680 = vst [vmem:[#allocation2 + $0x20] sm:$0xff] %v3667_v20  ;;  %v5865_v44 = vpack.c.bf16 %v3823_v55, %v3822_v33 }
 0x356   : > { %v3668_v0 = vrot.slane %v3652_v4, 4  ;;  %6364 = vrot.lane.b32.xlu1 %v6363_v41, %s6726_s24  ;;  %s6736_s24 = smov 65  }
 0x357   : > { %5858 = vmatpush3.bf16.msra.mxu1 %v5857_v13 }
 0x358   : > { %v3669_v51 = vsel %vm3659_vm1, %v3664_v14, %v3668_v0  ;;  %5860 = vmatprep.subr.bf16.mxu1 %v5859_v11  ;;  %v5873_v14 = vpack.c.bf16 %v3827_v46, %v3826_v30  ;;  %vm4190_vm1 = vcmask 56320  }
 0x359   : > { %3681 = vst [vmem:[#allocation2 + $0x28] sm:$0xff] %v3669_v51 }
 0x35b   : > { %5862 = vmatpush3.bf16.msra.mxu1 %v5861_v60 }
 0x35c   : > { %5864 = vmatprep.subr.bf16.mxu1 %v5863_v24 }
 0x35f   : > { %5866 = vmatpush3.bf16.msra.mxu1 %v5865_v44 }
 0x360   : > { %5868 = vmatprep.subr.bf16.mxu1 %v5867_v3 }
 0x363   : > { %5870 = vmatpush3.bf16.msra.mxu1 %v5869_v38 }
 0x364   : > { %5872 = vmatprep.subr.bf16.mxu1 %v5871_v48 }
 0x367   : > { %5874 = vmatpush3.bf16.msra.mxu1 %v5873_v14 }
 0x3b7   : > { %v6345_v43 = vpop.permute.xlu1 %6344 }
 0x3b8   : > { %v6347_v61 = vunpack.i.h.bf16 %v6345_v43  ;;  %v6346_v32 = vunpack.i.l.bf16 %v6345_v43 }
 0x3ba   : > { %v3712_v27 = vsel %vm2581_vm10, %v6346_v32, %v6347_v61  ;;  %v3732_v26 = vsel %vm2581_vm10, %v6347_v61, %v6346_v32 }
 0x3bb   : > { %v3737_v57 = vmax.f32 %v8109_v53, %v3712_v27  ;;  %v3738_v6 = vmax.f32 %v8112_v2, %v3732_v26 }
 0x3bd   : > { %v6350_v31 = vpop.permute.xlu0 %6349  ;;  %v6368_v58 = vpack.i.bf16 %v3738_v6, %v3737_v57 }
 0x3be   : > { %v6352_v10 = vunpack.i.h.bf16 %v6350_v31  ;;  %v6351_v12 = vunpack.i.l.bf16 %v6350_v31 }
 0x3bf   : > { %v6355_v5 = vpop.permute.xlu1 %6354  ;;  %6369 = vrot.lane.b32.xlu0 %v6368_v58, %s6722_s20 }
 0x3c0   : > { %v3713_v4 = vsel %vm2581_vm10, %v6351_v12, %v6352_v10  ;;  %v3733_v41 = vsel %vm2581_vm10, %v6352_v10, %v6351_v12  ;;  %v6357_v20 = vunpack.i.h.bf16 %v6355_v5  ;;  %v6356_v21 = vunpack.i.l.bf16 %v6355_v5 }
 0x3c1   : > { %v3739_v63 = vmax.f32 %v8115_v1, %v3713_v4  ;;  %v3740_v47 = vmax.f32 %v8124_v45, %v3733_v41 }
 0x3c2   : > { %v3714_v53 = vsel %vm2581_vm10, %v6356_v21, %v6357_v20  ;;  %v3734_v2 = vsel %vm2581_vm10, %v6357_v20, %v6356_v21 }
 0x3c3   : > { %v6360_v29 = vpop.permute.xlu0 %6359  ;;  %v6373_v0 = vpack.i.bf16 %v3740_v47, %v3739_v63  ;;  %v3741_v40 = vmax.f32 %v8126_v34, %v3714_v53  ;;  %v3742_v56 = vmax.f32 %v8132_v49, %v3734_v2 }
 0x3c4   : > { %v6362_v51 = vunpack.i.h.bf16 %v6360_v29  ;;  %v6361_v19 = vunpack.i.l.bf16 %v6360_v29 }
 0x3c5   : > { %6374 = vrot.lane.b32.xlu1 %v6373_v0, %s6722_s20  ;;  %v6378_v42 = vpack.i.bf16 %v3742_v56, %v3741_v40 }
 0x3c6   : > { %v3715_v62 = vsel %vm2581_vm10, %v6361_v19, %v6362_v51  ;;  %v3735_v1 = vsel %vm2581_vm10, %v6362_v51, %v6361_v19 }
 0x3c7   : > { %6379 = vrot.lane.b32.xlu0 %v6378_v42, %s6722_s20  ;;  %v3743_v45 = vmax.f32 %v8134_v36, %v3715_v62  ;;  %v3744_v15 = vmax.f32 %v8142_v18, %v3735_v1 }
 0x3c8   : > { %v6365_v39 = vpop.permute.xlu1 %6364 }
 0x3c9   : > { %v6367_v28 = vunpack.i.h.bf16 %v6365_v39  ;;  %v6366_v34 = vunpack.i.l.bf16 %v6365_v39  ;;  %v6383_v13 = vpack.i.bf16 %v3744_v15, %v3743_v45 }
 0x3cb   : > { %v3716_v49 = vsel %vm2581_vm10, %v6366_v34, %v6367_v28  ;;  %v3736_v11 = vsel %vm2581_vm10, %v6367_v28, %v6366_v34  ;;  %6384 = vrot.lane.b32.xlu1 %v6383_v13, %s6722_s20  ;;  %v6484_v28 = vld [vmem:[%s8743_s3 + $0x10] sm:$0xff]   ;;  %vm3957_vm10 = vcmp.ge.s32.totalorder %v6907_v16, 8 }
 0x3cc   : > { %v3745_v9 = vmax.f32 %v8144_v52, %v3716_v49  ;;  %v3746_v35 = vmax.f32 %v8172_v22, %v3736_v11  ;;  %v4921_v49 = vld [vmem:[%s8744_s4 + $0x8] sm:$0xff]  ;;  %v4920_v11 = vld [vmem:[%s8744_s4] sm:$0xff]  ;;  %vm4033_vm5 = vmpackc.low %vm3957_vm10, %vm3957_vm10 }
 0x3ce   : > { %v6388_v7 = vpack.i.bf16 %v3746_v35, %v3745_v9 }
 0x3d0   : > { %6389 = vrot.lane.b32.xlu0 %v6388_v7, %s6722_s20  ;;  %v8798_v7 = vmov 0  }
 0x431   : > { %v6370_v36 = vpop.permute.xlu0 %6369 }
 0x432   : > { %v6372_v59 = vunpack.i.h.bf16 %v6370_v36  ;;  %v6371_v18 = vunpack.i.l.bf16 %v6370_v36  ;;  %v4034_v36 = vsel %vm4033_vm5, 65537, %v8798_v7 }
 0x434   : > { %v3777_v60 = vsel %vm1923_vm6, %v6371_v18, %v6372_v59  ;;  %v3797_v24 = vsel %vm1923_vm6, %v6372_v59, %v6371_v18  ;;  %v4038_v59 = vrot.slane %v4034_v36, %v6930_v25  ;;  %v3949_v18 = vand.u32 7, %v6907_v16 }
 0x435   : > { %v3802_v33 = vmax.f32 %v3737_v57, %v3777_v60  ;;  %v3803_v55 = vmax.f32 %v3738_v6, %v3797_v24  ;;  %v6494_v24 = vld [vmem:[%s8743_s3 + $0x50] sm:$0xff]  }
 0x436   : > { %vm8380_vm0 = vcmp.ne.s16.totalorder %v4038_v59, 0  ;;  %vm8384_vm7 = vcmp.ge.s32.totalorder %v3949_v18, 1  ;;  %vm8404_vm2 = vcmp.le.s32.totalorder %v3949_v18, 6 }
 0x437   : > { %3908 = vmatprep.mubr.f32.mxu1 %v3803_v55  ;;  %v6375_v37 = vpop.permute.xlu1 %6374  ;;  %vm3989_vm11 = vmand %vm3957_vm10, %vm8384_vm7 }
 0x438   : > { %v6377_v17 = vunpack.i.h.bf16 %v6375_v37  ;;  %v6376_v44 = vunpack.i.l.bf16 %v6375_v37  ;;  %3909 = vmatmul.mubr.f32.vlgmr.msra.gmra.mrb[40].mxu1 %v3802_v33  ;;  %vm3992_vm3 = vmpackc.low %vm3989_vm11, %vm3989_vm11 }
 0x439   : > { %v6380_v52 = vpop.permute.xlu0 %6379  ;;  %vm8420_vm13 = vmand %vm3957_vm10, %vm8404_vm2 }
 0x43a   : > { %v6382_v3 = vunpack.i.h.bf16 %v6380_v52  ;;  %v6381_v22 = vunpack.i.l.bf16 %v6380_v52  ;;  %v3798_v23 = vsel %vm1923_vm6, %v6377_v17, %v6376_v44  ;;  %v3778_v54 = vsel %vm1923_vm6, %v6376_v44, %v6377_v17  ;;  %vm4206_vm8 = vmpackc.low %vm8420_vm13, %vm8420_vm13 }
 0x43b   : > { %v3805_v38 = vmax.f32 %v3740_v47, %v3798_v23  ;;  %v3804_v50 = vmax.f32 %v3739_v63, %v3778_v54  ;;  %vm4316_vm10 = vmpackc.low %vm8384_vm7, %vm8384_vm7  ;;  %vm4486_vm13 = vcmask 515072  }
 0x43c   : > { %v3799_v8 = vsel %vm1923_vm6, %v6382_v3, %v6381_v22  ;;  %v3779_v46 = vsel %vm1923_vm6, %v6381_v22, %v6382_v3  ;;  %v3993_v3 = vsel %vm3992_vm3, 65537, %v8798_v7  ;;  %vm4501_vm3 = vmpackc.low %vm8404_vm2, %vm8404_vm2 }
 0x43d   : > { %3913 = vmatprep.mubr.f32.mxu1 %v3805_v38  ;;  %v6385_v48 = vpop.permute.xlu1 %6384  ;;  %v3807_v30 = vmax.f32 %v3742_v56, %v3799_v8  ;;  %v3806_v61 = vmax.f32 %v3741_v40, %v3779_v46  ;;  %v3997_v54 = vrot.slane %v3993_v3, %v6930_v25  ;;  %v6485_v46 = vld [vmem:[%s8743_s3 + $0x18] sm:$0xff]  }
 0x43e   : > { %3914 = vmatmul.mubr.f32.gmra.mrb[42].mxu1 %v3804_v50  ;;  %v6387_v14 = vunpack.i.h.bf16 %v6385_v48  ;;  %v6386_v43 = vunpack.i.l.bf16 %v6385_v48 }
 0x43f   : > { %3918 = vmatprep.mubr.f32.mxu1 %v3807_v30  ;;  %vm8424_vm15 = vcmp.ne.s16.totalorder %v3997_v54, 0  ;;  %v6492_v54 = vld [vmem:[%s8743_s3 + $0x40] sm:$0xff]  }
 0x440   : > { %v3800_v32 = vsel %vm1923_vm6, %v6387_v14, %v6386_v43  ;;  %v3780_v27 = vsel %vm1923_vm6, %v6386_v43, %v6387_v14 }
 0x441   : > { %v3809_v26 = vmax.f32 %v3744_v15, %v3800_v32  ;;  %v3808_v6 = vmax.f32 %v3743_v45, %v3780_v27 }
 0x442   : > { %v6390_v57 = vpop.permute.xlu0 %6389  ;;  %3919 = vmatmul.mubr.f32.gmra.mrb[44].mxu1 %v3806_v61  ;;  %v6486_v61 = vld [vmem:[%s8743_s3] sm:$0xff]  }
 0x443   : > { %v6392_v31 = vunpack.i.h.bf16 %v6390_v57  ;;  %v6391_v58 = vunpack.i.l.bf16 %v6390_v57  ;;  %3923 = vmatprep.mubr.f32.mxu1 %v3809_v26 }
 0x445   : > { %v3801_v10 = vsel %vm1923_vm6, %v6392_v31, %v6391_v58  ;;  %v3781_v12 = vsel %vm1923_vm6, %v6391_v58, %v6392_v31  ;;  %vm3940_vm6 = vcmask 519168   ;;  %v4207_v58 = vsel %vm4206_vm8, 65537, %v8798_v7 }
 0x446   : > { %3924 = vmatmul.mubr.f32.gmra.mrb[46].mxu1 %v3808_v6  ;;  %v3811_v5 = vmax.f32 %v3746_v35, %v3801_v10  ;;  %v3810_v4 = vmax.f32 %v3745_v9, %v3781_v12  ;;  %v4923_v9 = vld [vmem:[%s8744_s4 + $0x18] sm:$0xff]  ;;  %v4922_v35 = vld [vmem:[%s8744_s4 + $0x10] sm:$0xff] }
 0x448   : > { %3928 = vmatprep.mubr.f32.mxu1 %v3811_v5  ;;  %v4211_v5 = vrot.slane %v4207_v58, %v6930_v25 }
 0x44a   : > { %3929 = vmatmul.mubr.f32.gmra.mrb[48].mxu1 %v3810_v4 }
 0x44b   : > { %5759 = vmatprep.mubr.msk.bf16.mxu1 %vm602_vm14, %v6484_v28 }
 0x50b   : > { %v5693_v41 = vpop.f32.mrb[40].mxu1 }
 0x50c   : > { %v5694_v20 = vpop.f32.mrb[41].mxu1 }
 0x50d   : > { %v5695_v21 = vadd.f32 %v5694_v20, %v5693_v41 }
 0x511   : > { %v5696_v63 = vpop.f32.mrb[42].mxu1 }
 0x512   : > { %v5697_v47 = vpop.f32.mrb[43].mxu1 }
 0x513   : > { %v5698_v53 = vadd.f32 %v5697_v47, %v5696_v63  ;;  %v6487_v63 = vld [vmem:[%s8743_s3 + $0x8] sm:$0xff]  }
 0x515   : > { %v3934_v2 = vpack.c.bf16 %v5698_v53, %v5695_v21  ;;  %v5699_v29 = vpop.f32.mrb[44].mxu1  ;;  %v6488_v53 = vld [vmem:[%s8743_s3 + $0x20] sm:$0xff]  }
 0x516   : > { %v5700_v0 = vpop.f32.mrb[45].mxu1 }
 0x517   : > { %3938 = vst.msk [vmem:[#allocation4] sm:$0xff] %vm3937_vm4, %v3934_v2  ;;  %v5701_v40 = vadd.f32 %v5700_v0, %v5699_v29 }
 0x519   : > { %v5702_v56 = vpop.f32.mrb[46].mxu1 }
 0x51a   : > { %v5703_v51 = vpop.f32.mrb[47].mxu1 }
 0x51b   : > { %v5704_v19 = vadd.f32 %v5703_v51, %v5702_v56 }
 0x51d   : > { %v3935_v42 = vpack.c.bf16 %v5704_v19, %v5701_v40  ;;  %v5705_v62 = vpop.f32.mrb[48].mxu1  ;;  %v4317_v19 = vsel %vm4316_vm10, 65537, %v8798_v7 }
 0x51e   : > { %v8296_v1 = vld [vmem:[#allocation4] sm:$0xff]  ;;  %v5706_v45 = vpop.f32.mrb[49].mxu1 }
 0x51f   : > { %3939 = vst.msk [vmem:[#allocation4 + $0x8] sm:$0xff] %vm3937_vm4, %v3935_v42  ;;  %v5707_v15 = vadd.f32 %v5706_v45, %v5705_v62  ;;  %4012 = vrot.lane.b32.xlu0 %v8296_v1, %s6730_s21  ;;  %4006 = vrot.lane.b32.xlu1 %v8296_v1, %s6731_s22  ;;  %v4321_v45 = vrot.slane %v4317_v19, %v6930_v25 }
 0x521   : > { %v3936_v39 = vpack.c.bf16 %v5707_v15, %v5707_v15  ;;  %vm8488_vm5 = vcmp.ne.s16.totalorder %v4321_v45, 0 }
 0x523   : > { %3941 = vst.msk [vmem:[#allocation4 + $0x10] sm:$0xf] %vm3940_vm6, %v3936_v39  ;;  %vm8456_vm6 = vcmp.ne.s16.totalorder %v4211_v5, 0 }
 0x526   : > { %v8305_v34 = vld [vmem:[#allocation4 + $0x8] sm:$0xff] }
 0x527   : > { %4014 = vrot.lane.b32.xlu0 %v8305_v34, %s6730_s21  ;;  %4008 = vrot.lane.b32.xlu1 %v8305_v34, %s6731_s22 }
 0x52a   : > { %v8309_v13 = vld [vmem:[#allocation4 + $0x10] sm:$0xff] }
 0x52b   : > { %4016 = vrot.lane.b32.xlu0 %v8309_v13, %s6730_s21  ;;  %4010 = vrot.lane.b32.xlu1 %v8309_v13, %s6731_s22 }
 0x52f   : > { %3970 = vrot.lane.b32.xlu0 %v8296_v1, %s6732_s8  ;;  %3964 = vrot.lane.b32.xlu1 %v8296_v1, %s6733_s9 }
 0x533   : > { %3972 = vrot.lane.b32.xlu0 %v8305_v34, %s6732_s8  ;;  %3966 = vrot.lane.b32.xlu1 %v8305_v34, %s6733_s9 }
 0x537   : > { %3974 = vrot.lane.b32.xlu0 %v8309_v13, %s6732_s8  ;;  %3968 = vrot.lane.b32.xlu1 %v8309_v13, %s6733_s9 }
 0x53b   : > { %4184 = vrot.lane.b32.xlu0 %v8296_v1, %s6734_s10  ;;  %4178 = vrot.lane.b32.xlu1 %v8296_v1, %s6735_s12 }
 0x53f   : > { %4186 = vrot.lane.b32.xlu0 %v8305_v34, %s6734_s10  ;;  %4180 = vrot.lane.b32.xlu1 %v8305_v34, %s6735_s12 }
 0x543   : > { %4188 = vrot.lane.b32.xlu0 %v8309_v13, %s6734_s10  ;;  %4182 = vrot.lane.b32.xlu1 %v8309_v13, %s6735_s12 }
 0x547   : > { %4296 = vrot.lane.b32.xlu0 %v8296_v1, %s6720_s19  ;;  %4290 = vrot.lane.b32.xlu1 %v8296_v1, %s6736_s24 }
 0x54b   : > { %4298 = vrot.lane.b32.xlu0 %v8305_v34, %s6720_s19  ;;  %4292 = vrot.lane.b32.xlu1 %v8305_v34, %s6736_s24 }
 0x54f   : > { %4300 = vrot.lane.b32.xlu0 %v8309_v13, %s6720_s19  ;;  %4294 = vrot.lane.b32.xlu1 %v8309_v13, %s6736_s24  ;;  %s6739_s19 = smov 121  }
 0x553   : > { %4480 = vrot.lane.b32.xlu0 %v8296_v1, %s6737_s13  ;;  %4474 = vrot.lane.b32.xlu1 %v8296_v1, %s6722_s20 }
 0x557   : > { %4482 = vrot.lane.b32.xlu0 %v8305_v34, %s6737_s13  ;;  %4476 = vrot.lane.b32.xlu1 %v8305_v34, %s6722_s20 }
 0x55b   : > { %4484 = vrot.lane.b32.xlu0 %v8309_v13, %s6737_s13  ;;  %4478 = vrot.lane.b32.xlu1 %v8309_v13, %s6722_s20  ;;  %s6742_s20 = smov 55  }
 0x55f   : > { %4591 = vrot.lane.b32.xlu0 %v8296_v1, %s6738_s14  ;;  %4585 = vrot.lane.b32.xlu1 %v8296_v1, %s6739_s19 }
 0x563   : > { %4593 = vrot.lane.b32.xlu0 %v8305_v34, %s6738_s14  ;;  %4587 = vrot.lane.b32.xlu1 %v8305_v34, %s6739_s19 }
 0x567   : > { %4595 = vrot.lane.b32.xlu0 %v8309_v13, %s6738_s14  ;;  %4589 = vrot.lane.b32.xlu1 %v8309_v13, %s6739_s19 }
 0x56b   : > { %4703 = vrot.lane.b32.xlu0 %v8296_v1, %s6740_s16  ;;  %4697 = vrot.lane.b32.xlu1 %v8296_v1, %s6741_s17 }
 0x56f   : > { %4705 = vrot.lane.b32.xlu0 %v8305_v34, %s6740_s16  ;;  %4699 = vrot.lane.b32.xlu1 %v8305_v34, %s6741_s17 }
 0x573   : > { %4707 = vrot.lane.b32.xlu0 %v8309_v13, %s6740_s16  ;;  %4701 = vrot.lane.b32.xlu1 %v8309_v13, %s6741_s17 }
 0x577   : > { %4814 = vrot.lane.b32.xlu0 %v8296_v1, %s6742_s20  ;;  %4808 = vrot.lane.b32.xlu1 %v8296_v1, %s6743_s18 }
 0x57b   : > { %4816 = vrot.lane.b32.xlu0 %v8305_v34, %s6742_s20  ;;  %4810 = vrot.lane.b32.xlu1 %v8305_v34, %s6743_s18 }
 0x57f   : > { %4818 = vrot.lane.b32.xlu0 %v8309_v13, %s6742_s20  ;;  %4812 = vrot.lane.b32.xlu1 %v8309_v13, %s6743_s18 }
 0x583   : > { %4931 = vperm.xlu0 %6341, %v4921_v49   ;;  %4926 = vperm.xlu1 %6342, %v4920_v11   ;;  %v6489_v11 = vld [vmem:[%s8743_s3 + $0x28] sm:$0xff]  }
 0x587   : > { %4941 = vperm.xlu0 %6341, %v4923_v9   ;;  %4936 = vperm.xlu1 %6342, %v4922_v35   ;;  %v6490_v35 = vld [vmem:[%s8743_s3 + $0x30] sm:$0xff]  }
 0x591   : > { %v4013_v33 = vpop.permute.xlu0 %4012  ;;  %v4007_v55 = vpop.permute.xlu1 %4006 }
 0x592   : > { %v4021_v37 = vsel %vm4018_vm12, %v4007_v55, %v4013_v33 }
 0x593   : > { %v4040_v17 = vsel %vm8380_vm0, %v4021_v37, 0  ;;  %6249 = vmatprep.subr.msk.bf16.mxu1 %vm8380_vm0, %v4021_v37 }
 0x594   : > { %5754 = vmatpush3.bf16.msra.mxu1 %v4040_v17 }
 0x599   : > { %v4015_v44 = vpop.permute.xlu0 %4014  ;;  %v4009_v52 = vpop.permute.xlu1 %4008 }
 0x59a   : > { %v4025_v22 = vsel %vm4018_vm12, %v4009_v52, %v4015_v44 }
 0x59b   : > { %v4041_v23 = vsel %vm8380_vm0, %v4025_v22, 0  ;;  %6250 = vmatprep.subr.msk.bf16.mxu1 %vm8380_vm0, %v4025_v22 }
 0x59c   : > { %5756 = vmatpush3.bf16.msra.mxu1 %v4041_v23  ;;  %v6491_v23 = vld [vmem:[%s8743_s3 + $0x38] sm:$0xff]  }
 0x59d   : > { %v4017_v50 = vpop.permute.xlu0 %4016  ;;  %v4011_v8 = vpop.permute.xlu1 %4010 }
 0x59e   : > { %v4029_v48 = vsel %vm4018_vm12, %v4011_v8, %v4017_v50  ;;  %vm8813_vm12 = vcmask 7168  }
 0x59f   : > { %v4042_v30 = vsel %vm8380_vm0, %v4029_v48, 0  ;;  %6251 = vmatprep.subr.msk.bf16.mxu1 %vm8380_vm0, %v4029_v48  ;;  %vm8814_vm0 = vmmov %vm8813_vm12  ;;  %v4502_v48 = vsel %vm4501_vm3, 65537, %v8798_v7 }
 0x5a0   : > { %5758 = vmatpush3.bf16.msra.mxu1 %v4042_v30  ;;  %vm8815_vm11 = vmmov %vm8814_vm0  ;;  %v4506_v14 = vrot.slane %v4502_v48, %v6930_v25 }
 0x5a1   : > { %v3971_v32 = vpop.permute.xlu0 %3970  ;;  %v3965_v27 = vpop.permute.xlu1 %3964 }
 0x5a2   : > { %v3979_v26 = vsel %vm3976_vm9, %v3965_v27, %v3971_v32  ;;  %v6493_v32 = vld [vmem:[%s8743_s3 + $0x48] sm:$0xff]   ;;  %vm8542_vm8 = vcmp.ne.s16.totalorder %v4506_v14, 0 }
 0x5a3   : > { %v3999_v57 = vsel %vm8424_vm15, %v3979_v26, 0  ;;  %5760 = vmatmul.mubr.msk.bf16.vlgmr.msra.gmra.mrb[52].mxu1 %vm602_vm14, %v6485_v46  ;;  %6252 = vmatprep.subr.msk.bf16.mxu1 %vm8424_vm15, %v3979_v26  ;;  %v6501_v14 = vld [vmem:[%s8743_s3 + $0x88] sm:$0xff]  }
 0x5a4   : > { %5764 = vmatpush3.bf16.msra.mxu1 %v3999_v57  ;;  %5769 = vmatprep.mubr.msk.bf16.mxu1 %vm602_vm14, %v6486_v61 }
 0x5a5   : > { %v3973_v6 = vpop.permute.xlu0 %3972  ;;  %v3967_v31 = vpop.permute.xlu1 %3966 }
 0x5a6   : > { %v3983_v10 = vsel %vm3976_vm9, %v3967_v31, %v3973_v6 }
 0x5a7   : > { %v4000_v12 = vsel %vm8424_vm15, %v3983_v10, 0  ;;  %6253 = vmatprep.subr.msk.bf16.mxu1 %vm8424_vm15, %v3983_v10 }
 0x5a8   : > { %5766 = vmatpush3.bf16.msra.mxu1 %v4000_v12 }
 0x5a9   : > { %v3975_v4 = vpop.permute.xlu0 %3974  ;;  %v3969_v41 = vpop.permute.xlu1 %3968 }
 0x5aa   : > { %v3987_v20 = vsel %vm3976_vm9, %v3969_v41, %v3975_v4  ;;  %vm3958_vm9 = vcmp.lt.s32.totalorder %v6907_v16, 56 }
 0x5ab   : > { %v4001_v21 = vsel %vm8424_vm15, %v3987_v20, 0  ;;  %6254 = vmatprep.subr.msk.bf16.mxu1 %vm8424_vm15, %v3987_v20  ;;  %vm8535_vm15 = vmand %vm3958_vm9, %vm8384_vm7 }
 0x5ac   : > { %5768 = vmatpush3.bf16.msra.mxu1 %v4001_v21  ;;  %vm4613_vm7 = vmpackc.low %vm8535_vm15, %vm8535_vm15 }
 0x5ad   : > { %v4185_v2 = vpop.permute.xlu0 %4184  ;;  %v4179_v29 = vpop.permute.xlu1 %4178  ;;  %v4614_v31 = vsel %vm4613_vm7, 65537, %v8798_v7  ;;  %vm4724_vm10 = vmpackc.low %vm3958_vm9, %vm3958_vm9 }
 0x5ae   : > { %v4193_v0 = vsel %vm4190_vm1, %v4179_v29, %v4185_v2  ;;  %v4618_v4 = vrot.slane %v4614_v31, %v6930_v25  ;;  %v6496_v2 = vld [vmem:[%s8743_s3 + $0x60] sm:$0xff]   ;;  %v4989_v31 = vld [vmem:[%s8746_s6 + $0x48] sm:$0xff] }
 0x5af   : > { %v4213_v40 = vsel %vm8456_vm6, %v4193_v0, 0  ;;  %5770 = vmatmul.mubr.msk.bf16.vlgmr.msra.gmra.mrb[52].mxu1 %vm602_vm14, %v6487_v63  ;;  %6255 = vmatprep.subr.msk.bf16.mxu1 %vm8456_vm6, %v4193_v0  ;;  %v6495_v63 = vld [vmem:[%s8743_s3 + $0x58] sm:$0xff]  }
 0x5b0   : > { %5774 = vmatpush3.bf16.msra.mxu1 %v4213_v40  ;;  %5779 = vmatprep.mubr.msk.bf16.mxu1 %vm602_vm14, %v6488_v53 }
 0x5b1   : > { %v4187_v56 = vpop.permute.xlu0 %4186  ;;  %v4181_v51 = vpop.permute.xlu1 %4180 }
 0x5b2   : > { %v4197_v42 = vsel %vm4190_vm1, %v4181_v51, %v4187_v56  ;;  %v4725_v51 = vsel %vm4724_vm10, 65537, %v8798_v7 }
 0x5b3   : > { %v4214_v62 = vsel %vm8456_vm6, %v4197_v42, 0  ;;  %6256 = vmatprep.subr.msk.bf16.mxu1 %vm8456_vm6, %v4197_v42 }
 0x5b4   : > { %5776 = vmatpush3.bf16.msra.mxu1 %v4214_v62 }
 0x5b5   : > { %v4189_v15 = vpop.permute.xlu0 %4188  ;;  %v4183_v39 = vpop.permute.xlu1 %4182 }
 0x5b6   : > { %v4201_v28 = vsel %vm4190_vm1, %v4183_v39, %v4189_v15  ;;  %vm4597_vm1 = vcmask 465920   ;;  %v4729_v15 = vrot.slane %v4725_v51, %v6930_v25 }
 0x5b7   : > { %v4215_v49 = vsel %vm8456_vm6, %v4201_v28, 0  ;;  %6257 = vmatprep.subr.msk.bf16.mxu1 %vm8456_vm6, %v4201_v28  ;;  %vm8575_vm6 = vcmp.ne.s16.totalorder %v4618_v4, 0  ;;  %v4988_v4 = vld [vmem:[%s8746_s6 + $0x40] sm:$0xff] }
 0x5b8   : > { %5778 = vmatpush3.bf16.msra.mxu1 %v4215_v49 }
 0x5b9   : > { %v4297_v36 = vpop.permute.xlu0 %4296  ;;  %v4291_v59 = vpop.permute.xlu1 %4290 }
 0x5ba   : > { %v4304_v18 = vsel %vm8813_vm12, %v4291_v59, %v4297_v36  ;;  %vm4833_vm12 = vmand %vm3958_vm9, %vm8404_vm2  ;;  %v6498_v36 = vld [vmem:[%s8743_s3 + $0x70] sm:$0xff]   ;;  %vm4820_vm2 = vcmask 449536  }
 0x5bb   : > { %v4323_v60 = vsel %vm8488_vm5, %v4304_v18, 0  ;;  %5780 = vmatmul.mubr.msk.bf16.vlgmr.msra.gmra.mrb[52].mxu1 %vm602_vm14, %v6489_v11  ;;  %6258 = vmatprep.subr.msk.bf16.mxu1 %vm8488_vm5, %v4304_v18  ;;  %v6497_v11 = vld [vmem:[%s8743_s3 + $0x68] sm:$0xff]  }
 0x5bc   : > { %5784 = vmatpush3.bf16.msra.mxu1 %v4323_v60  ;;  %5789 = vmatprep.mubr.msk.bf16.mxu1 %vm602_vm14, %v6490_v35 }
 0x5bd   : > { %v4299_v33 = vpop.permute.xlu0 %4298  ;;  %v4293_v55 = vpop.permute.xlu1 %4292 }
 0x5be   : > { %v4308_v37 = vsel %vm8814_vm0, %v4293_v55, %v4299_v33  ;;  %vm8611_vm0 = vcmp.ne.s16.totalorder %v4729_v15, 0 }
 0x5bf   : > { %v4324_v17 = vsel %vm8488_vm5, %v4308_v37, 0  ;;  %6259 = vmatprep.subr.msk.bf16.mxu1 %vm8488_vm5, %v4308_v37 }
 0x5c0   : > { %5786 = vmatpush3.bf16.msra.mxu1 %v4324_v17 }
 0x5c1   : > { %v4301_v44 = vpop.permute.xlu0 %4300  ;;  %v4295_v52 = vpop.permute.xlu1 %4294 }
 0x5c2   : > { %v4312_v3 = vsel %vm8815_vm11, %v4295_v52, %v4301_v44  ;;  %vm4836_vm11 = vmpackc.low %vm4833_vm12, %vm4833_vm12  ;;  %v6499_v52 = vld [vmem:[%s8743_s3 + $0x78] sm:$0xff]  }
 0x5c3   : > { %v4325_v22 = vsel %vm8488_vm5, %v4312_v3, 0  ;;  %6260 = vmatprep.subr.msk.bf16.mxu1 %vm8488_vm5, %v4312_v3  ;;  %vm4709_vm5 = vcmask 457728   ;;  %v4837_v18 = vsel %vm4836_vm11, 65537, %v8798_v7 }
 0x5c4   : > { %5788 = vmatpush3.bf16.msra.mxu1 %v4325_v22  ;;  %v4841_v37 = vrot.slane %v4837_v18, %v6930_v25  ;;  %v6500_v22 = vld [vmem:[%s8743_s3 + $0x80] sm:$0xff]  }
 0x5c5   : > { %v4481_v50 = vpop.permute.xlu0 %4480  ;;  %5793 = vmatprep.subr.bf16.mxu1 %v8296_v1  ;;  %v4475_v8 = vpop.permute.xlu1 %4474 }
 0x5c6   : > { %v4489_v27 = vsel %vm4486_vm13, %v4475_v8, %v4481_v50  ;;  %vm8640_vm3 = vcmp.ne.s16.totalorder %v4841_v37, 0 }
 0x5c7   : > { %5790 = vmatmul.mubr.msk.bf16.vlgmr.msra.gmra.mrb[52].mxu1 %vm602_vm14, %v6491_v23  ;;  %v4508_v6 = vsel %vm8542_vm8, %v4489_v27, 0 }
 0x5c8   : > { %5794 = vmatpush3.bf16.msra.mxu1 %v8296_v1  ;;  %5799 = vmatprep.mubr.msk.bf16.mxu1 %vm602_vm14, %v6492_v54 }
 0x5c9   : > { %v4483_v30 = vpop.permute.xlu0 %4482  ;;  %5795 = vmatprep.subr.bf16.mxu1 %v8305_v34  ;;  %v4477_v46 = vpop.permute.xlu1 %4476 }
 0x5cc   : > { %5796 = vmatpush3.bf16.msra.mxu1 %v8305_v34  ;;  %v4982_v34 = vld [vmem:[%s8746_s6 + $0x10] sm:$0xff] }
 0x5cd   : > { %v4485_v43 = vpop.permute.xlu0 %4484  ;;  %5797 = vmatprep.subr.bf16.mxu1 %v8309_v13  ;;  %v4479_v61 = vpop.permute.xlu1 %4478 }
 0x5ce   : > { %v4497_v5 = vsel %vm4486_vm13, %v4479_v61, %v4485_v43  ;;  %v4981_v43 = vld [vmem:[%s8746_s6 + $0x8] sm:$0xff]  ;;  %v4983_v61 = vld [vmem:[%s8746_s6 + $0x18] sm:$0xff] }
 0x5cf   : > { %v4510_v21 = vsel %vm8542_vm8, %v4497_v5, 0  ;;  %v5875_v1 = vpack.c.bf16 %v4983_v61, %v4981_v43 }
 0x5d0   : > { %5798 = vmatpush3.bf16.msra.mxu1 %v8309_v13  ;;  %v4493_v13 = vsel %vm4486_vm13, %v4477_v46, %v4483_v30 }
 0x5d1   : > { %v4592_v26 = vpop.permute.xlu0 %4591  ;;  %6261 = vmatprep.subr.msk.bf16.mxu1 %vm8542_vm8, %v4489_v27  ;;  %v4586_v57 = vpop.permute.xlu1 %4585  ;;  %v4509_v12 = vsel %vm8542_vm8, %v4493_v13, 0 }
 0x5d2   : > { %v4600_v53 = vsel %vm4597_vm1, %v4586_v57, %v4592_v26  ;;  %v4987_v26 = vld [vmem:[%s8746_s6 + $0x38] sm:$0xff]  ;;  %v4984_v57 = vld [vmem:[%s8746_s6 + $0x20] sm:$0xff] }
 0x5d3   : > { %5800 = vmatmul.mubr.msk.bf16.vlgmr.msra.gmra.mrb[52].mxu1 %vm602_vm14, %v6493_v32  ;;  %v4620_v40 = vsel %vm8575_vm6, %v4600_v53, 0  ;;  %v4980_v32 = vld [vmem:[%s8746_s6] sm:$0xff] }
 0x5d4   : > { %5804 = vmatpush3.bf16.msra.mxu1 %v4508_v6  ;;  %5809 = vmatprep.mubr.msk.bf16.mxu1 %vm602_vm14, %v6494_v24  ;;  %v5877_v27 = vpack.c.bf16 %v4982_v34, %v4980_v32  ;;  %v4985_v24 = vld [vmem:[%s8746_s6 + $0x28] sm:$0xff]  ;;  %v8827_v32 = vlaneseq }
 0x5d5   : > { %v4594_v58 = vpop.permute.xlu0 %4593  ;;  %6262 = vmatprep.subr.msk.bf16.mxu1 %vm8542_vm8, %v4493_v13  ;;  %v4588_v10 = vpop.permute.xlu1 %4587  ;;  %v5879_v6 = vpack.c.bf16 %v4987_v26, %v4985_v24  ;;  %v4986_v13 = vld [vmem:[%s8746_s6 + $0x30] sm:$0xff] }
 0x5d6   : > { %v4604_v56 = vsel %vm4597_vm1, %v4588_v10, %v4594_v58  ;;  %v4991_v58 = vld [vmem:[%s8746_s6 + $0x58] sm:$0xff]  ;;  %v6744_v10 = vmov 0.0   ;;  %vm5090_vm9 = vcmp.lt.s32.totalorder %v8827_v32, 256 }
 0x5d7   : > { %v4621_v62 = vsel %vm8575_vm6, %v4604_v56, 0 }
 0x5d8   : > { %5806 = vmatpush3.bf16.msra.mxu1 %v4509_v12  ;;  %v5881_v12 = vpack.c.bf16 %v4986_v13, %v4984_v57 }
 0x5d9   : > { %v4596_v41 = vpop.permute.xlu0 %4595  ;;  %6263 = vmatprep.subr.msk.bf16.mxu1 %vm8542_vm8, %v4497_v5  ;;  %v4590_v20 = vpop.permute.xlu1 %4589  ;;  %v5883_v5 = vpack.c.bf16 %v4991_v58, %v4989_v31 }
 0x5da   : > { %v4608_v45 = vsel %vm4597_vm1, %v4590_v20, %v4596_v41  ;;  %v4990_v41 = vld [vmem:[%s8746_s6 + $0x50] sm:$0xff]  ;;  %v4993_v20 = vld [vmem:[%s8746_s6 + $0x68] sm:$0xff] }
 0x5db   : > { %v4622_v39 = vsel %vm8575_vm6, %v4608_v45, 0 }
 0x5dc   : > { %5808 = vmatpush3.bf16.msra.mxu1 %v4510_v21  ;;  %v4995_v21 = vld [vmem:[%s8746_s6 + $0x78] sm:$0xff] }
 0x5dd   : > { %v4704_v29 = vpop.permute.xlu0 %4703  ;;  %6264 = vmatprep.subr.msk.bf16.mxu1 %vm8575_vm6, %v4600_v53  ;;  %v4698_v0 = vpop.permute.xlu1 %4697  ;;  %v5887_v47 = vpack.c.bf16 %v4995_v21, %v4993_v20  ;;  %v4992_v53 = vld [vmem:[%s8746_s6 + $0x60] sm:$0xff] }
 0x5de   : > { %v4712_v35 = vsel %vm4709_vm5, %v4698_v0, %v4704_v29 }
 0x5df   : > { %5810 = vmatmul.mubr.msk.bf16.vlgmr.msra.gmra.mrb[52].mxu1 %vm602_vm14, %v6495_v63  ;;  %v4731_v16 = vsel %vm8611_vm0, %v4712_v35, 0  ;;  %v5885_v63 = vpack.c.bf16 %v4990_v41, %v4988_v4 }
 0x5e0   : > { %5814 = vmatpush3.bf16.msra.mxu1 %v4620_v40  ;;  %5819 = vmatprep.mubr.msk.bf16.mxu1 %vm602_vm14, %v6496_v2  ;;  %v4994_v2 = vld [vmem:[%s8746_s6 + $0x70] sm:$0xff] }
 0x5e1   : > { %v4706_v19 = vpop.permute.xlu0 %4705  ;;  %6265 = vmatprep.subr.msk.bf16.mxu1 %vm8575_vm6, %v4604_v56  ;;  %v4700_v42 = vpop.permute.xlu1 %4699  ;;  %v5889_v29 = vpack.c.bf16 %v4994_v2, %v4992_v53 }
 0x5e2   : > { %v4716_v38 = vsel %vm4709_vm5, %v4700_v42, %v4706_v19 }
 0x5e3   : > { %v4732_v33 = vsel %vm8611_vm0, %v4716_v38, 0 }
 0x5e4   : > { %5816 = vmatpush3.bf16.msra.mxu1 %v4621_v62 }
 0x5e5   : > { %6266 = vmatprep.subr.msk.bf16.mxu1 %vm8575_vm6, %v4608_v45  ;;  %v4708_v28 = vpop.permute.xlu0 %4707  ;;  %v4702_v49 = vpop.permute.xlu1 %4701 }
 0x5e6   : > { %v4720_v55 = vsel %vm4709_vm5, %v4702_v49, %v4708_v28 }
 0x5e7   : > { %v4733_v17 = vsel %vm8611_vm0, %v4720_v55, 0 }
 0x5e8   : > { %5818 = vmatpush3.bf16.msra.mxu1 %v4622_v39 }
 0x5e9   : > { %6267 = vmatprep.subr.msk.bf16.mxu1 %vm8611_vm0, %v4712_v35  ;;  %v4815_v59 = vpop.permute.xlu0 %4814  ;;  %v4809_v60 = vpop.permute.xlu1 %4808 }
 0x5ea   : > { %v4823_v25 = vsel %vm4820_vm2, %v4809_v60, %v4815_v59 }
 0x5eb   : > { %5820 = vmatmul.mubr.msk.bf16.vlgmr.msra.gmra.mrb[52].mxu1 %vm602_vm14, %v6497_v11  ;;  %v4843_v23 = vsel %vm8640_vm3, %v4823_v25, 0 }
 0x5ec   : > { %5824 = vmatpush3.bf16.msra.mxu1 %v4731_v16  ;;  %5829 = vmatprep.mubr.msk.bf16.mxu1 %vm602_vm14, %v6498_v36 }
 0x5ed   : > { %6268 = vmatprep.subr.msk.bf16.mxu1 %vm8611_vm0, %v4716_v38  ;;  %v4817_v7 = vpop.permute.xlu0 %4816  ;;  %v4811_v44 = vpop.permute.xlu1 %4810 }
 0x5ee   : > { %v4827_v54 = vsel %vm4820_vm2, %v4811_v44, %v4817_v7 }
 0x5ef   : > { %v4844_v48 = vsel %vm8640_vm3, %v4827_v54, 0 }
 0x5f0   : > { %5826 = vmatpush3.bf16.msra.mxu1 %v4732_v33 }
 0x5f1   : > { %6269 = vmatprep.subr.msk.bf16.mxu1 %vm8611_vm0, %v4720_v55  ;;  %v4819_v50 = vpop.permute.xlu0 %4818  ;;  %v4813_v8 = vpop.permute.xlu1 %4812  ;;  %v4967_v55 = vld [vmem:[#allocation5] sm:$0xff] }
 0x5f2   : > { %v4831_v30 = vsel %vm4820_vm2, %v4813_v8, %v4819_v50  ;;  %v6745_v50 = vmov 1966171168  }
 0x5f3   : > { %v4845_v46 = vsel %vm8640_vm3, %v4831_v30, 0  ;;  %v5074_v8 = vunpack.c.l.s4 %v6745_v50 }
 0x5f4   : > { %5828 = vmatpush3.bf16.msra.mxu1 %v4733_v17 }
 0x5f5   : > { %6270 = vmatprep.subr.msk.bf16.mxu1 %vm8640_vm3, %v4823_v25 }
 0x5f7   : > { %5830 = vmatmul.mubr.msk.bf16.vlgmr.msra.gmra.mrb[52].mxu1 %vm602_vm14, %v6499_v52 }
 0x5f8   : > { %5834 = vmatpush3.bf16.msra.mxu1 %v4843_v23  ;;  %5839 = vmatprep.mubr.msk.bf16.mxu1 %vm602_vm14, %v6500_v22 }
 0x5f9   : > { %6271 = vmatprep.subr.msk.bf16.mxu1 %vm8640_vm3, %v4827_v54 }
 0x5fc   : > { %5836 = vmatpush3.bf16.msra.mxu1 %v4844_v48  ;;  %v5075_v48 = vunpack.c.0.s8 %v5074_v8 }
 0x5fd   : > { %6272 = vmatprep.subr.msk.bf16.mxu1 %vm8640_vm3, %v4831_v30 }
 0x600   : > { %5838 = vmatpush3.bf16.msra.mxu1 %v4845_v46  ;;  %v8826_v46 = vld [vmem:[#allocation6_spill] sm:$0xff] }
 0x601   : > { %5876 = vmatprep.subr.bf16.mxu1 %v5875_v1 }
 0x602   : > { %v4927_v40 = vpop.permute.xlu1 %4926  ;;  %v4932_v42 = vpop.permute.xlu0 %4931 }
 0x603   : > { %5840 = vmatmul.mubr.msk.bf16.vlgmr.msra.gmra.mrb[52].mxu1 %vm602_vm14, %v6501_v14  ;;  %vm4978_vm14 = vcmask 523268   ;;  %v5078_v14 = vsub.s32 %v5075_v48, %v8826_v46 }
 0x604   : > { %5878 = vmatpush1.bf16.msra.mxu1 %v5877_v27  ;;  %5063 = vmatprep.mubr.f32.mxu1 %v6744_v10 }
 0x605   : > { %5880 = vmatprep.subr.bf16.mxu1 %v5879_v6 }
 0x606   : > { %v4937_v28 = vpop.permute.xlu1 %4936  ;;  %v4942_v11 = vpop.permute.xlu0 %4941 }
 0x608   : > { %5882 = vmatpush1.bf16.msra.mxu1 %v5881_v12 }
 0x609   : > { %5884 = vmatprep.subr.bf16.mxu1 %v5883_v5 }
 0x60c   : > { %5886 = vmatpush1.bf16.msra.mxu1 %v5885_v63 }
 0x60d   : > { %5888 = vmatprep.subr.bf16.mxu1 %v5887_v47 }
 0x610   : > { %5890 = vmatpush1.bf16.msra.mxu1 %v5889_v29 }
 0x6d6   : > { %v5841_v0 = vpop.f32.mrb[52].mxu1 }
 0x6d7   : > { %v4901_v56 = vpop.f32.mrb[53].mxu1  ;;  %v4946_v49 = vadd.f32 %v5841_v0, %v4937_v28 }
 0x6d8   : > { %v4944_v51 = vadd.f32 %v4927_v40, %v4901_v56  ;;  %v5842_v19 = vpop.f32.mrb[54].mxu1 }
 0x6d9   : > { %v4904_v62 = vpop.f32.mrb[55].mxu1  ;;  %v5657_v9 = vmul.f32 -1.442695, %v4946_v49  ;;  %v4947_v35 = vadd.f32 %v5842_v19, %v4942_v11 }
 0x6da   : > { %v5655_v45 = vmul.f32 -1.442695, %v4944_v51  ;;  %v4945_v15 = vadd.f32 %v4932_v42, %v4904_v62 }
 0x6dc   : > { %6662 = vpow2.f32 %v5655_v45  ;;  %v5656_v39 = vmul.f32 -1.442695, %v4945_v15 }
 0x6de   : > { %6664 = vpow2.f32 %v5656_v39 }
 0x6df   : > { %6666 = vpow2.f32 %v5657_v9 }
 0x6e0   : > { %6668 = vtanh.f32 %v4947_v35 }
 0x6e6   : > { %v6663_v36 = vpop.eup %6662 }
 0x6e7   : > { %v4951_v16 = vadd.f32 1.0, %v6663_v36 }
 0x6e8   : > { %v6665_v38 = vpop.eup %6664 }
 0x6e9   : > { %6670 = vrcp.f32 %v4951_v16  ;;  %v4957_v59 = vadd.f32 1.0, %v6665_v38  ;;  %v6667_v18 = vpop.eup %6666 }
 0x6ea   : > { %v6669_v60 = vpop.eup %6668  ;;  %v4963_v7 = vadd.f32 1.0, %v6667_v18 }
 0x6eb   : > { %6672 = vrcp.f32 %v4957_v59 }
 0x6ec   : > { %6674 = vrcp.f32 %v4963_v7 }
 0x6f3   : > { %v6671_v33 = vpop.eup %6670 }
 0x6f4   : > { %v4969_v37 = vmul.f32 %v6671_v33, %v6669_v60 }
 0x6f5   : > { %v6673_v17 = vpop.eup %6672 }
 0x6f6   : > { %v4968_v44 = vmul.f32 %v6673_v17, %v4967_v55  ;;  %v6675_v3 = vpop.eup %6674 }
 0x6f8   : > { %v4970_v52 = vadd.f32 %v4969_v37, %v4968_v44 }
 0x6fa   : > { %6676 = vtanh.f32 %v4970_v52  ;;  %4973 = vst.msk [vmem:[#allocation5] sm:$0xff] %vm3937_vm4, %v4970_v52 }
 0x704   : > { %v6677_v25 = vpop.eup %6676 }
 0x705   : > { %v4972_v22 = vmul.f32 %v6677_v25, %v6675_v3 }
 0x707   : > { %v4974_v23 = vpack.c.bf16 %v4972_v22, %v4972_v22  ;;  %5658 = vmatmul.mubr.msk.f32.vlgmr.msra.gmra.mrb[50].mxu1 %vm3937_vm4, %v4972_v22 }
 0x709   : > { %v4976_v54 = vrot.slane %v4974_v23, 4 }
 0x70b   : > { %4979 = vst.msk [vmem:[#allocation4 + $0x10] sm:$0xf0] %vm4978_vm14, %v4976_v54 }
 0x7da   : > { %v5065_v30 = vpop.f32.mrb[50].mxu1 }
 0x7db   : > { %v5067_v43 = vpop.f32.mrb[51].mxu1 }
 0x7dc   : > { %v5072_v61 = vcombine.low %v5065_v30, %v5067_v43 }
 0x7de   : > { %v5079_v1 = vrot.slane %v5072_v61, %v5078_v14 }
 0x7e0   : > { %v5086_v34 = vrot.slane %v5079_v1, %v5078_v14 }
 0x7e2   : > { %5092 = vst.msk [vmem:[%s312_s15] sm:$0x3] %vm5090_vm9, %v5086_v34 }
 0x7e3 PF: > { %s17_s28 = sadd.s32 1, %s6716_s28   ;;  %s8828_s24 = smov %s6708_s26 }
 0x7e4   : > { %p14_p8 = scmp.ge.s32.totalorder %s17_s28, 10   ;;  %s8829_s25 = smov %s6712_s27 }
 0x7e5   : > { %s8830_s26 = smov %s8833_s29  ;;  %s8831_s27 = smov %s8837_s30 }
 0x7e6   :  { %16 = sbr.rel (!%p14_p8) target bundleno = 3 (0x3), region = 98 }

</bundles_post_ra>
